<compile_context>
chip_gen: v6e
topology: v6e:2x2x1
jax: 0.10.0
libtpu: 0.0.40
codegen_flags: <defaults>
</compile_context>

<pallas_src>
import jax
import jax.numpy as jnp
import numpy as np
from jax.experimental import pallas as pl
from jax.experimental.pallas import tpu as pltpu


def resnet_pointnet_kernel(p_ref, fpw_ref, fpb_ref,
                           b0f0w_ref, b0f0b_ref, b0f1w_ref, b0f1b_ref,
                           b0scw_ref,
                           f0tw_ref, f0bw_ref, f0b_ref,
                           f1w_ref, f1b_ref,
                           sctw_ref, scbw_ref,
                           fcw_ref, fcb_ref, o_ref):
    Bb, T, Dp = p_ref.shape
    H = f1w_ref.shape[-1]
    rows = Bb * T

    bf16 = lambda v: v.astype(jnp.bfloat16)
    relu = lambda v: jnp.maximum(v, 0)

    def dot(a, b):                       # 2-D MXU matmul, f32 accumulation
        return jnp.dot(a, b, preferred_element_type=jnp.float32)

    def dot3(a3, w):                     # (Bb,T,K) bf16 @ (K,N) -> (Bb,T,N) f32
        k = a3.shape[-1]
        return dot(a3.reshape(rows, k), w).reshape(Bb, T, w.shape[-1])

    # ---- fc_pos over all Bb*T points at once ----
    net = dot3(p_ref[...], fpw_ref[...]) + fpb_ref[...]           # (Bb,T,2H) f32
    net_b = bf16(net)                                             # single cast

    # ---- block 0: input is the full 2H fc_pos output ----
    n0 = dot3(relu(net_b), b0f0w_ref[...]) + b0f0b_ref[...]       # fc_0
    dx = dot3(relu(bf16(n0)), b0f1w_ref[...]) + b0f1b_ref[...]    # fc_1
    net_h = dot3(net_b, b0scw_ref[...]) + dx                      # shortcut + dx

    # ---- blocks 1..4: concat([h, pooled]) folded into split weights ----
    for i in range(4):
        h_b = bf16(net_h)                                         # one cast/block
        pooled_b = bf16(jnp.max(net_h, axis=1))                   # (Bb,H)
        # fc_0: per-point half + per-sample pooled half (bias folded into small)
        bot0 = dot(relu(pooled_b), f0bw_ref[i]) + f0b_ref[i]      # (Bb,H) f32
        n0 = dot3(relu(h_b), f0tw_ref[i]) + bot0[:, None, :]
        dx = dot3(relu(bf16(n0)), f1w_ref[i]) + f1b_ref[i]        # fc_1
        # shortcut (no bias)
        xsb = dot(pooled_b, scbw_ref[i])                          # (Bb,H) f32
        net_h = dot3(h_b, sctw_ref[i]) + xsb[:, None, :] + dx

    # ---- global max-pool over points, then fc_c(relu(.)) ----
    pooled_b = bf16(jnp.max(net_h, axis=1))                       # (Bb,H)
    o_ref[...] = dot(relu(pooled_b), fcw_ref[...]) + fcb_ref[...]


def _vmem_limit_bytes():
    # Generation-aware VMEM budget: physical capacity minus headroom for Mosaic
    # internal scratch (v7x 64 MiB -> ~52 MiB; v5e/v6e 128 MiB -> 112 MiB).
    try:
        cap = int(pltpu.get_tpu_info().vmem_capacity_bytes)
        return max(32 << 20, min(cap - (12 << 20), 112 << 20))
    except Exception:
        return 48 << 20      # conservative fallback, safe on every generation


def _pick_b_block(B, T, H, Dp, Cp, weight_bytes, vmem_limit):
    # Largest batch block that (a) keeps >= 2 grid steps (two v7x TensorCores),
    # (b) fits an estimated live-VMEM budget, (c) stops once rows >= 512
    # (MXU-friendly M for the 256-wide systolic array).
    max_cand = B // 2 if B > 1 else 1
    divisors = [d for d in range(1, max_cand + 1) if B % d == 0] or [1]
    best = divisors[0]
    for d in divisors:
        rows = d * T
        act_bytes = rows * H * 40 + 2 * rows * Dp * 2 + 2 * d * Cp * 4
        if weight_bytes + act_bytes > int(0.85 * vmem_limit):
            break
        best = d
        if rows >= 512:
            break
    return best


def resnet_pointnet(p, params, b_block=None):
    B, T, D = p.shape
    H2 = params["fc_pos_w"].shape[1]
    H = H2 // 2
    C = params["fc_c_w"].shape[1]
    assert T % 8 == 0, "T (num points) should be a multiple of 8"

    # Layout plumbing (wrapper-side, mathematically a no-op).
    Dp = max(8, ((D + 7) // 8) * 8)           # pad tiny point dim
    Cp = ((C + 127) // 128) * 128             # lane-dense output
    if Cp > 128:
        Cp = ((Cp + 255) // 256) * 256        # 256-align for the 2x256 MXU

    f32, bf16 = jnp.float32, jnp.bfloat16
    p_pad = jnp.pad(p, ((0, 0), (0, 0), (0, Dp - D))).astype(bf16)
    fpw = jnp.pad(params["fc_pos_w"], ((0, Dp - D), (0, 0))).astype(bf16)
    fpb = params["fc_pos_b"].astype(f32)

    # Block 0 keeps full (2H, H) weights (input is the raw fc_pos output).
    b0f0w = params["blk_fc0_w"][0].astype(bf16)
    b0f0b = params["blk_fc0_b"][0].astype(f32)
    b0f1w = params["blk_fc1_w"][0].astype(bf16)
    b0f1b = params["blk_fc1_b"][0].astype(f32)
    b0scw = params["blk_sc_w"][0].astype(bf16)

    # Blocks 1..4: split the (2H, H) weights into top (per-point h) and bottom
    # (per-sample pooled) halves: concat([h, pooled]) @ W == h@W[:H] + pooled@W[H:].
    f0tw = params["blk_fc0_w"][1:, :H, :].astype(bf16)    # (4, H, H)
    f0bw = params["blk_fc0_w"][1:, H:, :].astype(bf16)    # (4, H, H)
    f0b = params["blk_fc0_b"][1:].astype(f32)             # (4, 1, H)
    f1w = params["blk_fc1_w"][1:].astype(bf16)            # (4, H, H)
    f1b = params["blk_fc1_b"][1:].astype(f32)             # (4, 1, H)
    sctw = params["blk_sc_w"][1:, :H, :].astype(bf16)     # (4, H, H)
    scbw = params["blk_sc_w"][1:, H:, :].astype(bf16)     # (4, H, H)

    fcw = jnp.pad(params["fc_c_w"], ((0, 0), (0, Cp - C))).astype(bf16)
    fcb = jnp.pad(params["fc_c_b"], ((0, 0), (0, Cp - C))).astype(f32)

    weights = (fpw, fpb, b0f0w, b0f0b, b0f1w, b0f1b, b0scw,
               f0tw, f0bw, f0b, f1w, f1b, sctw, scbw, fcw, fcb)
    weight_bytes = int(sum(w.size * w.dtype.itemsize for w in weights))

    vmem_limit = _vmem_limit_bytes()
    if b_block is None:
        b_block = _pick_b_block(B, T, H, Dp, Cp, weight_bytes, vmem_limit)
    assert B % b_block == 0

    flops = int(2 * B * T * (Dp * H2 + 5 * (H2 * H + H * H + H2 * H))
                + 2 * B * H * Cp)
    bytes_accessed = int(weight_bytes + p_pad.size * p_pad.dtype.itemsize
                         + B * Cp * 4)

    # Grid-invariant weights: constant index_map + single buffer -> no dead
    # double-buffer VMEM (halves the weight footprint, key for v7x 64 MiB).
    def full(shape):
        return pl.BlockSpec(shape, lambda b: (0,) * len(shape),
                            pipeline_mode=pl.Buffered(1))

    out = pl.pallas_call(
        resnet_pointnet_kernel,
        out_shape=jax.ShapeDtypeStruct((B, Cp), jnp.float32),
        grid_spec=pltpu.PrefetchScalarGridSpec(
            num_scalar_prefetch=0,
            grid=(B // b_block,),
            in_specs=[
                pl.BlockSpec((b_block, T, Dp), lambda b: (b, 0, 0)),  # points
                full((Dp, H2)), full((1, H2)),                        # fc_pos
                full((H2, H)), full((1, H)),                          # block0 fc_0
                full((H, H)), full((1, H)),                           # block0 fc_1
                full((H2, H)),                                        # block0 shortcut
                full((4, H, H)), full((4, H, H)), full((4, 1, H)),    # fc_0 top/bot/b
                full((4, H, H)), full((4, 1, H)),                     # fc_1 w/b
                full((4, H, H)), full((4, H, H)),                     # shortcut top/bot
                full((H, Cp)), full((1, Cp)),                         # fc_c
            ],
            out_specs=pl.BlockSpec((b_block, Cp), lambda b: (b, 0)),
        ),
        compiler_params=pltpu.CompilerParams(
            dimension_semantics=("parallel",),
            vmem_limit_bytes=vmem_limit),
        cost_estimate=pl.CostEstimate(flops=flops, transcendentals=0,
                                      bytes_accessed=bytes_accessed),
    )(p_pad, *weights)
    return out[:, :C]


def resnet_pointnet_ref(p, params):
    """Pure-JAX reference mirroring the PyTorch forward pass (concat form).

    Matmul operands are cast to bf16 (with f32 accumulation) to match the
    kernel's precision choices so the check can use a tight tolerance.
    """
    relu = lambda v: jnp.maximum(v, 0.0)
    bf16 = lambda v: v.astype(jnp.bfloat16)
    mm = lambda a, w: jnp.dot(bf16(a), bf16(w),
                              preferred_element_type=jnp.float32)

    net = mm(p, params["fc_pos_w"]) + params["fc_pos_b"]              # (B,T,2H)
    for i in range(5):
        n0 = mm(relu(net), params["blk_fc0_w"][i]) + params["blk_fc0_b"][i]
        dx = mm(relu(n0), params["blk_fc1_w"][i]) + params["blk_fc1_b"][i]
        xs = mm(net, params["blk_sc_w"][i])
        net_h = xs + dx
        if i < 4:
            pooled = jnp.max(net_h, axis=1, keepdims=True)
            pooled = jnp.broadcast_to(pooled, net_h.shape)
            net = jnp.concatenate([net_h, pooled], axis=2)
        else:
            net = net_h
    pooled = jnp.max(net, axis=1)                                     # (B,H)
    return mm(relu(pooled), params["fc_c_w"]) + params["fc_c_b"]      # (B,C)


def make_params(key, dim, hidden_dim, c_dim):
    # Synthetic deterministic init (shapes from ResnetPointnet.__init__).
    # NOTE: the PyTorch module zero-inits each block's fc_1.weight; here we use
    # small random weights so the whole dataflow is exercised.
    H, H2, C, D = hidden_dim, 2 * hidden_dim, c_dim, dim
    keys = jax.random.split(key, 10)
    n = lambda k, shape: (0.1 * jax.random.normal(k, shape)).astype(jnp.float32)
    return {
        "fc_pos_w": n(keys[0], (D, H2)),
        "fc_pos_b": n(keys[1], (1, H2)),
        "blk_fc0_w": n(keys[2], (5, H2, H)),
        "blk_fc0_b": n(keys[3], (5, 1, H)),
        "blk_fc1_w": n(keys[4], (5, H, H)),
        "blk_fc1_b": n(keys[5], (5, 1, H)),
        "blk_sc_w": n(keys[6], (5, H2, H)),
        "fc_c_w": n(keys[7], (H, C)),
        "fc_c_b": n(keys[8], (1, C)),
    }


if __name__ == "__main__":
    B, T, D = 16, 32, 3          # batch, num_points, point dim
    hidden_dim, c_dim = 32, 32   # small hidden / latent dims

    key = jax.random.PRNGKey(0)
    kp, kw = jax.random.split(key)
    p = jax.random.normal(kp, (B, T, D), dtype=jnp.float32)
    params = make_params(kw, D, hidden_dim, c_dim)

    out = jax.block_until_ready(resnet_pointnet(p, params))
    ref = jax.block_until_ready(resnet_pointnet_ref(p, params))

    assert out.shape == (B, c_dim)
    np.testing.assert_allclose(np.asarray(out), np.asarray(ref),
                               rtol=5e-3, atol=5e-3)
    print("KERNEL_OK")
</pallas_src>

<mosaic_0001>
module attributes {stable_mosaic.version = 11 : i64} {
  func.func @resnet_pointnet_kernel(%arg0: i32, %arg1: memref<8x32x8xbf16, #tpu.memory_space<vmem>>, %arg2: memref<8x64xbf16, #tpu.memory_space<vmem>>, %arg3: memref<1x64xf32, #tpu.memory_space<vmem>>, %arg4: memref<64x32xbf16, #tpu.memory_space<vmem>>, %arg5: memref<1x32xf32, #tpu.memory_space<vmem>>, %arg6: memref<32x32xbf16, #tpu.memory_space<vmem>>, %arg7: memref<1x32xf32, #tpu.memory_space<vmem>>, %arg8: memref<64x32xbf16, #tpu.memory_space<vmem>>, %arg9: memref<4x32x32xbf16, #tpu.memory_space<vmem>>, %arg10: memref<4x32x32xbf16, #tpu.memory_space<vmem>>, %arg11: memref<4x1x32xf32, #tpu.memory_space<vmem>>, %arg12: memref<4x32x32xbf16, #tpu.memory_space<vmem>>, %arg13: memref<4x1x32xf32, #tpu.memory_space<vmem>>, %arg14: memref<4x32x32xbf16, #tpu.memory_space<vmem>>, %arg15: memref<4x32x32xbf16, #tpu.memory_space<vmem>>, %arg16: memref<32x128xbf16, #tpu.memory_space<vmem>>, %arg17: memref<1x128xf32, #tpu.memory_space<vmem>>, %arg18: memref<8x128xf32, #tpu.memory_space<vmem>>) attributes {dimension_semantics = [#tpu.dimension_semantics<parallel>], iteration_bounds = array<i64: 2>, scalar_prefetch = 0 : i64, scratch_operands = 0 : i64, tpu.core_type = #tpu.core_type<tc>, window_params = [{transform_indices = @transform_0, window_bounds = array<i64: 8, 32, 8>}, {pipeline_mode = #tpu.pipeline_mode<synchronous>, transform_indices = @transform_1, window_bounds = array<i64: 8, 64>}, {pipeline_mode = #tpu.pipeline_mode<synchronous>, transform_indices = @transform_2, window_bounds = array<i64: 1, 64>}, {pipeline_mode = #tpu.pipeline_mode<synchronous>, transform_indices = @transform_3, window_bounds = array<i64: 64, 32>}, {pipeline_mode = #tpu.pipeline_mode<synchronous>, transform_indices = @transform_4, window_bounds = array<i64: 1, 32>}, {pipeline_mode = #tpu.pipeline_mode<synchronous>, transform_indices = @transform_5, window_bounds = array<i64: 32, 32>}, {pipeline_mode = #tpu.pipeline_mode<synchronous>, transform_indices = @transform_6, window_bounds = array<i64: 1, 32>}, {pipeline_mode = #tpu.pipeline_mode<synchronous>, transform_indices = @transform_7, window_bounds = array<i64: 64, 32>}, {pipeline_mode = #tpu.pipeline_mode<synchronous>, transform_indices = @transform_8, window_bounds = array<i64: 4, 32, 32>}, {pipeline_mode = #tpu.pipeline_mode<synchronous>, transform_indices = @transform_9, window_bounds = array<i64: 4, 32, 32>}, {pipeline_mode = #tpu.pipeline_mode<synchronous>, transform_indices = @transform_10, window_bounds = array<i64: 4, 1, 32>}, {pipeline_mode = #tpu.pipeline_mode<synchronous>, transform_indices = @transform_11, window_bounds = array<i64: 4, 32, 32>}, {pipeline_mode = #tpu.pipeline_mode<synchronous>, transform_indices = @transform_12, window_bounds = array<i64: 4, 1, 32>}, {pipeline_mode = #tpu.pipeline_mode<synchronous>, transform_indices = @transform_13, window_bounds = array<i64: 4, 32, 32>}, {pipeline_mode = #tpu.pipeline_mode<synchronous>, transform_indices = @transform_14, window_bounds = array<i64: 4, 32, 32>}, {pipeline_mode = #tpu.pipeline_mode<synchronous>, transform_indices = @transform_15, window_bounds = array<i64: 32, 128>}, {pipeline_mode = #tpu.pipeline_mode<synchronous>, transform_indices = @transform_16, window_bounds = array<i64: 1, 128>}, {transform_indices = @transform_17, window_bounds = array<i64: 8, 128>}]} {
    %c0 = arith.constant 0 : index
    %c0_0 = arith.constant 0 : index
    %c0_1 = arith.constant 0 : index
    %0 = vector.load %arg1[%c0, %c0_0, %c0_1] : memref<8x32x8xbf16, #tpu.memory_space<vmem>>, vector<8x32x8xbf16>
    %c0_2 = arith.constant 0 : index
    %c0_3 = arith.constant 0 : index
    %1 = vector.load %arg2[%c0_2, %c0_3] : memref<8x64xbf16, #tpu.memory_space<vmem>>, vector<8x64xbf16>
    %2 = vector.shape_cast %0 : vector<8x32x8xbf16> to vector<256x8xbf16>
    %cst = arith.constant dense<0.000000e+00> : vector<256x64xf32>
    %3 = tpu.matmul %2, %1, %cst {dimension_numbers = #tpu.dot_dimension_numbers<[1], [0], [0], [1], [0, 0, 1, 1], [], []>} : vector<256x8xbf16>, vector<8x64xbf16>, vector<256x64xf32> -> vector<256x64xf32>
    %4 = vector.shape_cast %3 : vector<256x64xf32> to vector<8x32x64xf32>
    %c0_4 = arith.constant 0 : index
    %c0_5 = arith.constant 0 : index
    %5 = vector.load %arg3[%c0_4, %c0_5] : memref<1x64xf32, #tpu.memory_space<vmem>>, vector<1x64xf32>
    %6 = vector.shape_cast %5 : vector<1x64xf32> to vector<1x1x64xf32>
    %7 = vector.broadcast %6 : vector<1x1x64xf32> to vector<8x32x64xf32>
    %8 = arith.addf %4, %7 : vector<8x32x64xf32>
    %9 = arith.truncf %8 : vector<8x32x64xf32> to vector<8x32x64xbf16>
    %cst_6 = arith.constant 0.000000e+00 : bf16
    %10 = vector.broadcast %cst_6 : bf16 to vector<8x32x64xbf16>
    %11 = arith.maximumf %9, %10 : vector<8x32x64xbf16>
    %c0_7 = arith.constant 0 : index
    %c0_8 = arith.constant 0 : index
    %12 = vector.load %arg4[%c0_7, %c0_8] : memref<64x32xbf16, #tpu.memory_space<vmem>>, vector<64x32xbf16>
    %13 = vector.shape_cast %11 : vector<8x32x64xbf16> to vector<256x64xbf16>
    %cst_9 = arith.constant dense<0.000000e+00> : vector<256x32xf32>
    %14 = tpu.matmul %13, %12, %cst_9 {dimension_numbers = #tpu.dot_dimension_numbers<[1], [0], [0], [1], [0, 0, 1, 1], [], []>} : vector<256x64xbf16>, vector<64x32xbf16>, vector<256x32xf32> -> vector<256x32xf32>
    %15 = vector.shape_cast %14 : vector<256x32xf32> to vector<8x32x32xf32>
    %c0_10 = arith.constant 0 : index
    %c0_11 = arith.constant 0 : index
    %16 = vector.load %arg5[%c0_10, %c0_11] : memref<1x32xf32, #tpu.memory_space<vmem>>, vector<1x32xf32>
    %17 = vector.shape_cast %16 : vector<1x32xf32> to vector<1x1x32xf32>
    %18 = vector.broadcast %17 : vector<1x1x32xf32> to vector<8x32x32xf32>
    %19 = arith.addf %15, %18 : vector<8x32x32xf32>
    %20 = arith.truncf %19 : vector<8x32x32xf32> to vector<8x32x32xbf16>
    %cst_12 = arith.constant 0.000000e+00 : bf16
    %21 = vector.broadcast %cst_12 : bf16 to vector<8x32x32xbf16>
    %22 = arith.maximumf %20, %21 : vector<8x32x32xbf16>
    %c0_13 = arith.constant 0 : index
    %c0_14 = arith.constant 0 : index
    %23 = vector.load %arg6[%c0_13, %c0_14] : memref<32x32xbf16, #tpu.memory_space<vmem>>, vector<32x32xbf16>
    %24 = vector.shape_cast %22 : vector<8x32x32xbf16> to vector<256x32xbf16>
    %cst_15 = arith.constant dense<0.000000e+00> : vector<256x32xf32>
    %25 = tpu.matmul %24, %23, %cst_15 {dimension_numbers = #tpu.dot_dimension_numbers<[1], [0], [0], [1], [0, 0, 1, 1], [], []>} : vector<256x32xbf16>, vector<32x32xbf16>, vector<256x32xf32> -> vector<256x32xf32>
    %26 = vector.shape_cast %25 : vector<256x32xf32> to vector<8x32x32xf32>
    %c0_16 = arith.constant 0 : index
    %c0_17 = arith.constant 0 : index
    %27 = vector.load %arg7[%c0_16, %c0_17] : memref<1x32xf32, #tpu.memory_space<vmem>>, vector<1x32xf32>
    %28 = vector.shape_cast %27 : vector<1x32xf32> to vector<1x1x32xf32>
    %29 = vector.broadcast %28 : vector<1x1x32xf32> to vector<8x32x32xf32>
    %30 = arith.addf %26, %29 : vector<8x32x32xf32>
    %c0_18 = arith.constant 0 : index
    %c0_19 = arith.constant 0 : index
    %31 = vector.load %arg8[%c0_18, %c0_19] : memref<64x32xbf16, #tpu.memory_space<vmem>>, vector<64x32xbf16>
    %32 = vector.shape_cast %9 : vector<8x32x64xbf16> to vector<256x64xbf16>
    %cst_20 = arith.constant dense<0.000000e+00> : vector<256x32xf32>
    %33 = tpu.matmul %32, %31, %cst_20 {dimension_numbers = #tpu.dot_dimension_numbers<[1], [0], [0], [1], [0, 0, 1, 1], [], []>} : vector<256x64xbf16>, vector<64x32xbf16>, vector<256x32xf32> -> vector<256x32xf32>
    %34 = vector.shape_cast %33 : vector<256x32xf32> to vector<8x32x32xf32>
    %35 = arith.addf %34, %30 : vector<8x32x32xf32>
    %36 = arith.truncf %35 : vector<8x32x32xf32> to vector<8x32x32xbf16>
    %cst_21 = arith.constant dense<0xFF800000> : vector<8x32xf32>
    %37 = vector.multi_reduction <maximumf>, %35, %cst_21 [1] : vector<8x32x32xf32> to vector<8x32xf32>
    %38 = arith.truncf %37 : vector<8x32xf32> to vector<8x32xbf16>
    %cst_22 = arith.constant 0.000000e+00 : bf16
    %39 = vector.broadcast %cst_22 : bf16 to vector<8x32xbf16>
    %40 = arith.maximumf %38, %39 : vector<8x32xbf16>
    %c0_23 = arith.constant 0 : index
    %c0_24 = arith.constant 0 : index
    %c0_25 = arith.constant 0 : index
    %41 = vector.load %arg10[%c0_23, %c0_24, %c0_25] : memref<4x32x32xbf16, #tpu.memory_space<vmem>>, vector<1x32x32xbf16>
    %42 = vector.shape_cast %41 : vector<1x32x32xbf16> to vector<32x32xbf16>
    %cst_26 = arith.constant dense<0.000000e+00> : vector<8x32xf32>
    %43 = tpu.matmul %40, %42, %cst_26 {dimension_numbers = #tpu.dot_dimension_numbers<[1], [0], [0], [1], [0, 0, 1, 1], [], []>} : vector<8x32xbf16>, vector<32x32xbf16>, vector<8x32xf32> -> vector<8x32xf32>
    %c0_27 = arith.constant 0 : index
    %c0_28 = arith.constant 0 : index
    %c0_29 = arith.constant 0 : index
    %44 = vector.load %arg11[%c0_27, %c0_28, %c0_29] : memref<4x1x32xf32, #tpu.memory_space<vmem>>, vector<1x1x32xf32>
    %45 = vector.shape_cast %44 : vector<1x1x32xf32> to vector<1x32xf32>
    %46 = vector.broadcast %45 : vector<1x32xf32> to vector<8x32xf32>
    %47 = arith.addf %43, %46 : vector<8x32xf32>
    %cst_30 = arith.constant 0.000000e+00 : bf16
    %48 = vector.broadcast %cst_30 : bf16 to vector<8x32x32xbf16>
    %49 = arith.maximumf %36, %48 : vector<8x32x32xbf16>
    %c0_31 = arith.constant 0 : index
    %c0_32 = arith.constant 0 : index
    %c0_33 = arith.constant 0 : index
    %50 = vector.load %arg9[%c0_31, %c0_32, %c0_33] : memref<4x32x32xbf16, #tpu.memory_space<vmem>>, vector<1x32x32xbf16>
    %51 = vector.shape_cast %50 : vector<1x32x32xbf16> to vector<32x32xbf16>
    %52 = vector.shape_cast %49 : vector<8x32x32xbf16> to vector<256x32xbf16>
    %cst_34 = arith.constant dense<0.000000e+00> : vector<256x32xf32>
    %53 = tpu.matmul %52, %51, %cst_34 {dimension_numbers = #tpu.dot_dimension_numbers<[1], [0], [0], [1], [0, 0, 1, 1], [], []>} : vector<256x32xbf16>, vector<32x32xbf16>, vector<256x32xf32> -> vector<256x32xf32>
    %54 = vector.shape_cast %53 : vector<256x32xf32> to vector<8x32x32xf32>
    %55 = vector.shape_cast %47 : vector<8x32xf32> to vector<8x1x32xf32>
    %56 = vector.broadcast %55 : vector<8x1x32xf32> to vector<8x32x32xf32>
    %57 = arith.addf %54, %56 : vector<8x32x32xf32>
    %58 = arith.truncf %57 : vector<8x32x32xf32> to vector<8x32x32xbf16>
    %cst_35 = arith.constant 0.000000e+00 : bf16
    %59 = vector.broadcast %cst_35 : bf16 to vector<8x32x32xbf16>
    %60 = arith.maximumf %58, %59 : vector<8x32x32xbf16>
    %c0_36 = arith.constant 0 : index
    %c0_37 = arith.constant 0 : index
    %c0_38 = arith.constant 0 : index
    %61 = vector.load %arg12[%c0_36, %c0_37, %c0_38] : memref<4x32x32xbf16, #tpu.memory_space<vmem>>, vector<1x32x32xbf16>
    %62 = vector.shape_cast %61 : vector<1x32x32xbf16> to vector<32x32xbf16>
    %63 = vector.shape_cast %60 : vector<8x32x32xbf16> to vector<256x32xbf16>
    %cst_39 = arith.constant dense<0.000000e+00> : vector<256x32xf32>
    %64 = tpu.matmul %63, %62, %cst_39 {dimension_numbers = #tpu.dot_dimension_numbers<[1], [0], [0], [1], [0, 0, 1, 1], [], []>} : vector<256x32xbf16>, vector<32x32xbf16>, vector<256x32xf32> -> vector<256x32xf32>
    %65 = vector.shape_cast %64 : vector<256x32xf32> to vector<8x32x32xf32>
    %c0_40 = arith.constant 0 : index
    %c0_41 = arith.constant 0 : index
    %c0_42 = arith.constant 0 : index
    %66 = vector.load %arg13[%c0_40, %c0_41, %c0_42] : memref<4x1x32xf32, #tpu.memory_space<vmem>>, vector<1x1x32xf32>
    %67 = vector.shape_cast %66 : vector<1x1x32xf32> to vector<1x32xf32>
    %68 = vector.shape_cast %67 : vector<1x32xf32> to vector<1x1x32xf32>
    %69 = vector.broadcast %68 : vector<1x1x32xf32> to vector<8x32x32xf32>
    %70 = arith.addf %65, %69 : vector<8x32x32xf32>
    %c0_43 = arith.constant 0 : index
    %c0_44 = arith.constant 0 : index
    %c0_45 = arith.constant 0 : index
    %71 = vector.load %arg15[%c0_43, %c0_44, %c0_45] : memref<4x32x32xbf16, #tpu.memory_space<vmem>>, vector<1x32x32xbf16>
    %72 = vector.shape_cast %71 : vector<1x32x32xbf16> to vector<32x32xbf16>
    %cst_46 = arith.constant dense<0.000000e+00> : vector<8x32xf32>
    %73 = tpu.matmul %38, %72, %cst_46 {dimension_numbers = #tpu.dot_dimension_numbers<[1], [0], [0], [1], [0, 0, 1, 1], [], []>} : vector<8x32xbf16>, vector<32x32xbf16>, vector<8x32xf32> -> vector<8x32xf32>
    %c0_47 = arith.constant 0 : index
    %c0_48 = arith.constant 0 : index
    %c0_49 = arith.constant 0 : index
    %74 = vector.load %arg14[%c0_47, %c0_48, %c0_49] : memref<4x32x32xbf16, #tpu.memory_space<vmem>>, vector<1x32x32xbf16>
    %75 = vector.shape_cast %74 : vector<1x32x32xbf16> to vector<32x32xbf16>
    %76 = vector.shape_cast %36 : vector<8x32x32xbf16> to vector<256x32xbf16>
    %cst_50 = arith.constant dense<0.000000e+00> : vector<256x32xf32>
    %77 = tpu.matmul %76, %75, %cst_50 {dimension_numbers = #tpu.dot_dimension_numbers<[1], [0], [0], [1], [0, 0, 1, 1], [], []>} : vector<256x32xbf16>, vector<32x32xbf16>, vector<256x32xf32> -> vector<256x32xf32>
    %78 = vector.shape_cast %77 : vector<256x32xf32> to vector<8x32x32xf32>
    %79 = vector.shape_cast %73 : vector<8x32xf32> to vector<8x1x32xf32>
    %80 = vector.broadcast %79 : vector<8x1x32xf32> to vector<8x32x32xf32>
    %81 = arith.addf %78, %80 : vector<8x32x32xf32>
    %82 = arith.addf %81, %70 : vector<8x32x32xf32>
    %83 = arith.truncf %82 : vector<8x32x32xf32> to vector<8x32x32xbf16>
    %cst_51 = arith.constant dense<0xFF800000> : vector<8x32xf32>
    %84 = vector.multi_reduction <maximumf>, %82, %cst_51 [1] : vector<8x32x32xf32> to vector<8x32xf32>
    %85 = arith.truncf %84 : vector<8x32xf32> to vector<8x32xbf16>
    %cst_52 = arith.constant 0.000000e+00 : bf16
    %86 = vector.broadcast %cst_52 : bf16 to vector<8x32xbf16>
    %87 = arith.maximumf %85, %86 : vector<8x32xbf16>
    %c1 = arith.constant 1 : index
    %c0_53 = arith.constant 0 : index
    %c0_54 = arith.constant 0 : index
    %88 = vector.load %arg10[%c1, %c0_53, %c0_54] : memref<4x32x32xbf16, #tpu.memory_space<vmem>>, vector<1x32x32xbf16>
    %89 = vector.shape_cast %88 : vector<1x32x32xbf16> to vector<32x32xbf16>
    %cst_55 = arith.constant dense<0.000000e+00> : vector<8x32xf32>
    %90 = tpu.matmul %87, %89, %cst_55 {dimension_numbers = #tpu.dot_dimension_numbers<[1], [0], [0], [1], [0, 0, 1, 1], [], []>} : vector<8x32xbf16>, vector<32x32xbf16>, vector<8x32xf32> -> vector<8x32xf32>
    %c1_56 = arith.constant 1 : index
    %c0_57 = arith.constant 0 : index
    %c0_58 = arith.constant 0 : index
    %91 = vector.load %arg11[%c1_56, %c0_57, %c0_58] : memref<4x1x32xf32, #tpu.memory_space<vmem>>, vector<1x1x32xf32>
    %92 = vector.shape_cast %91 : vector<1x1x32xf32> to vector<1x32xf32>
    %93 = vector.broadcast %92 : vector<1x32xf32> to vector<8x32xf32>
    %94 = arith.addf %90, %93 : vector<8x32xf32>
    %cst_59 = arith.constant 0.000000e+00 : bf16
    %95 = vector.broadcast %cst_59 : bf16 to vector<8x32x32xbf16>
    %96 = arith.maximumf %83, %95 : vector<8x32x32xbf16>
    %c1_60 = arith.constant 1 : index
    %c0_61 = arith.constant 0 : index
    %c0_62 = arith.constant 0 : index
    %97 = vector.load %arg9[%c1_60, %c0_61, %c0_62] : memref<4x32x32xbf16, #tpu.memory_space<vmem>>, vector<1x32x32xbf16>
    %98 = vector.shape_cast %97 : vector<1x32x32xbf16> to vector<32x32xbf16>
    %99 = vector.shape_cast %96 : vector<8x32x32xbf16> to vector<256x32xbf16>
    %cst_63 = arith.constant dense<0.000000e+00> : vector<256x32xf32>
    %100 = tpu.matmul %99, %98, %cst_63 {dimension_numbers = #tpu.dot_dimension_numbers<[1], [0], [0], [1], [0, 0, 1, 1], [], []>} : vector<256x32xbf16>, vector<32x32xbf16>, vector<256x32xf32> -> vector<256x32xf32>
    %101 = vector.shape_cast %100 : vector<256x32xf32> to vector<8x32x32xf32>
    %102 = vector.shape_cast %94 : vector<8x32xf32> to vector<8x1x32xf32>
    %103 = vector.broadcast %102 : vector<8x1x32xf32> to vector<8x32x32xf32>
    %104 = arith.addf %101, %103 : vector<8x32x32xf32>
    %105 = arith.truncf %104 : vector<8x32x32xf32> to vector<8x32x32xbf16>
    %cst_64 = arith.constant 0.000000e+00 : bf16
    %106 = vector.broadcast %cst_64 : bf16 to vector<8x32x32xbf16>
    %107 = arith.maximumf %105, %106 : vector<8x32x32xbf16>
    %c1_65 = arith.constant 1 : index
    %c0_66 = arith.constant 0 : index
    %c0_67 = arith.constant 0 : index
    %108 = vector.load %arg12[%c1_65, %c0_66, %c0_67] : memref<4x32x32xbf16, #tpu.memory_space<vmem>>, vector<1x32x32xbf16>
    %109 = vector.shape_cast %108 : vector<1x32x32xbf16> to vector<32x32xbf16>
    %110 = vector.shape_cast %107 : vector<8x32x32xbf16> to vector<256x32xbf16>
    %cst_68 = arith.constant dense<0.000000e+00> : vector<256x32xf32>
    %111 = tpu.matmul %110, %109, %cst_68 {dimension_numbers = #tpu.dot_dimension_numbers<[1], [0], [0], [1], [0, 0, 1, 1], [], []>} : vector<256x32xbf16>, vector<32x32xbf16>, vector<256x32xf32> -> vector<256x32xf32>
    %112 = vector.shape_cast %111 : vector<256x32xf32> to vector<8x32x32xf32>
    %c1_69 = arith.constant 1 : index
    %c0_70 = arith.constant 0 : index
    %c0_71 = arith.constant 0 : index
    %113 = vector.load %arg13[%c1_69, %c0_70, %c0_71] : memref<4x1x32xf32, #tpu.memory_space<vmem>>, vector<1x1x32xf32>
    %114 = vector.shape_cast %113 : vector<1x1x32xf32> to vector<1x32xf32>
    %115 = vector.shape_cast %114 : vector<1x32xf32> to vector<1x1x32xf32>
    %116 = vector.broadcast %115 : vector<1x1x32xf32> to vector<8x32x32xf32>
    %117 = arith.addf %112, %116 : vector<8x32x32xf32>
    %c1_72 = arith.constant 1 : index
    %c0_73 = arith.constant 0 : index
    %c0_74 = arith.constant 0 : index
    %118 = vector.load %arg15[%c1_72, %c0_73, %c0_74] : memref<4x32x32xbf16, #tpu.memory_space<vmem>>, vector<1x32x32xbf16>
    %119 = vector.shape_cast %118 : vector<1x32x32xbf16> to vector<32x32xbf16>
    %cst_75 = arith.constant dense<0.000000e+00> : vector<8x32xf32>
    %120 = tpu.matmul %85, %119, %cst_75 {dimension_numbers = #tpu.dot_dimension_numbers<[1], [0], [0], [1], [0, 0, 1, 1], [], []>} : vector<8x32xbf16>, vector<32x32xbf16>, vector<8x32xf32> -> vector<8x32xf32>
    %c1_76 = arith.constant 1 : index
    %c0_77 = arith.constant 0 : index
    %c0_78 = arith.constant 0 : index
    %121 = vector.load %arg14[%c1_76, %c0_77, %c0_78] : memref<4x32x32xbf16, #tpu.memory_space<vmem>>, vector<1x32x32xbf16>
    %122 = vector.shape_cast %121 : vector<1x32x32xbf16> to vector<32x32xbf16>
    %123 = vector.shape_cast %83 : vector<8x32x32xbf16> to vector<256x32xbf16>
    %cst_79 = arith.constant dense<0.000000e+00> : vector<256x32xf32>
    %124 = tpu.matmul %123, %122, %cst_79 {dimension_numbers = #tpu.dot_dimension_numbers<[1], [0], [0], [1], [0, 0, 1, 1], [], []>} : vector<256x32xbf16>, vector<32x32xbf16>, vector<256x32xf32> -> vector<256x32xf32>
    %125 = vector.shape_cast %124 : vector<256x32xf32> to vector<8x32x32xf32>
    %126 = vector.shape_cast %120 : vector<8x32xf32> to vector<8x1x32xf32>
    %127 = vector.broadcast %126 : vector<8x1x32xf32> to vector<8x32x32xf32>
    %128 = arith.addf %125, %127 : vector<8x32x32xf32>
    %129 = arith.addf %128, %117 : vector<8x32x32xf32>
    %130 = arith.truncf %129 : vector<8x32x32xf32> to vector<8x32x32xbf16>
    %cst_80 = arith.constant dense<0xFF800000> : vector<8x32xf32>
    %131 = vector.multi_reduction <maximumf>, %129, %cst_80 [1] : vector<8x32x32xf32> to vector<8x32xf32>
    %132 = arith.truncf %131 : vector<8x32xf32> to vector<8x32xbf16>
    %cst_81 = arith.constant 0.000000e+00 : bf16
    %133 = vector.broadcast %cst_81 : bf16 to vector<8x32xbf16>
    %134 = arith.maximumf %132, %133 : vector<8x32xbf16>
    %c2 = arith.constant 2 : index
    %c0_82 = arith.constant 0 : index
    %c0_83 = arith.constant 0 : index
    %135 = vector.load %arg10[%c2, %c0_82, %c0_83] : memref<4x32x32xbf16, #tpu.memory_space<vmem>>, vector<1x32x32xbf16>
    %136 = vector.shape_cast %135 : vector<1x32x32xbf16> to vector<32x32xbf16>
    %cst_84 = arith.constant dense<0.000000e+00> : vector<8x32xf32>
    %137 = tpu.matmul %134, %136, %cst_84 {dimension_numbers = #tpu.dot_dimension_numbers<[1], [0], [0], [1], [0, 0, 1, 1], [], []>} : vector<8x32xbf16>, vector<32x32xbf16>, vector<8x32xf32> -> vector<8x32xf32>
    %c2_85 = arith.constant 2 : index
    %c0_86 = arith.constant 0 : index
    %c0_87 = arith.constant 0 : index
    %138 = vector.load %arg11[%c2_85, %c0_86, %c0_87] : memref<4x1x32xf32, #tpu.memory_space<vmem>>, vector<1x1x32xf32>
    %139 = vector.shape_cast %138 : vector<1x1x32xf32> to vector<1x32xf32>
    %140 = vector.broadcast %139 : vector<1x32xf32> to vector<8x32xf32>
    %141 = arith.addf %137, %140 : vector<8x32xf32>
    %cst_88 = arith.constant 0.000000e+00 : bf16
    %142 = vector.broadcast %cst_88 : bf16 to vector<8x32x32xbf16>
    %143 = arith.maximumf %130, %142 : vector<8x32x32xbf16>
    %c2_89 = arith.constant 2 : index
    %c0_90 = arith.constant 0 : index
    %c0_91 = arith.constant 0 : index
    %144 = vector.load %arg9[%c2_89, %c0_90, %c0_91] : memref<4x32x32xbf16, #tpu.memory_space<vmem>>, vector<1x32x32xbf16>
    %145 = vector.shape_cast %144 : vector<1x32x32xbf16> to vector<32x32xbf16>
    %146 = vector.shape_cast %143 : vector<8x32x32xbf16> to vector<256x32xbf16>
    %cst_92 = arith.constant dense<0.000000e+00> : vector<256x32xf32>
    %147 = tpu.matmul %146, %145, %cst_92 {dimension_numbers = #tpu.dot_dimension_numbers<[1], [0], [0], [1], [0, 0, 1, 1], [], []>} : vector<256x32xbf16>, vector<32x32xbf16>, vector<256x32xf32> -> vector<256x32xf32>
    %148 = vector.shape_cast %147 : vector<256x32xf32> to vector<8x32x32xf32>
    %149 = vector.shape_cast %141 : vector<8x32xf32> to vector<8x1x32xf32>
    %150 = vector.broadcast %149 : vector<8x1x32xf32> to vector<8x32x32xf32>
    %151 = arith.addf %148, %150 : vector<8x32x32xf32>
    %152 = arith.truncf %151 : vector<8x32x32xf32> to vector<8x32x32xbf16>
    %cst_93 = arith.constant 0.000000e+00 : bf16
    %153 = vector.broadcast %cst_93 : bf16 to vector<8x32x32xbf16>
    %154 = arith.maximumf %152, %153 : vector<8x32x32xbf16>
    %c2_94 = arith.constant 2 : index
    %c0_95 = arith.constant 0 : index
    %c0_96 = arith.constant 0 : index
    %155 = vector.load %arg12[%c2_94, %c0_95, %c0_96] : memref<4x32x32xbf16, #tpu.memory_space<vmem>>, vector<1x32x32xbf16>
    %156 = vector.shape_cast %155 : vector<1x32x32xbf16> to vector<32x32xbf16>
    %157 = vector.shape_cast %154 : vector<8x32x32xbf16> to vector<256x32xbf16>
    %cst_97 = arith.constant dense<0.000000e+00> : vector<256x32xf32>
    %158 = tpu.matmul %157, %156, %cst_97 {dimension_numbers = #tpu.dot_dimension_numbers<[1], [0], [0], [1], [0, 0, 1, 1], [], []>} : vector<256x32xbf16>, vector<32x32xbf16>, vector<256x32xf32> -> vector<256x32xf32>
    %159 = vector.shape_cast %158 : vector<256x32xf32> to vector<8x32x32xf32>
    %c2_98 = arith.constant 2 : index
    %c0_99 = arith.constant 0 : index
    %c0_100 = arith.constant 0 : index
    %160 = vector.load %arg13[%c2_98, %c0_99, %c0_100] : memref<4x1x32xf32, #tpu.memory_space<vmem>>, vector<1x1x32xf32>
    %161 = vector.shape_cast %160 : vector<1x1x32xf32> to vector<1x32xf32>
    %162 = vector.shape_cast %161 : vector<1x32xf32> to vector<1x1x32xf32>
    %163 = vector.broadcast %162 : vector<1x1x32xf32> to vector<8x32x32xf32>
    %164 = arith.addf %159, %163 : vector<8x32x32xf32>
    %c2_101 = arith.constant 2 : index
    %c0_102 = arith.constant 0 : index
    %c0_103 = arith.constant 0 : index
    %165 = vector.load %arg15[%c2_101, %c0_102, %c0_103] : memref<4x32x32xbf16, #tpu.memory_space<vmem>>, vector<1x32x32xbf16>
    %166 = vector.shape_cast %165 : vector<1x32x32xbf16> to vector<32x32xbf16>
    %cst_104 = arith.constant dense<0.000000e+00> : vector<8x32xf32>
    %167 = tpu.matmul %132, %166, %cst_104 {dimension_numbers = #tpu.dot_dimension_numbers<[1], [0], [0], [1], [0, 0, 1, 1], [], []>} : vector<8x32xbf16>, vector<32x32xbf16>, vector<8x32xf32> -> vector<8x32xf32>
    %c2_105 = arith.constant 2 : index
    %c0_106 = arith.constant 0 : index
    %c0_107 = arith.constant 0 : index
    %168 = vector.load %arg14[%c2_105, %c0_106, %c0_107] : memref<4x32x32xbf16, #tpu.memory_space<vmem>>, vector<1x32x32xbf16>
    %169 = vector.shape_cast %168 : vector<1x32x32xbf16> to vector<32x32xbf16>
    %170 = vector.shape_cast %130 : vector<8x32x32xbf16> to vector<256x32xbf16>
    %cst_108 = arith.constant dense<0.000000e+00> : vector<256x32xf32>
    %171 = tpu.matmul %170, %169, %cst_108 {dimension_numbers = #tpu.dot_dimension_numbers<[1], [0], [0], [1], [0, 0, 1, 1], [], []>} : vector<256x32xbf16>, vector<32x32xbf16>, vector<256x32xf32> -> vector<256x32xf32>
    %172 = vector.shape_cast %171 : vector<256x32xf32> to vector<8x32x32xf32>
    %173 = vector.shape_cast %167 : vector<8x32xf32> to vector<8x1x32xf32>
    %174 = vector.broadcast %173 : vector<8x1x32xf32> to vector<8x32x32xf32>
    %175 = arith.addf %172, %174 : vector<8x32x32xf32>
    %176 = arith.addf %175, %164 : vector<8x32x32xf32>
    %177 = arith.truncf %176 : vector<8x32x32xf32> to vector<8x32x32xbf16>
    %cst_109 = arith.constant dense<0xFF800000> : vector<8x32xf32>
    %178 = vector.multi_reduction <maximumf>, %176, %cst_109 [1] : vector<8x32x32xf32> to vector<8x32xf32>
    %179 = arith.truncf %178 : vector<8x32xf32> to vector<8x32xbf16>
    %cst_110 = arith.constant 0.000000e+00 : bf16
    %180 = vector.broadcast %cst_110 : bf16 to vector<8x32xbf16>
    %181 = arith.maximumf %179, %180 : vector<8x32xbf16>
    %c3 = arith.constant 3 : index
    %c0_111 = arith.constant 0 : index
    %c0_112 = arith.constant 0 : index
    %182 = vector.load %arg10[%c3, %c0_111, %c0_112] : memref<4x32x32xbf16, #tpu.memory_space<vmem>>, vector<1x32x32xbf16>
    %183 = vector.shape_cast %182 : vector<1x32x32xbf16> to vector<32x32xbf16>
    %cst_113 = arith.constant dense<0.000000e+00> : vector<8x32xf32>
    %184 = tpu.matmul %181, %183, %cst_113 {dimension_numbers = #tpu.dot_dimension_numbers<[1], [0], [0], [1], [0, 0, 1, 1], [], []>} : vector<8x32xbf16>, vector<32x32xbf16>, vector<8x32xf32> -> vector<8x32xf32>
    %c3_114 = arith.constant 3 : index
    %c0_115 = arith.constant 0 : index
    %c0_116 = arith.constant 0 : index
    %185 = vector.load %arg11[%c3_114, %c0_115, %c0_116] : memref<4x1x32xf32, #tpu.memory_space<vmem>>, vector<1x1x32xf32>
    %186 = vector.shape_cast %185 : vector<1x1x32xf32> to vector<1x32xf32>
    %187 = vector.broadcast %186 : vector<1x32xf32> to vector<8x32xf32>
    %188 = arith.addf %184, %187 : vector<8x32xf32>
    %cst_117 = arith.constant 0.000000e+00 : bf16
    %189 = vector.broadcast %cst_117 : bf16 to vector<8x32x32xbf16>
    %190 = arith.maximumf %177, %189 : vector<8x32x32xbf16>
    %c3_118 = arith.constant 3 : index
    %c0_119 = arith.constant 0 : index
    %c0_120 = arith.constant 0 : index
    %191 = vector.load %arg9[%c3_118, %c0_119, %c0_120] : memref<4x32x32xbf16, #tpu.memory_space<vmem>>, vector<1x32x32xbf16>
    %192 = vector.shape_cast %191 : vector<1x32x32xbf16> to vector<32x32xbf16>
    %193 = vector.shape_cast %190 : vector<8x32x32xbf16> to vector<256x32xbf16>
    %cst_121 = arith.constant dense<0.000000e+00> : vector<256x32xf32>
    %194 = tpu.matmul %193, %192, %cst_121 {dimension_numbers = #tpu.dot_dimension_numbers<[1], [0], [0], [1], [0, 0, 1, 1], [], []>} : vector<256x32xbf16>, vector<32x32xbf16>, vector<256x32xf32> -> vector<256x32xf32>
    %195 = vector.shape_cast %194 : vector<256x32xf32> to vector<8x32x32xf32>
    %196 = vector.shape_cast %188 : vector<8x32xf32> to vector<8x1x32xf32>
    %197 = vector.broadcast %196 : vector<8x1x32xf32> to vector<8x32x32xf32>
    %198 = arith.addf %195, %197 : vector<8x32x32xf32>
    %199 = arith.truncf %198 : vector<8x32x32xf32> to vector<8x32x32xbf16>
    %cst_122 = arith.constant 0.000000e+00 : bf16
    %200 = vector.broadcast %cst_122 : bf16 to vector<8x32x32xbf16>
    %201 = arith.maximumf %199, %200 : vector<8x32x32xbf16>
    %c3_123 = arith.constant 3 : index
    %c0_124 = arith.constant 0 : index
    %c0_125 = arith.constant 0 : index
    %202 = vector.load %arg12[%c3_123, %c0_124, %c0_125] : memref<4x32x32xbf16, #tpu.memory_space<vmem>>, vector<1x32x32xbf16>
    %203 = vector.shape_cast %202 : vector<1x32x32xbf16> to vector<32x32xbf16>
    %204 = vector.shape_cast %201 : vector<8x32x32xbf16> to vector<256x32xbf16>
    %cst_126 = arith.constant dense<0.000000e+00> : vector<256x32xf32>
    %205 = tpu.matmul %204, %203, %cst_126 {dimension_numbers = #tpu.dot_dimension_numbers<[1], [0], [0], [1], [0, 0, 1, 1], [], []>} : vector<256x32xbf16>, vector<32x32xbf16>, vector<256x32xf32> -> vector<256x32xf32>
    %206 = vector.shape_cast %205 : vector<256x32xf32> to vector<8x32x32xf32>
    %c3_127 = arith.constant 3 : index
    %c0_128 = arith.constant 0 : index
    %c0_129 = arith.constant 0 : index
    %207 = vector.load %arg13[%c3_127, %c0_128, %c0_129] : memref<4x1x32xf32, #tpu.memory_space<vmem>>, vector<1x1x32xf32>
    %208 = vector.shape_cast %207 : vector<1x1x32xf32> to vector<1x32xf32>
    %209 = vector.shape_cast %208 : vector<1x32xf32> to vector<1x1x32xf32>
    %210 = vector.broadcast %209 : vector<1x1x32xf32> to vector<8x32x32xf32>
    %211 = arith.addf %206, %210 : vector<8x32x32xf32>
    %c3_130 = arith.constant 3 : index
    %c0_131 = arith.constant 0 : index
    %c0_132 = arith.constant 0 : index
    %212 = vector.load %arg15[%c3_130, %c0_131, %c0_132] : memref<4x32x32xbf16, #tpu.memory_space<vmem>>, vector<1x32x32xbf16>
    %213 = vector.shape_cast %212 : vector<1x32x32xbf16> to vector<32x32xbf16>
    %cst_133 = arith.constant dense<0.000000e+00> : vector<8x32xf32>
    %214 = tpu.matmul %179, %213, %cst_133 {dimension_numbers = #tpu.dot_dimension_numbers<[1], [0], [0], [1], [0, 0, 1, 1], [], []>} : vector<8x32xbf16>, vector<32x32xbf16>, vector<8x32xf32> -> vector<8x32xf32>
    %c3_134 = arith.constant 3 : index
    %c0_135 = arith.constant 0 : index
    %c0_136 = arith.constant 0 : index
    %215 = vector.load %arg14[%c3_134, %c0_135, %c0_136] : memref<4x32x32xbf16, #tpu.memory_space<vmem>>, vector<1x32x32xbf16>
    %216 = vector.shape_cast %215 : vector<1x32x32xbf16> to vector<32x32xbf16>
    %217 = vector.shape_cast %177 : vector<8x32x32xbf16> to vector<256x32xbf16>
    %cst_137 = arith.constant dense<0.000000e+00> : vector<256x32xf32>
    %218 = tpu.matmul %217, %216, %cst_137 {dimension_numbers = #tpu.dot_dimension_numbers<[1], [0], [0], [1], [0, 0, 1, 1], [], []>} : vector<256x32xbf16>, vector<32x32xbf16>, vector<256x32xf32> -> vector<256x32xf32>
    %219 = vector.shape_cast %218 : vector<256x32xf32> to vector<8x32x32xf32>
    %220 = vector.shape_cast %214 : vector<8x32xf32> to vector<8x1x32xf32>
    %221 = vector.broadcast %220 : vector<8x1x32xf32> to vector<8x32x32xf32>
    %222 = arith.addf %219, %221 : vector<8x32x32xf32>
    %223 = arith.addf %222, %211 : vector<8x32x32xf32>
    %cst_138 = arith.constant dense<0xFF800000> : vector<8x32xf32>
    %224 = vector.multi_reduction <maximumf>, %223, %cst_138 [1] : vector<8x32x32xf32> to vector<8x32xf32>
    %225 = arith.truncf %224 : vector<8x32xf32> to vector<8x32xbf16>
    %cst_139 = arith.constant 0.000000e+00 : bf16
    %226 = vector.broadcast %cst_139 : bf16 to vector<8x32xbf16>
    %227 = arith.maximumf %225, %226 : vector<8x32xbf16>
    %c0_140 = arith.constant 0 : index
    %c0_141 = arith.constant 0 : index
    %228 = vector.load %arg16[%c0_140, %c0_141] : memref<32x128xbf16, #tpu.memory_space<vmem>>, vector<32x128xbf16>
    %cst_142 = arith.constant dense<0.000000e+00> : vector<8x128xf32>
    %229 = tpu.matmul %227, %228, %cst_142 {dimension_numbers = #tpu.dot_dimension_numbers<[1], [0], [0], [1], [0, 0, 1, 1], [], []>} : vector<8x32xbf16>, vector<32x128xbf16>, vector<8x128xf32> -> vector<8x128xf32>
    %c0_143 = arith.constant 0 : index
    %c0_144 = arith.constant 0 : index
    %230 = vector.load %arg17[%c0_143, %c0_144] : memref<1x128xf32, #tpu.memory_space<vmem>>, vector<1x128xf32>
    %231 = vector.broadcast %230 : vector<1x128xf32> to vector<8x128xf32>
    %232 = arith.addf %229, %231 : vector<8x128xf32>
    %c0_145 = arith.constant 0 : index
    %c0_146 = arith.constant 0 : index
    %233 = vector.load %arg18[%c0_145, %c0_146] : memref<8x128xf32, #tpu.memory_space<vmem>>, vector<8x128xf32>
    tpu.vector_store %arg18[%c0_145, %c0_146], %232 {strides = array<i32>} : memref<8x128xf32, #tpu.memory_space<vmem>>, vector<8x128xf32>,
    return
  }
  func.func @transform_0(%arg0: i32) -> (i32, i32, i32) {
    %c0_i32 = arith.constant 0 : i32
    %c0_i32_0 = arith.constant 0 : i32
    %c0_i32_1 = arith.constant 0 : i32
    return %arg0, %c0_i32, %c0_i32_0 : i32, i32, i32
  }
  func.func @transform_1(%arg0: i32) -> (i32, i32) {
    %c0_i32 = arith.constant 0 : i32
    %c0_i32_0 = arith.constant 0 : i32
    %c0_i32_1 = arith.constant 0 : i32
    return %c0_i32, %c0_i32_0 : i32, i32
  }
  func.func @transform_2(%arg0: i32) -> (i32, i32) {
    %c0_i32 = arith.constant 0 : i32
    %c0_i32_0 = arith.constant 0 : i32
    %c0_i32_1 = arith.constant 0 : i32
    return %c0_i32, %c0_i32_0 : i32, i32
  }
  func.func @transform_3(%arg0: i32) -> (i32, i32) {
    %c0_i32 = arith.constant 0 : i32
    %c0_i32_0 = arith.constant 0 : i32
    %c0_i32_1 = arith.constant 0 : i32
    return %c0_i32, %c0_i32_0 : i32, i32
  }
  func.func @transform_4(%arg0: i32) -> (i32, i32) {
    %c0_i32 = arith.constant 0 : i32
    %c0_i32_0 = arith.constant 0 : i32
    %c0_i32_1 = arith.constant 0 : i32
    return %c0_i32, %c0_i32_0 : i32, i32
  }
  func.func @transform_5(%arg0: i32) -> (i32, i32) {
    %c0_i32 = arith.constant 0 : i32
    %c0_i32_0 = arith.constant 0 : i32
    %c0_i32_1 = arith.constant 0 : i32
    return %c0_i32, %c0_i32_0 : i32, i32
  }
  func.func @transform_6(%arg0: i32) -> (i32, i32) {
    %c0_i32 = arith.constant 0 : i32
    %c0_i32_0 = arith.constant 0 : i32
    %c0_i32_1 = arith.constant 0 : i32
    return %c0_i32, %c0_i32_0 : i32, i32
  }
  func.func @transform_7(%arg0: i32) -> (i32, i32) {
    %c0_i32 = arith.constant 0 : i32
    %c0_i32_0 = arith.constant 0 : i32
    %c0_i32_1 = arith.constant 0 : i32
    return %c0_i32, %c0_i32_0 : i32, i32
  }
  func.func @transform_8(%arg0: i32) -> (i32, i32, i32) {
    %c0_i32 = arith.constant 0 : i32
    %c0_i32_0 = arith.constant 0 : i32
    %c0_i32_1 = arith.constant 0 : i32
    %c0_i32_2 = arith.constant 0 : i32
    return %c0_i32, %c0_i32_0, %c0_i32_1 : i32, i32, i32
  }
  func.func @transform_9(%arg0: i32) -> (i32, i32, i32) {
    %c0_i32 = arith.constant 0 : i32
    %c0_i32_0 = arith.constant 0 : i32
    %c0_i32_1 = arith.constant 0 : i32
    %c0_i32_2 = arith.constant 0 : i32
    return %c0_i32, %c0_i32_0, %c0_i32_1 : i32, i32, i32
  }
  func.func @transform_10(%arg0: i32) -> (i32, i32, i32) {
    %c0_i32 = arith.constant 0 : i32
    %c0_i32_0 = arith.constant 0 : i32
    %c0_i32_1 = arith.constant 0 : i32
    %c0_i32_2 = arith.constant 0 : i32
    return %c0_i32, %c0_i32_0, %c0_i32_1 : i32, i32, i32
  }
  func.func @transform_11(%arg0: i32) -> (i32, i32, i32) {
    %c0_i32 = arith.constant 0 : i32
    %c0_i32_0 = arith.constant 0 : i32
    %c0_i32_1 = arith.constant 0 : i32
    %c0_i32_2 = arith.constant 0 : i32
    return %c0_i32, %c0_i32_0, %c0_i32_1 : i32, i32, i32
  }
  func.func @transform_12(%arg0: i32) -> (i32, i32, i32) {
    %c0_i32 = arith.constant 0 : i32
    %c0_i32_0 = arith.constant 0 : i32
    %c0_i32_1 = arith.constant 0 : i32
    %c0_i32_2 = arith.constant 0 : i32
    return %c0_i32, %c0_i32_0, %c0_i32_1 : i32, i32, i32
  }
  func.func @transform_13(%arg0: i32) -> (i32, i32, i32) {
    %c0_i32 = arith.constant 0 : i32
    %c0_i32_0 = arith.constant 0 : i32
    %c0_i32_1 = arith.constant 0 : i32
    %c0_i32_2 = arith.constant 0 : i32
    return %c0_i32, %c0_i32_0, %c0_i32_1 : i32, i32, i32
  }
  func.func @transform_14(%arg0: i32) -> (i32, i32, i32) {
    %c0_i32 = arith.constant 0 : i32
    %c0_i32_0 = arith.constant 0 : i32
    %c0_i32_1 = arith.constant 0 : i32
    %c0_i32_2 = arith.constant 0 : i32
    return %c0_i32, %c0_i32_0, %c0_i32_1 : i32, i32, i32
  }
  func.func @transform_15(%arg0: i32) -> (i32, i32) {
    %c0_i32 = arith.constant 0 : i32
    %c0_i32_0 = arith.constant 0 : i32
    %c0_i32_1 = arith.constant 0 : i32
    return %c0_i32, %c0_i32_0 : i32, i32
  }
  func.func @transform_16(%arg0: i32) -> (i32, i32) {
    %c0_i32 = arith.constant 0 : i32
    %c0_i32_0 = arith.constant 0 : i32
    %c0_i32_1 = arith.constant 0 : i32
    return %c0_i32, %c0_i32_0 : i32, i32
  }
  func.func @transform_17(%arg0: i32) -> (i32, i32) {
    %c0_i32 = arith.constant 0 : i32
    %c0_i32_0 = arith.constant 0 : i32
    return %arg0, %c0_i32 : i32, i32
  }
}

</mosaic_0001>

<bundles_post_ra>
// kernel: tpu_custom_call.1
= control target key start
LH: loop header
LB: loop body
LE: loop exit
PB: predicated region body
PF: predicated region fallthrough
CT: control target
= control target key end

     0   :  { %s11887_s0 = inlined_call_operand.vmem [shape: bf16[16,32,8], index: 0, kind: input, shape index: {}]   ;;  %s11888_s1 = inlined_call_operand.hbm [shape: bf16[8,64], index: 1, kind: input, shape index: {}]   ;;  %s11889_s2 = inlined_call_operand.hbm [shape: f32[1,64], index: 2, kind: input, shape index: {}]   ;;  %s11890_s3 = inlined_call_operand.vmem [shape: bf16[64,32], index: 3, kind: input, shape index: {}]   ;;  %s11891_s4 = inlined_call_operand.hbm [shape: f32[1,32], index: 4, kind: input, shape index: {}]   ;;  %s11892_s5 = inlined_call_operand.vmem [shape: bf16[32,32], index: 5, kind: input, shape index: {}]   ;;  %s11893_s6 = inlined_call_operand.hbm [shape: f32[1,32], index: 6, kind: input, shape index: {}]   ;;  %s11894_s7 = inlined_call_operand.vmem [shape: bf16[64,32], index: 7, kind: input, shape index: {}]   ;;  %s11895_s8 = inlined_call_operand.vmem [shape: bf16[4,32,32], index: 8, kind: input, shape index: {}]   ;;  %s11896_s9 = inlined_call_operand.vmem [shape: bf16[4,32,32], index: 9, kind: input, shape index: {}]   ;;  %s11897_s10 = inlined_call_operand.hbm [shape: f32[4,1,32], index: 10, kind: input, shape index: {}]   ;;  %s11898_s11 = inlined_call_operand.vmem [shape: bf16[4,32,32], index: 11, kind: input, shape index: {}]   ;;  %s11899_s12 = inlined_call_operand.vmem [shape: f32[4,1,32], index: 12, kind: input, shape index: {}]   ;;  %s11900_s13 = inlined_call_operand.vmem [shape: bf16[4,32,32], index: 13, kind: input, shape index: {}]   ;;  %s11901_s14 = inlined_call_operand.vmem [shape: bf16[4,32,32], index: 14, kind: input, shape index: {}]   ;;  %s11902_s15 = inlined_call_operand.vmem [shape: bf16[32,128], index: 15, kind: input, shape index: {}]   ;;  %s11903_s16 = inlined_call_operand.vmem [shape: f32[1,128], index: 16, kind: input, shape index: {}]   ;;  %s11904_s17 = inlined_call_operand.hbm [shape: f32[16,128], index: 17, kind: output, shape index: {}]  }
   0x1   :  { %11932 = sst [smem:[#allocation34_spill]] %s11887_s0 }
   0x2   :  { %11933 = sst [smem:[#allocation35_spill]] %s11888_s1 }
   0x3   :  { %11934 = sst [smem:[#allocation36_spill]] %s11889_s2 }
   0x4   :  { %22 = vsyncpa [#allocation3], 0 }
   0x5   :  { %23 = vsyncpa [#allocation6], 0 }
   0x6   :  { %24 = vsyncpa [#allocation9], 0 }
   0x7   :  { %25 = vsyncpa [#allocation4], 0 }
   0x8   :  { %27 = vsyncpa [#allocation4 + $0x1], 0  ;;  %s9491_s24 = smov 0   ;;  %s9493_s25 = smov 0  }
   0x9   :  { %s9495_s26 = smov 0   ;;  %s9497_s27 = smov 0  }
   0xa LB: > { %11935 = sst [smem:[#allocation16_spill]] %s9375_s24  ;;  %s9512_s28 = sadd.s32 4294967295, %s9387_s27   ;;  %s9387_s27 = sphi %s9497_s27, %s11988_s27   ;;  %s9383_s26 = sphi %s9495_s26, %s11990_s26   ;;  %s9379_s25 = sphi %s9493_s25, %s11992_s25   ;;  %s9375_s24 = sphi %s9491_s24, %s11991_s24  }
   0xb   : > { %11936 = sst [smem:[#allocation17_spill]] %s9383_s26  ;;  %s7617_s29 = sadd.s32 4294967294, %s9387_s27  }
   0xc   : > { %11937 = sst [smem:[#allocation18_spill]] %s9387_s27  ;;  %s9516_s0 = sadd.s32 1, %s9387_s27  }
   0xd   : > { %11938 = sst [smem:[#allocation19_spill]] %s9516_s0  ;;  %s402_s30 = sadd.s32 1, %s9383_s26 }
   0xe   : > { %s399_s18 = ssub.s32 %s9387_s27, %s9516_s0  ;;  %p412_p0 = scmp.ne.s32.totalorder %s9383_s26, %s9379_s25 }
   0xf   : > { %p400_p1 = scmp.eq.s32.totalorder %s399_s18, 0  ;;  %p413_p2 = scmp.eq.s32.totalorder %s9512_s28, 1 }
  0x10   : > { %p418_p3 = scmp.ne.s32.totalorder %s9379_s25, %s9375_s24  ;;  %p419_p4 = scmp.eq.s32.totalorder %s7617_s29, 1 }
  0x11   : > { %s9527_s19 = scalar_select %p400_p1, %s9383_s26, %s402_s30  }
  0x12   : > { %p9529_p5 = por %p413_p2, %p412_p0  ;;  %p9533_p6 = por %p419_p4, %p418_p3 }
  0x13   : > { %11939 = sst [smem:[#allocation20_spill]] %s9527_s19  ;;  %p7618_p7 = scmp.ge.s32.totalorder %s9387_s27, 1 }
  0x14   : > { %s11940_s1 = scalar_select %p9529_p5, 1, 0 }
  0x15   : > { %s11941_s20 = scalar_select %p9533_p6, 1, 0 }
  0x16   : > { %p426_p8 = scmp.lt.s32.totalorder %s9387_s27, 3  ;;  %p11910_p9 = scmp.eq.s32.totalorder %s9512_s28, 0 }
  0x17   : > { %11942 = sst [smem:[#allocation21_spill]] %s11941_s20  ;;  %s9389_s22 = smov [#allocation5]  }
  0x18   : > { %p9540_p10 = pnand %p7618_p7, %p426_p8  ;;  %s450_s23 = sshll.u32 %s9389_s22, 4  ;;  %s451_s23 = int_to_ptr.vmem [resolvable:$true] %s450_s23 }
  0x19   : > { %s9390_s29 = smov [#allocation8]   ;;  %s9391_s19 = smov [#allocation2]  }
  0x1a   : > { %s11943_s21 = scalar_select %p9540_p10, 1, 0 }
  0x1b   : > { %p9043_p11 = pneg %p9540_p10  ;;  %s478_s30 = sshll.u32 %s9390_s29, 4  ;;  %s479_s30 = int_to_ptr.vmem [resolvable:$true] %s478_s30 }
  0x1c   : > { %s439_s26 = sshll.u32 %s9391_s19, 4  ;;  %s9196_s22 = scalar_lea.vmem %s451_s23, 16  ;;  %s9552_s26 = int_to_ptr.vmem [resolvable:$true] %s439_s26 }
  0x1d   : > { %p9548_p12 = pnand %p11910_p9, %p9043_p11  ;;  %p9197_p0 = scmp.ne.s32.totalorder %s451_s23, %s9196_s22 }
  0x1e   : > { %s9203_s29 = scalar_lea.vmem %s451_s23, 32  ;;  %p9204_p3 = scmp.lt.s32.totalorder %s451_s23, %s451_s23 }
  0x1f   : > { %p9556_p13 = pneg %p9548_p12  ;;  %p9205_p4 = scmp.lt.s32.totalorder %s9203_s29, %s9196_s22 }
  0x21   : > { %p9199_p1 = pnand %p9197_p0, %p9556_p13  ;;  %p9206_p7 = por %p9205_p4, %p9204_p3 }
  0x23   : > { %p9200_p2 = pneg %p9199_p1 }
  0x25   : > { %p9207_p8 = pnand %p9206_p7, %p9200_p2 }
  0x27   : > { %9210 = shalt.err (!%p9207_p8)
}
  0x28   : > { %s11946_s2 = sld [smem:[#allocation36_spill]]  ;;  %s9222_s24 = scalar_lea.vmem %s479_s30, 16 }
  0x29   : > { %p9223_p11 = scmp.ne.s32.totalorder %s479_s30, %s9222_s24  ;;  %s9229_s27 = scalar_lea.vmem %s479_s30, 32 }
  0x2a   : > { %p9230_p0 = scmp.lt.s32.totalorder %s479_s30, %s479_s30  ;;  %p9231_p1 = scmp.lt.s32.totalorder %s9229_s27, %s9222_s24 }
  0x2b   : > { %p9225_p9 = pnand %p9223_p11, %p9556_p13 }
  0x2c   : > { %p9232_p5 = por %p9231_p1, %p9230_p0 }
  0x2d   : > { %p9226_p6 = pneg %p9225_p9 }
  0x2e   : > { %9049 = dma.hbm_to_vmem [thread:$0]  (!%p9548_p12), %s11946_s2, 16, %s451_s23, [#allocation6]  }
  0x2f   : > { %p9233_p10 = pnand %p9232_p5, %p9226_p6 }
  0x31   : > { %9236 = shalt.err (!%p9233_p10)
}
  0x32   : > { %9055 = dma.hbm_to_vmem [thread:$0]  (!%p9548_p12), %s11893_s6, 16, %s479_s30, [#allocation9]  }
  0x33   : > { %s9248_s20 = scalar_lea.vmem %s9552_s26, 64  ;;  %p9256_p4 = scmp.lt.s32.totalorder %s9552_s26, %s9552_s26 }
  0x34   : > { %p9249_p2 = scmp.ne.s32.totalorder %s9552_s26, %s9248_s20  ;;  %p9257_p7 = scmp.lt.s32.totalorder %s9248_s20, %s9248_s20 }
  0x36   : > { %p9251_p9 = pnand %p9249_p2, %p9556_p13  ;;  %p9258_p5 = por %p9257_p7, %p9256_p4 }
  0x38   : > { %p9252_p3 = pneg %p9251_p9 }
  0x3a   : > { %p9259_p6 = pnand %p9258_p5, %p9252_p3 }
  0x3c   : > { %9262 = shalt.err (!%p9259_p6)
}
  0x3d   : > { %s11947_s23 = sld [smem:[#allocation35_spill]]  ;;  %s9392_s30 = smov [#allocation7]  }
  0x3e   : > { %s464_s19 = sshll.u32 %s9392_s30, 4  ;;  %s9393_s22 = smov [#allocation10]   ;;  %s465_s19 = int_to_ptr.vmem [resolvable:$true] %s464_s19 }
  0x3f   : > { %s497_s29 = sshll.u32 %s9393_s22, 4  ;;  %s9274_s2 = scalar_lea.vmem %s465_s19, 16  ;;  %s498_s29 = int_to_ptr.vmem [resolvable:$true] %s497_s29 }
  0x40   : > { %p9275_p10 = scmp.ne.s32.totalorder %s465_s19, %s9274_s2  ;;  %s9281_s20 = scalar_lea.vmem %s465_s19, 32 }
  0x41   : > { %p9282_p0 = scmp.lt.s32.totalorder %s465_s19, %s465_s19  ;;  %p9283_p1 = scmp.lt.s32.totalorder %s9281_s20, %s9274_s2 }
  0x42   : > { %p9277_p8 = pnand %p9275_p10, %p9556_p13 }
  0x43   : > { %9046 = dma.hbm_to_vmem [thread:$0]  (!%p9548_p12), %s11947_s23, 64, %s9552_s26, [#allocation3]  }
  0x44   : > { %p9278_p11 = pneg %p9277_p8  ;;  %p9284_p2 = por %p9283_p1, %p9282_p0 }
  0x46   : > { %p9285_p9 = pnand %p9284_p2, %p9278_p11 }
  0x48   : > { %9288 = shalt.err (!%p9285_p9)
}
  0x49   : > { %9052 = dma.hbm_to_vmem [thread:$0]  (!%p9548_p12), %s11891_s4, 16, %s465_s19, [#allocation6]  }
  0x4a   : > { %s9300_s27 = scalar_lea.vmem %s498_s29, 64  ;;  %p9308_p5 = scmp.lt.s32.totalorder %s498_s29, %s498_s29 }
  0x4b   : > { %p9301_p3 = scmp.ne.s32.totalorder %s498_s29, %s9300_s27  ;;  %p9309_p6 = scmp.lt.s32.totalorder %s9300_s27, %s9300_s27 }
  0x4d   : > { %p9303_p4 = pnand %p9301_p3, %p9556_p13  ;;  %p9310_p10 = por %p9309_p6, %p9308_p5 }
  0x4f   : > { %p9304_p7 = pneg %p9303_p4 }
  0x51   : > { %p9311_p8 = pnand %p9310_p10, %p9304_p7 }
  0x53   : > { %9314 = shalt.err (!%p9311_p8)
}
  0x54   : > { %s9394_s2 = smov 16   ;;  %s9395_s23 = smov 1  }
  0x55   : > { %9058 = dma.hbm_to_vmem [thread:$0]  (!%p9548_p12), %s11897_s10, 64, %s498_s29, [#allocation9], %s9394_s2, %s9394_s2, %s9395_s23  }
  0x56   : > { %p11948_p11 = scmp.ne.s32.totalorder %s11943_s21, 0 }
  0x58   : > { %541 = sbr.rel (%p11948_p11) target bundleno = 3082 (0xc0a), region = 88 }
  0x5d   : > { %p11949_p0 = scmp.eq.s32.totalorder %s9512_s28, 0 }
  0x5f   : > { %9358 = dma.done.wait (%p11949_p0), [#allocation3], 64   ;;  %p11950_p13 = pmov %p11949_p0 }
  0x60   : > { %p11951_p1 = pmov %p11949_p0 }
  0x61   : > { %9360 = vsyncadd (%p11950_p13), [#allocation3], 4294967232 }
  0x62   : > { %9362 = dma.done.wait (%p11951_p1), [#allocation6], 32   ;;  %p11952_p2 = pmov %p11949_p0 }
  0x63   : > { %p11953_p9 = pmov %p11949_p0 }
  0x64   : > { %9364 = vsyncadd (%p11952_p2), [#allocation6], 4294967264 }
  0x65   : > { %9366 = dma.done.wait (%p11953_p9), [#allocation9], 80   ;;  %p11954_p12 = pmov %p11949_p0 }
  0x66   : > { %s7632_s0 = sshll.u32 %s9512_s28, 3  ;;  %vm780_vm0 = vcmask 1043456   ;;  %s11955_s29 = sld [smem:[#allocation34_spill]]  ;;  %vm731_vm1 = vcmask 64512   ;;  %v650_v0 = vld [vmem:[#allocation2] sm:$0xf] }
  0x67   : > { %9368 = vsyncadd (%p11954_p12), [#allocation9], 4294967216  ;;  %p611_p3 = scmp.lt.s32.totalorder %s7632_s0, 15  ;;  %9020 = vmatprep.subr.msk.bf16.mxu0 %vm780_vm0, %v650_v0  ;;  %v782_v1 = vsel %vm780_vm0, %v650_v0, 0  ;;  %v9133_v9 = vld [vmem:[%s11890_s3 + $0x18] sm:$0xff]   ;;  %v9134_v19 = vld [vmem:[%s11890_s3 + $0x10] sm:$0xff]  }
  0x68   : > { %8367 = vmatpush3.bf16.msra.mxu0 %v782_v1  ;;  %8400 = vmatprep.subr.bf16.mxu1 %v9133_v9  ;;  %v9135_v20 = vld [vmem:[%s11890_s3 + $0x8] sm:$0xff]   ;;  %v9136_v21 = vld [vmem:[%s11890_s3] sm:$0xff]   ;;  %v9137_v22 = vld [vmem:[%s11894_s7 + $0x18] sm:$0xff]   ;;  %vm1048_vm2 = vcmask 523264   ;;  %v11916_v38 = vmov 0   ;;  %vm1345_vm3 = vcmask 261120  }
  0x69   : > { %s11994_s0 = smov (!%p611_p3, %s7632_s0), 15  ;;  %8401 = vmatpush3.bf16.msra.mxu1 %v9133_v9  ;;  %v9667_v25 = vld [vmem:[#allocation5] ss:$0 sm:$0xff]  ;;  %v9141_v30 = vld [vmem:[%s11892_s5 + $0x8] sm:$0xff]   ;;  %v9138_v42 = vld [vmem:[%s11894_s7 + $0x10] sm:$0xff]   ;;  %vm9398_vm4 = vmmov 0  }
  0x6a   : > { %s8047_s21 = sshll.u32 %s11994_s0, 4  ;;  %8402 = vmatprep.subr.bf16.mxu1 %v9134_v19  ;;  %v9142_v31 = vld [vmem:[%s11892_s5] sm:$0xff]   ;;  %8440 = vmatprep.subr.bf16.mxu0 %v9141_v30  ;;  %v9139_v50 = vld [vmem:[%s11894_s7 + $0x8] sm:$0xff]   ;;  %vm2030_vm5 = vcmask 1041409   ;;  %vm2032_vm6 = vcmask 1042434   ;;  %vm2034_vm7 = vcmask 1043459  }
  0x6b   : > { %v9140_v56 = vld [vmem:[%s11894_s7] sm:$0xff]   ;;  %vm2036_vm8 = vcmask 1044484   ;;  %vm2038_vm9 = vcmask 1045509   ;;  %vm2040_vm10 = vcmask 1046534   ;;  %vm2042_vm11 = vcmask 1047559   ;;  %p11983_p7 = scmp.ne.s32.totalorder %s11940_s1, 0 }
  0x6c   : > { %s9618_s20 = scalar_lea.vmem %s11955_s29, %s8047_s21  ;;  %s607_s21 = sand.u32 1, %s9379_s25  }
  0x6d   : > { %v9117_v2 = vld [vmem:[%s9618_s20] sm:$0xff]   ;;  %v9118_v3 = vld [vmem:[%s9618_s20 + $0x8] sm:$0xff]   ;;  %v9119_v4 = vld [vmem:[%s9618_s20 + $0x10] sm:$0xff]   ;;  %8403 = vmatpush3.bf16.msra.mxu1 %v9134_v19  ;;  %s7631_s18 = sshll.u32 %s607_s21, 3  ;;  %s7495_s30 = scalar_lea.sflag [#allocation4], %s607_s21 }
  0x6e   : > { %8368 = vmatprep.mubr.msk.bf16.mxu0 %vm731_vm1, %v9117_v2  ;;  %v9120_v5 = vld [vmem:[%s9618_s20 + $0x18] sm:$0xff]   ;;  %v9121_v6 = vld [vmem:[%s9618_s20 + $0x20] sm:$0xff]   ;;  %v9122_v7 = vld [vmem:[%s9618_s20 + $0x28] sm:$0xff]   ;;  %8404 = vmatprep.subr.bf16.mxu1 %v9135_v20  ;;  %s609_s24 = scalar_lea.vmem [#allocation11], %s7631_s18 }
  0x6f   : > { %8369 = vmatmul.mubr.msk.bf16.vlgmr.msra.gmra.mxu0 %vm731_vm1, %v9118_v3  ;;  %v9123_v8 = vld [vmem:[%s9618_s20 + $0x30] sm:$0xff]   ;;  %v9124_v10 = vld [vmem:[%s9618_s20 + $0x38] sm:$0xff]   ;;  %v9125_v11 = vld [vmem:[%s9618_s20 + $0x40] sm:$0xff]   ;;  %s7508_s26 = sshll.u32 %s609_s24, 4  ;;  %s11848_s26 = int_to_ptr.vmem [resolvable:$true] %s7508_s26 }
  0x70   : > { %8372 = vmatprep.mubr.msk.bf16.mxu0 %vm731_vm1, %v9119_v4  ;;  %v9126_v12 = vld [vmem:[%s9618_s20 + $0x48] sm:$0xff]   ;;  %v9127_v13 = vld [vmem:[%s9618_s20 + $0x50] sm:$0xff]   ;;  %v9128_v14 = vld [vmem:[%s9618_s20 + $0x58] sm:$0xff]   ;;  %8441 = vmatpush3.bf16.msra.mxu0 %v9141_v30  ;;  %s9315_s22 = scalar_lea.vmem %s11848_s26, 128 }
  0x71   : > { %v9129_v15 = vld [vmem:[%s9618_s20 + $0x60] sm:$0xff]   ;;  %v9130_v16 = vld [vmem:[%s9618_s20 + $0x68] sm:$0xff]   ;;  %v9131_v17 = vld [vmem:[%s9618_s20 + $0x70] sm:$0xff]   ;;  %8405 = vmatpush3.bf16.msra.mxu1 %v9135_v20  ;;  %8442 = vmatprep.subr.bf16.mxu0 %v9142_v31  ;;  %p9316_p4 = scmp.ne.s32.totalorder %s11848_s26, %s9315_s22 }
  0x72   : > { %v9132_v18 = vld [vmem:[%s9618_s20 + $0x78] sm:$0xff]   ;;  %8406 = vmatprep.subr.bf16.mxu1 %v9136_v21  ;;  %s8044_s20 = sshll.u32 %s9512_s28, 7  ;;  %s9400_s28 = smov [#allocation11]  }
  0x73   : > { %s11846_s23 = scalar_lea.hbm %s11904_s17, %s8044_s20  ;;  %p9317_p5 = pnand %p9316_p4, %p11983_p7 }
  0x74   : > { %8443 = vmatpush3.bf16.msra.mxu0 %v9142_v31  ;;  %s9319_s0 = sshll.u32 %s9400_s28, 4  ;;  %s9320_s0 = int_to_ptr.vmem [resolvable:$false] %s9319_s0 }
  0x75   : > { %8407 = vmatpush3.bf16.msra.mxu1 %v9136_v21  ;;  %p9318_p6 = pneg %p9317_p5  ;;  %s9321_s18 = scalar_lea.vmem %s9320_s0, 256 }
  0x76   : > { %8476 = vmatprep.subr.bf16.mxu1 %v9137_v22  ;;  %p9322_p10 = scmp.lt.s32.totalorder %s11848_s26, %s9320_s0  ;;  %p9323_p8 = scmp.lt.s32.totalorder %s9321_s18, %s9315_s22 }
  0x77   : > { %8373 = vmatmul.mubr.msk.bf16.gmra.mxu0 %vm731_vm1, %v9120_v5 }
  0x78   : > { %8376 = vmatprep.mubr.msk.bf16.mxu0 %vm731_vm1, %v9121_v6  ;;  %p9324_p11 = por %p9323_p8, %p9322_p10 }
  0x7a   : > { %p9325_p0 = pnand %p9324_p11, %p9318_p6 }
  0x7f   : > { %8377 = vmatmul.mubr.msk.bf16.gmra.mxu0 %vm731_vm1, %v9122_v7 }
  0x80   : > { %8380 = vmatprep.mubr.msk.bf16.mxu0 %vm731_vm1, %v9123_v8 }
  0x87   : > { %8381 = vmatmul.mubr.msk.bf16.gmra.mxu0 %vm731_vm1, %v9124_v10 }
  0x88   : > { %8384 = vmatprep.mubr.msk.bf16.mxu0 %vm731_vm1, %v9125_v11 }
  0x8f   : > { %8385 = vmatmul.mubr.msk.bf16.gmra.mxu0 %vm731_vm1, %v9126_v12 }
  0x90   : > { %8388 = vmatprep.mubr.msk.bf16.mxu0 %vm731_vm1, %v9127_v13 }
  0x97   : > { %8389 = vmatmul.mubr.msk.bf16.gmra.mxu0 %vm731_vm1, %v9128_v14 }
  0x98   : > { %8392 = vmatprep.mubr.msk.bf16.mxu0 %vm731_vm1, %v9129_v15 }
  0x9f   : > { %8393 = vmatmul.mubr.msk.bf16.gmra.mxu0 %vm731_vm1, %v9130_v16 }
  0xa0   : > { %8396 = vmatprep.mubr.msk.bf16.mxu0 %vm731_vm1, %v9131_v17 }
  0xa7   : > { %8397 = vmatmul.mubr.msk.bf16.gmra.mxu0 %vm731_vm1, %v9132_v18 }
 0x12f   : > { %v8370_v23 = vpop.f32.mrf.mxu0 }
 0x130   : > { %v954_v28 = vadd.f32 %v8370_v23, %v9667_v25 }
 0x131   : > { %v818_v24 = vpop.f32.mrf.mxu0 }
 0x132   : > { %v952_v32 = vadd.f32 %v9667_v25, %v818_v24 }
 0x133   : > { %v8371_v26 = vpop.f32.mrf.mxu0 }
 0x134   : > { %v955_v27 = vadd.f32 %v8371_v26, %v9667_v25 }
 0x135   : > { %v821_v29 = vpop.f32.mrf.mxu0 }
 0x136   : > { %v953_v33 = vadd.f32 %v9667_v25, %v821_v29  ;;  %v9679_v34 = vpack.c.bf16 %v955_v27, %v954_v28 }
 0x137   : > { %v8374_v35 = vpop.f32.mrf.mxu0 }
 0x138   : > { %v9681_v36 = vpack.c.bf16 %v953_v33, %v952_v32  ;;  %v1001_v40 = vmax.bf16 %v11916_v38, %v9679_v34  ;;  %v958_v44 = vadd.f32 %v8374_v35, %v9667_v25 }
 0x139   : > { %v834_v37 = vpop.f32.mrf.mxu0 }
 0x13a   : > { %v1000_v39 = vmax.bf16 %v11916_v38, %v9681_v36  ;;  %v956_v46 = vadd.f32 %v9667_v25, %v834_v37 }
 0x13b   : > { %v8375_v41 = vpop.f32.mrf.mxu0 }
 0x13c   : > { %v959_v43 = vadd.f32 %v8375_v41, %v9667_v25  ;;  %8408 = vmatprep.mubr.msk.bf16.mxu1 %vm1048_vm2, %v1000_v39 }
 0x13d   : > { %v837_v45 = vpop.f32.mrf.mxu0  ;;  %8409 = vmatmul.mubr.msk.bf16.vlgmr.msra.gmra.mxu1 %vm1048_vm2, %v1001_v40 }
 0x13e   : > { %v957_v47 = vadd.f32 %v9667_v25, %v837_v45  ;;  %8477 = vmatpush3.bf16.msra.mxu1 %v9137_v22  ;;  %v9696_v48 = vpack.c.bf16 %v959_v43, %v958_v44 }
 0x13f   : > { %v8378_v49 = vpop.f32.mrf.mxu0  ;;  %8478 = vmatprep.subr.bf16.mxu1 %v9138_v42 }
 0x140   : > { %v9701_v51 = vpack.c.bf16 %v957_v47, %v956_v46  ;;  %v1003_v54 = vmax.bf16 %v11916_v38, %v9696_v48  ;;  %v962_v58 = vadd.f32 %v8378_v49, %v9667_v25 }
 0x141   : > { %v850_v52 = vpop.f32.mrf.mxu0 }
 0x142   : > { %v1002_v53 = vmax.bf16 %v11916_v38, %v9701_v51  ;;  %8479 = vmatpush3.bf16.msra.mxu1 %v9138_v42  ;;  %v960_v60 = vadd.f32 %v9667_v25, %v850_v52 }
 0x143   : > { %v8379_v55 = vpop.f32.mrf.mxu0  ;;  %8480 = vmatprep.subr.bf16.mxu1 %v9139_v50 }
 0x144   : > { %v963_v57 = vadd.f32 %v8379_v55, %v9667_v25  ;;  %8412 = vmatprep.mubr.msk.bf16.mxu1 %vm1048_vm2, %v1002_v53 }
 0x145   : > { %v853_v59 = vpop.f32.mrf.mxu0  ;;  %8413 = vmatmul.mubr.msk.bf16.gmra.mxu1 %vm1048_vm2, %v1003_v54 }
 0x146   : > { %v961_v61 = vadd.f32 %v9667_v25, %v853_v59  ;;  %8481 = vmatpush3.bf16.msra.mxu1 %v9139_v50  ;;  %v9716_v62 = vpack.c.bf16 %v963_v57, %v962_v58 }
 0x147   : > { %v8382_v63 = vpop.f32.mrf.mxu0  ;;  %8482 = vmatprep.subr.bf16.mxu1 %v9140_v56 }
 0x148   : > { %v9718_v0 = vpack.c.bf16 %v961_v61, %v960_v60  ;;  %v1005_v3 = vmax.bf16 %v11916_v38, %v9716_v62  ;;  %v966_v6 = vadd.f32 %v8382_v63, %v9667_v25 }
 0x149   : > { %v866_v1 = vpop.f32.mrf.mxu0 }
 0x14a   : > { %v1004_v2 = vmax.bf16 %v11916_v38, %v9718_v0  ;;  %8483 = vmatpush3.bf16.msra.mxu1 %v9140_v56  ;;  %v964_v8 = vadd.f32 %v9667_v25, %v866_v1 }
 0x14b   : > { %v8383_v4 = vpop.f32.mrf.mxu0 }
 0x14c   : > { %v967_v5 = vadd.f32 %v8383_v4, %v9667_v25  ;;  %8416 = vmatprep.mubr.msk.bf16.mxu1 %vm1048_vm2, %v1004_v2 }
 0x14d   : > { %v869_v7 = vpop.f32.mrf.mxu0  ;;  %8417 = vmatmul.mubr.msk.bf16.gmra.mxu1 %vm1048_vm2, %v1005_v3 }
 0x14e   : > { %v965_v9 = vadd.f32 %v9667_v25, %v869_v7  ;;  %v9730_v10 = vpack.c.bf16 %v967_v5, %v966_v6 }
 0x14f   : > { %v8386_v11 = vpop.f32.mrf.mxu0 }
 0x150   : > { %v9732_v12 = vpack.c.bf16 %v965_v9, %v964_v8  ;;  %v1007_v15 = vmax.bf16 %v11916_v38, %v9730_v10  ;;  %v970_v18 = vadd.f32 %v8386_v11, %v9667_v25 }
 0x151   : > { %v882_v13 = vpop.f32.mrf.mxu0 }
 0x152   : > { %v1006_v14 = vmax.bf16 %v11916_v38, %v9732_v12  ;;  %v968_v20 = vadd.f32 %v9667_v25, %v882_v13 }
 0x153   : > { %v8387_v16 = vpop.f32.mrf.mxu0 }
 0x154   : > { %v971_v17 = vadd.f32 %v8387_v16, %v9667_v25  ;;  %8420 = vmatprep.mubr.msk.bf16.mxu1 %vm1048_vm2, %v1006_v14 }
 0x155   : > { %v885_v19 = vpop.f32.mrf.mxu0  ;;  %8421 = vmatmul.mubr.msk.bf16.gmra.mxu1 %vm1048_vm2, %v1007_v15 }
 0x156   : > { %v969_v21 = vadd.f32 %v9667_v25, %v885_v19  ;;  %v993_v22 = vpack.c.bf16 %v971_v17, %v970_v18 }
 0x157   : > { %v8390_v23 = vpop.f32.mrf.mxu0 }
 0x158   : > { %v992_v24 = vpack.c.bf16 %v969_v21, %v968_v20  ;;  %v1009_v28 = vmax.bf16 %v11916_v38, %v993_v22  ;;  %v974_v31 = vadd.f32 %v8390_v23, %v9667_v25 }
 0x159   : > { %v898_v26 = vpop.f32.mrf.mxu0 }
 0x15a   : > { %v1008_v27 = vmax.bf16 %v11916_v38, %v992_v24  ;;  %v972_v33 = vadd.f32 %v9667_v25, %v898_v26 }
 0x15b   : > { %v8391_v29 = vpop.f32.mrf.mxu0 }
 0x15c   : > { %v975_v30 = vadd.f32 %v8391_v29, %v9667_v25  ;;  %8424 = vmatprep.mubr.msk.bf16.mxu1 %vm1048_vm2, %v1008_v27 }
 0x15d   : > { %v901_v32 = vpop.f32.mrf.mxu0  ;;  %8425 = vmatmul.mubr.msk.bf16.gmra.mxu1 %vm1048_vm2, %v1009_v28 }
 0x15e   : > { %v973_v35 = vadd.f32 %v9667_v25, %v901_v32  ;;  %v995_v37 = vpack.c.bf16 %v975_v30, %v974_v31 }
 0x15f   : > { %v8394_v39 = vpop.f32.mrf.mxu0 }
 0x160   : > { %v994_v40 = vpack.c.bf16 %v973_v35, %v972_v33  ;;  %v1011_v43 = vmax.bf16 %v11916_v38, %v995_v37  ;;  %v978_v46 = vadd.f32 %v8394_v39, %v9667_v25 }
 0x161   : > { %v914_v41 = vpop.f32.mrf.mxu0 }
 0x162   : > { %v1010_v42 = vmax.bf16 %v11916_v38, %v994_v40  ;;  %v976_v49 = vadd.f32 %v9667_v25, %v914_v41 }
 0x163   : > { %v8395_v44 = vpop.f32.mrf.mxu0 }
 0x164   : > { %v979_v45 = vadd.f32 %v8395_v44, %v9667_v25  ;;  %8428 = vmatprep.mubr.msk.bf16.mxu1 %vm1048_vm2, %v1010_v42 }
 0x165   : > { %v917_v47 = vpop.f32.mrf.mxu0  ;;  %8429 = vmatmul.mubr.msk.bf16.gmra.mxu1 %vm1048_vm2, %v1011_v43 }
 0x166   : > { %v977_v50 = vadd.f32 %v9667_v25, %v917_v47  ;;  %v997_v52 = vpack.c.bf16 %v979_v45, %v978_v46 }
 0x167   : > { %v8398_v53 = vpop.f32.mrf.mxu0 }
 0x168   : > { %v996_v54 = vpack.c.bf16 %v977_v50, %v976_v49  ;;  %v1013_v57 = vmax.bf16 %v11916_v38, %v997_v52  ;;  %v982_v60 = vadd.f32 %v8398_v53, %v9667_v25 }
 0x169   : > { %v930_v55 = vpop.f32.mrf.mxu0 }
 0x16a   : > { %v1012_v56 = vmax.bf16 %v11916_v38, %v996_v54  ;;  %v980_v63 = vadd.f32 %v9667_v25, %v930_v55 }
 0x16b   : > { %v8399_v58 = vpop.f32.mrf.mxu0 }
 0x16c   : > { %v983_v59 = vadd.f32 %v8399_v58, %v9667_v25  ;;  %8432 = vmatprep.mubr.msk.bf16.mxu1 %vm1048_vm2, %v1012_v56 }
 0x16d   : > { %v933_v61 = vpop.f32.mrf.mxu0  ;;  %8433 = vmatmul.mubr.msk.bf16.gmra.mxu1 %vm1048_vm2, %v1013_v57 }
 0x16e   : > { %v981_v1 = vadd.f32 %v9667_v25, %v933_v61  ;;  %v999_v2 = vpack.c.bf16 %v983_v59, %v982_v60 }
 0x170   : > { %v998_v3 = vpack.c.bf16 %v981_v1, %v980_v63  ;;  %v1015_v5 = vmax.bf16 %v11916_v38, %v999_v2 }
 0x172   : > { %v1014_v4 = vmax.bf16 %v11916_v38, %v998_v3 }
 0x174   : > { %8436 = vmatprep.mubr.msk.bf16.mxu1 %vm1048_vm2, %v1014_v4 }
 0x175   : > { %8437 = vmatmul.mubr.msk.bf16.gmra.mxu1 %vm1048_vm2, %v1015_v5 }
 0x176   : > { %8484 = vmatprep.mubr.msk.bf16.mxu1 %vm1048_vm2, %v9681_v36  ;;  %v9796_v36 = vld [vmem:[#allocation7] ss:$0 sm:$0xff] }
 0x17d   : > { %8485 = vmatmul.mubr.msk.bf16.vlgmr.msra.gmra.mxu1 %vm1048_vm2, %v9679_v34 }
 0x17e   : > { %8488 = vmatprep.mubr.msk.bf16.mxu1 %vm1048_vm2, %v9701_v51 }
 0x185   : > { %8489 = vmatmul.mubr.msk.bf16.gmra.mxu1 %vm1048_vm2, %v9696_v48 }
 0x186   : > { %8492 = vmatprep.mubr.msk.bf16.mxu1 %vm1048_vm2, %v9718_v0 }
 0x18d   : > { %8493 = vmatmul.mubr.msk.bf16.gmra.mxu1 %vm1048_vm2, %v9716_v62 }
 0x18e   : > { %8496 = vmatprep.mubr.msk.bf16.mxu1 %vm1048_vm2, %v9732_v12 }
 0x195   : > { %8497 = vmatmul.mubr.msk.bf16.gmra.mxu1 %vm1048_vm2, %v9730_v10 }
 0x196   : > { %8500 = vmatprep.mubr.msk.bf16.mxu1 %vm1048_vm2, %v992_v24 }
 0x19d   : > { %8501 = vmatmul.mubr.msk.bf16.gmra.mxu1 %vm1048_vm2, %v993_v22 }
 0x19e   : > { %8504 = vmatprep.mubr.msk.bf16.mxu1 %vm1048_vm2, %v994_v40 }
 0x1a5   : > { %8505 = vmatmul.mubr.msk.bf16.gmra.mxu1 %vm1048_vm2, %v995_v37 }
 0x1a6   : > { %8508 = vmatprep.mubr.msk.bf16.mxu1 %vm1048_vm2, %v996_v54 }
 0x1ad   : > { %8509 = vmatmul.mubr.msk.bf16.gmra.mxu1 %vm1048_vm2, %v997_v52 }
 0x1ae   : > { %8512 = vmatprep.mubr.msk.bf16.mxu1 %vm1048_vm2, %v998_v3 }
 0x1b5   : > { %8513 = vmatmul.mubr.msk.bf16.gmra.mxu1 %vm1048_vm2, %v999_v2 }
 0x1fd   : > { %v8410_v25 = vpop.f32.mrf.mxu1 }
 0x1fe   : > { %v1267_v62 = vadd.f32 %v8410_v25, %v9796_v36 }
 0x1ff   : > { %v1131_v34 = vpop.f32.mrf.mxu1 }
 0x200   : > { %v1265_v6 = vadd.f32 %v9796_v36, %v1131_v34 }
 0x201   : > { %v8411_v48 = vpop.f32.mrf.mxu1 }
 0x202   : > { %v1268_v51 = vadd.f32 %v8411_v48, %v9796_v36 }
 0x203   : > { %v1134_v0 = vpop.f32.mrf.mxu1 }
 0x204   : > { %v1266_v7 = vadd.f32 %v9796_v36, %v1134_v0  ;;  %v1298_v8 = vpack.c.bf16 %v1268_v51, %v1267_v62 }
 0x205   : > { %v8414_v9 = vpop.f32.mrf.mxu1 }
 0x206   : > { %v1297_v10 = vpack.c.bf16 %v1266_v7, %v1265_v6  ;;  %v1314_v13 = vmax.bf16 %v11916_v38, %v1298_v8  ;;  %v1271_v16 = vadd.f32 %v8414_v9, %v9796_v36 }
 0x207   : > { %v1147_v11 = vpop.f32.mrf.mxu1 }
 0x208   : > { %v1313_v12 = vmax.bf16 %v11916_v38, %v1297_v10  ;;  %v1269_v18 = vadd.f32 %v9796_v36, %v1147_v11 }
 0x209   : > { %v8415_v14 = vpop.f32.mrf.mxu1 }
 0x20a   : > { %v1272_v15 = vadd.f32 %v8415_v14, %v9796_v36  ;;  %8444 = vmatprep.mubr.msk.bf16.mxu0 %vm1345_vm3, %v1313_v12 }
 0x20b   : > { %v1150_v17 = vpop.f32.mrf.mxu1  ;;  %8445 = vmatmul.mubr.msk.bf16.vlgmr.msra.gmra.mxu0 %vm1345_vm3, %v1314_v13 }
 0x20c   : > { %v1270_v19 = vadd.f32 %v9796_v36, %v1150_v17  ;;  %v1300_v20 = vpack.c.bf16 %v1272_v15, %v1271_v16 }
 0x20d   : > { %v8418_v21 = vpop.f32.mrf.mxu1 }
 0x20e   : > { %v1299_v22 = vpack.c.bf16 %v1270_v19, %v1269_v18  ;;  %v1316_v26 = vmax.bf16 %v11916_v38, %v1300_v20  ;;  %v1275_v29 = vadd.f32 %v8418_v21, %v9796_v36 }
 0x20f   : > { %v1163_v23 = vpop.f32.mrf.mxu1 }
 0x210   : > { %v1315_v24 = vmax.bf16 %v11916_v38, %v1299_v22  ;;  %v1273_v31 = vadd.f32 %v9796_v36, %v1163_v23 }
 0x211   : > { %v8419_v27 = vpop.f32.mrf.mxu1 }
 0x212   : > { %v1276_v28 = vadd.f32 %v8419_v27, %v9796_v36  ;;  %8448 = vmatprep.mubr.msk.bf16.mxu0 %vm1345_vm3, %v1315_v24 }
 0x213   : > { %v1166_v30 = vpop.f32.mrf.mxu1  ;;  %8449 = vmatmul.mubr.msk.bf16.gmra.mxu0 %vm1345_vm3, %v1316_v26 }
 0x214   : > { %v1274_v32 = vadd.f32 %v9796_v36, %v1166_v30  ;;  %v1302_v33 = vpack.c.bf16 %v1276_v28, %v1275_v29 }
 0x215   : > { %v8422_v35 = vpop.f32.mrf.mxu1 }
 0x216   : > { %v1301_v37 = vpack.c.bf16 %v1274_v32, %v1273_v31  ;;  %v1318_v41 = vmax.bf16 %v11916_v38, %v1302_v33  ;;  %v1279_v44 = vadd.f32 %v8422_v35, %v9796_v36 }
 0x217   : > { %v1179_v39 = vpop.f32.mrf.mxu1 }
 0x218   : > { %v1317_v40 = vmax.bf16 %v11916_v38, %v1301_v37  ;;  %v1277_v46 = vadd.f32 %v9796_v36, %v1179_v39  ;;  %v9143_v37 = vld [vmem:[%s11895_s8 + $0x8] sm:$0xff]  }
 0x219   : > { %v8423_v42 = vpop.f32.mrf.mxu1  ;;  %8524 = vmatprep.subr.bf16.mxu0 %v9143_v37  ;;  %v9145_v39 = vld [vmem:[%s11896_s9 + $0x8] sm:$0xff]  }
 0x21a   : > { %v1280_v43 = vadd.f32 %v8423_v42, %v9796_v36  ;;  %8452 = vmatprep.mubr.msk.bf16.mxu0 %vm1345_vm3, %v1317_v40  ;;  %8525 = vmatpush3.bf16.msra.mxu0 %v9143_v37  ;;  %v11914_v40 = vmov 0.0  }
 0x21b   : > { %v1182_v45 = vpop.f32.mrf.mxu1  ;;  %8453 = vmatmul.mubr.msk.bf16.gmra.mxu0 %vm1345_vm3, %v1318_v41  ;;  %8516 = vmatprep.subr.bf16.mxu1 %v11914_v40 }
 0x21c   : > { %v1278_v47 = vadd.f32 %v9796_v36, %v1182_v45  ;;  %v1304_v49 = vpack.c.bf16 %v1280_v43, %v1279_v44  ;;  %8517 = vmatpush3.bf16.msra.mxu1 %v9145_v39  ;;  %8520 = vmatprep.mubr.msk.bf16.mxu1 %vm9398_vm4, %v11914_v40 }
 0x21d   : > { %v8426_v50 = vpop.f32.mrf.mxu1  ;;  %8518 = vmatprep.subr.bf16.mxu1 %v11914_v40 }
 0x21e   : > { %v1303_v52 = vpack.c.bf16 %v1278_v47, %v1277_v46  ;;  %v1320_v55 = vmax.bf16 %v11916_v38, %v1304_v49  ;;  %v1283_v58 = vadd.f32 %v8426_v50, %v9796_v36  ;;  %v9146_v47 = vld [vmem:[%s11896_s9] sm:$0xff]  }
 0x21f   : > { %v1195_v53 = vpop.f32.mrf.mxu1 }
 0x220   : > { %v1319_v54 = vmax.bf16 %v11916_v38, %v1303_v52  ;;  %v1281_v60 = vadd.f32 %v9796_v36, %v1195_v53  ;;  %8519 = vmatpush3.bf16.msra.mxu1 %v9146_v47 }
 0x221   : > { %v8427_v56 = vpop.f32.mrf.mxu1 }
 0x222   : > { %v1284_v57 = vadd.f32 %v8427_v56, %v9796_v36  ;;  %8456 = vmatprep.mubr.msk.bf16.mxu0 %vm1345_vm3, %v1319_v54 }
 0x223   : > { %v1198_v59 = vpop.f32.mrf.mxu1  ;;  %8457 = vmatmul.mubr.msk.bf16.gmra.mxu0 %vm1345_vm3, %v1320_v55 }
 0x224   : > { %v1282_v61 = vadd.f32 %v9796_v36, %v1198_v59  ;;  %v1306_v63 = vpack.c.bf16 %v1284_v57, %v1283_v58 }
 0x225   : > { %v8430_v1 = vpop.f32.mrf.mxu1 }
 0x226   : > { %v1305_v2 = vpack.c.bf16 %v1282_v61, %v1281_v60  ;;  %v1322_v5 = vmax.bf16 %v11916_v38, %v1306_v63  ;;  %v1287_v48 = vadd.f32 %v8430_v1, %v9796_v36  ;;  %v9893_v61 = vld [vmem:[#allocation8] ss:$0 sm:$0xff] }
 0x227   : > { %v1211_v3 = vpop.f32.mrf.mxu1 }
 0x228   : > { %v1321_v4 = vmax.bf16 %v11916_v38, %v1305_v2  ;;  %v1285_v62 = vadd.f32 %v9796_v36, %v1211_v3 }
 0x229   : > { %v8431_v25 = vpop.f32.mrf.mxu1 }
 0x22a   : > { %v1288_v34 = vadd.f32 %v8431_v25, %v9796_v36  ;;  %8460 = vmatprep.mubr.msk.bf16.mxu0 %vm1345_vm3, %v1321_v4 }
 0x22b   : > { %v1214_v51 = vpop.f32.mrf.mxu1  ;;  %8461 = vmatmul.mubr.msk.bf16.gmra.mxu0 %vm1345_vm3, %v1322_v5 }
 0x22c   : > { %v1286_v0 = vadd.f32 %v9796_v36, %v1214_v51  ;;  %v1308_v6 = vpack.c.bf16 %v1288_v34, %v1287_v48 }
 0x22d   : > { %v8434_v7 = vpop.f32.mrf.mxu1 }
 0x22e   : > { %v1307_v8 = vpack.c.bf16 %v1286_v0, %v1285_v62  ;;  %v1324_v11 = vmax.bf16 %v11916_v38, %v1308_v6  ;;  %v1291_v14 = vadd.f32 %v8434_v7, %v9796_v36 }
 0x22f   : > { %v1227_v9 = vpop.f32.mrf.mxu1 }
 0x230   : > { %v1323_v10 = vmax.bf16 %v11916_v38, %v1307_v8  ;;  %v1289_v16 = vadd.f32 %v9796_v36, %v1227_v9 }
 0x231   : > { %v8435_v12 = vpop.f32.mrf.mxu1 }
 0x232   : > { %v1292_v13 = vadd.f32 %v8435_v12, %v9796_v36  ;;  %8464 = vmatprep.mubr.msk.bf16.mxu0 %vm1345_vm3, %v1323_v10 }
 0x233   : > { %v1230_v15 = vpop.f32.mrf.mxu1  ;;  %8465 = vmatmul.mubr.msk.bf16.gmra.mxu0 %vm1345_vm3, %v1324_v11 }
 0x234   : > { %v1290_v17 = vadd.f32 %v9796_v36, %v1230_v15  ;;  %v1310_v18 = vpack.c.bf16 %v1292_v13, %v1291_v14 }
 0x235   : > { %v8438_v19 = vpop.f32.mrf.mxu1 }
 0x236   : > { %v1309_v20 = vpack.c.bf16 %v1290_v17, %v1289_v16  ;;  %v1326_v23 = vmax.bf16 %v11916_v38, %v1310_v18  ;;  %v1295_v27 = vadd.f32 %v8438_v19, %v9796_v36  ;;  %v9147_v17 = vld [vmem:[%s11901_s14 + $0x8] sm:$0xff]  }
 0x237   : > { %v1243_v21 = vpop.f32.mrf.mxu1 }
 0x238   : > { %v1325_v22 = vmax.bf16 %v11916_v38, %v1309_v20  ;;  %v1293_v29 = vadd.f32 %v9796_v36, %v1243_v21 }
 0x239   : > { %v8439_v24 = vpop.f32.mrf.mxu1 }
 0x23a   : > { %v1296_v26 = vadd.f32 %v8439_v24, %v9796_v36  ;;  %8468 = vmatprep.mubr.msk.bf16.mxu0 %vm1345_vm3, %v1325_v22 }
 0x23b   : > { %v1246_v28 = vpop.f32.mrf.mxu1  ;;  %8469 = vmatmul.mubr.msk.bf16.gmra.mxu0 %vm1345_vm3, %v1326_v23 }
 0x23c   : > { %v1294_v30 = vadd.f32 %v9796_v36, %v1246_v28  ;;  %v1312_v31 = vpack.c.bf16 %v1296_v26, %v1295_v27  ;;  %v9144_v36 = vld [vmem:[%s11895_s8] sm:$0xff]  }
 0x23d   : > { %8526 = vmatprep.subr.bf16.mxu0 %v9144_v36  ;;  %v8486_v41 = vpop.f32.mrf.mxu1  ;;  %v9148_v28 = vld [vmem:[%s11901_s14] sm:$0xff]  }
 0x23e   : > { %v1311_v32 = vpack.c.bf16 %v1294_v30, %v1293_v29  ;;  %v1328_v35 = vmax.bf16 %v11916_v38, %v1312_v31  ;;  %8527 = vmatpush3.bf16.msra.mxu0 %v9144_v36 }
 0x23f   : > { %8596 = vmatprep.subr.bf16.mxu0 %v11914_v40  ;;  %v1708_v42 = vpop.f32.mrf.mxu1 }
 0x240   : > { %v1327_v33 = vmax.bf16 %v11916_v38, %v1311_v32 }
 0x241   : > { %v8487_v43 = vpop.f32.mrf.mxu1 }
 0x242   : > { %8472 = vmatprep.mubr.msk.bf16.mxu0 %vm1345_vm3, %v1327_v33 }
 0x243   : > { %8473 = vmatmul.mubr.msk.bf16.gmra.mxu0 %vm1345_vm3, %v1328_v35  ;;  %v1711_v44 = vpop.f32.mrf.mxu1 }
 0x245   : > { %v8490_v45 = vpop.f32.mrf.mxu1 }
 0x247   : > { %v1724_v46 = vpop.f32.mrf.mxu1 }
 0x249   : > { %v8491_v49 = vpop.f32.mrf.mxu1 }
 0x24b   : > { %v1727_v50 = vpop.f32.mrf.mxu1 }
 0x24d   : > { %v9879_v52 = vpop.f32.mrf.mxu1 }
 0x24f   : > { %v9881_v53 = vpop.f32.mrf.mxu1 }
 0x251   : > { %v8495_v54 = vpop.f32.mrf.mxu1 }
 0x253   : > { %v9883_v55 = vpop.f32.mrf.mxu1 }
 0x255   : > { %v9885_v56 = vpop.f32.mrf.mxu1 }
 0x257   : > { %v9887_v57 = vpop.f32.mrf.mxu1 }
 0x259   : > { %v9889_v58 = vpop.f32.mrf.mxu1 }
 0x25b   : > { %v9891_v59 = vpop.f32.mrf.mxu1 }
 0x25d   : > { %v9895_v1 = vpop.f32.mrf.mxu1 }
 0x25f   : > { %v9903_v51 = vpop.f32.mrf.mxu1 }
 0x261   : > { %v9910_v11 = vpop.f32.mrf.mxu1 }
 0x263   : > { %v9926_v22 = vpop.f32.mrf.mxu1 }
 0x265   : > { %v9938_v32 = vpop.f32.mrf.mxu1 }
 0x2cb   : > { %v8446_v60 = vpop.f32.mrf.mxu0 }
 0x2cc   : > { %v1564_v2 = vadd.f32 %v8446_v60, %v9893_v61 }
 0x2cd   : > { %v1428_v63 = vpop.f32.mrf.mxu0 }
 0x2ce   : > { %v1562_v4 = vadd.f32 %v9893_v61, %v1428_v63  ;;  %v1837_v62 = vadd.f32 %v8486_v41, %v1564_v2 }
 0x2cf   : > { %v8447_v3 = vpop.f32.mrf.mxu0 }
 0x2d0   : > { %v1565_v5 = vadd.f32 %v8447_v3, %v9893_v61  ;;  %v1835_v6 = vadd.f32 %v1708_v42, %v1562_v4 }
 0x2d1   : > { %v1431_v25 = vpop.f32.mrf.mxu0 }
 0x2d2   : > { %v9900_v34 = vadd.f32 %v8487_v43, %v1565_v5  ;;  %v1563_v48 = vadd.f32 %v9893_v61, %v1431_v25 }
 0x2d3   : > { %v8450_v0 = vpop.f32.mrf.mxu0 }
 0x2d4   : > { %v1836_v7 = vadd.f32 %v1711_v44, %v1563_v48  ;;  %v9906_v8 = vpack.c.bf16 %v9900_v34, %v1837_v62  ;;  %v1568_v12 = vadd.f32 %v8450_v0, %v9893_v61 }
 0x2d5   : > { %v1444_v9 = vpop.f32.mrf.mxu0 }
 0x2d6   : > { %v9908_v10 = vpack.c.bf16 %v1836_v7, %v1835_v6  ;;  %v1566_v14 = vadd.f32 %v9893_v61, %v1444_v9  ;;  %v2101_v18 = vmax.bf16 %v11916_v38, %v9906_v8  ;;  %v1841_v23 = vadd.f32 %v8490_v45, %v1568_v12 }
 0x2d7   : > { %v8451_v13 = vpop.f32.mrf.mxu0  ;;  %v1884_v43 = vsel %vm1345_vm3, %v1836_v7, -inf }
 0x2d8   : > { %v1569_v15 = vadd.f32 %v8451_v13, %v9893_v61  ;;  %v2100_v16 = vmax.bf16 %v11916_v38, %v9908_v10  ;;  %v1839_v26 = vadd.f32 %v1724_v46, %v1566_v14  ;;  %v9953_v46 = vpop.f32.mrf.mxu1 }
 0x2d9   : > { %v1447_v19 = vpop.f32.mrf.mxu0 }
 0x2da   : > { %v9922_v20 = vadd.f32 %v8491_v49, %v1569_v15  ;;  %v1567_v21 = vadd.f32 %v9893_v61, %v1447_v19  ;;  %8528 = vmatprep.mubr.msk.bf16.mxu0 %vm1345_vm3, %v2100_v16  ;;  %v9968_v5 = vpop.f32.mrf.mxu1  ;;  %v1896_v13 = vsel %vm1345_vm3, %v1839_v26, -inf  ;;  %v1888_v19 = vsel %vm1345_vm3, %v9900_v34, -inf }
 0x2db   : > { %v8454_v24 = vpop.f32.mrf.mxu0  ;;  %8529 = vmatmul.mubr.msk.bf16.vlgmr.msra.gmra.mxu0 %vm1345_vm3, %v2101_v18 }
 0x2dc   : > { %v1840_v27 = vadd.f32 %v1727_v50, %v1567_v21  ;;  %8597 = vmatpush3.bf16.msra.mxu0 %v9147_v17  ;;  %v9933_v29 = vpack.c.bf16 %v9922_v20, %v1841_v23  ;;  %v1572_v33 = vadd.f32 %v8454_v24, %v9893_v61  ;;  %v1883_v50 = vsel %vm1345_vm3, %v1835_v6, -inf  ;;  %v9983_v15 = vpop.f32.mrf.mxu1 }
 0x2dd   : > { %v1460_v30 = vpop.f32.mrf.mxu0  ;;  %8598 = vmatprep.subr.bf16.mxu0 %v11914_v40 }
 0x2de   : > { %v9936_v31 = vpack.c.bf16 %v1840_v27, %v1839_v26  ;;  %v1570_v37 = vadd.f32 %v9893_v61, %v1460_v30  ;;  %v2103_v41 = vmax.bf16 %v11916_v38, %v9933_v29  ;;  %v9956_v47 = vadd.f32 %v9879_v52, %v1572_v33 }
 0x2df   : > { %v8455_v35 = vpop.f32.mrf.mxu0  ;;  %v1886_v52 = vsel %vm1345_vm3, %v1837_v62, -inf  ;;  %v1897_v0 = vsel %vm1345_vm3, %v1840_v27, -inf  ;;  %v1899_v26 = vsel %vm1345_vm3, %v1841_v23, -inf }
 0x2e0   : > { %v1573_v36 = vadd.f32 %v8455_v35, %v9893_v61  ;;  %v2102_v39 = vmax.bf16 %v11916_v38, %v9936_v31  ;;  %8599 = vmatpush3.bf16.msra.mxu0 %v9148_v28  ;;  %v1843_v60 = vadd.f32 %v9881_v53, %v1570_v37  ;;  %v1898_v16 = vmax.f32 %v1896_v13, %v1897_v0  ;;  %v9999_v37 = vpop.f32.mrf.mxu1 }
 0x2e1   : > { %v1463_v42 = vpop.f32.mrf.mxu0  ;;  %8640 = vmatprep.subr.bf16.mxu0 %v11914_v40 }
 0x2e2   : > { %v9949_v44 = vadd.f32 %v8495_v54, %v1573_v36  ;;  %v1571_v45 = vadd.f32 %v9893_v61, %v1463_v42  ;;  %8532 = vmatprep.mubr.msk.bf16.mxu0 %vm1345_vm3, %v2102_v39  ;;  %v1885_v54 = vmax.f32 %v1883_v50, %v1884_v43  ;;  %v1900_v34 = vmax.f32 %v1898_v16, %v1899_v26 }
 0x2e3   : > { %v8458_v49 = vpop.f32.mrf.mxu0  ;;  %8533 = vmatmul.mubr.msk.bf16.gmra.mxu0 %vm1345_vm3, %v2103_v41  ;;  %v1909_v36 = vsel %vm1345_vm3, %v1843_v60, -inf }
 0x2e4   : > { %v1844_v63 = vadd.f32 %v9883_v55, %v1571_v45  ;;  %v9964_v2 = vpack.c.bf16 %v9949_v44, %v9956_v47  ;;  %v1576_v25 = vadd.f32 %v8458_v49, %v9893_v61  ;;  %v1887_v7 = vmax.f32 %v1885_v54, %v1886_v52  ;;  %v10015_v52 = vpop.f32.mrf.mxu1 }
 0x2e5   : > { %v1476_v3 = vpop.f32.mrf.mxu0 }
 0x2e6   : > { %v9966_v4 = vpack.c.bf16 %v1844_v63, %v1843_v60  ;;  %v1574_v53 = vadd.f32 %v9893_v61, %v1476_v3  ;;  %v2105_v9 = vmax.bf16 %v11916_v38, %v9964_v2  ;;  %v1849_v17 = vadd.f32 %v9885_v56, %v1576_v25 }
 0x2e7   : > { %v8459_v48 = vpop.f32.mrf.mxu0  ;;  %v1910_v30 = vsel %vm1345_vm3, %v1844_v63, -inf  ;;  %v1901_v63 = vsel %vm1345_vm3, %v9922_v20, -inf }
 0x2e8   : > { %v1577_v55 = vadd.f32 %v8459_v48, %v9893_v61  ;;  %v2104_v6 = vmax.bf16 %v11916_v38, %v9966_v4  ;;  %v1847_v21 = vadd.f32 %v9887_v57, %v1574_v53  ;;  %v1911_v43 = vmax.f32 %v1909_v36, %v1910_v30 }
 0x2e9   : > { %v1479_v12 = vpop.f32.mrf.mxu0  ;;  %v1902_v25 = vmax.f32 %v1900_v34, %v1901_v63  ;;  %v1912_v53 = vsel %vm1345_vm3, %v9956_v47, -inf  ;;  %v1925_v20 = vsel %vm1345_vm3, %v1849_v17, -inf }
 0x2ea   : > { %v1850_v62 = vadd.f32 %v9889_v58, %v1577_v55  ;;  %v1575_v14 = vadd.f32 %v9893_v61, %v1479_v12  ;;  %8536 = vmatprep.mubr.msk.bf16.mxu0 %vm1345_vm3, %v2104_v6  ;;  %v1889_v58 = vmax.f32 %v1887_v7, %v1888_v19  ;;  %v1922_v23 = vsel %vm1345_vm3, %v1847_v21, -inf }
 0x2eb   : > { %v8462_v18 = vpop.f32.mrf.mxu0  ;;  %8537 = vmatmul.mubr.msk.bf16.gmra.mxu0 %vm1345_vm3, %v2105_v9  ;;  %v1913_v55 = vmax.f32 %v1911_v43, %v1912_v53  ;;  %v1903_v16 = vrot.slane %v1902_v25, 4 }
 0x2ec   : > { %v1848_v24 = vadd.f32 %v9891_v59, %v1575_v14  ;;  %v9992_v27 = vpack.c.bf16 %v1850_v62, %v1849_v17  ;;  %v1580_v57 = vadd.f32 %v8462_v18, %v9893_v61  ;;  %v1890_v42 = vrot.slane %v1889_v58, 4  ;;  %v8511_v14 = vpop.f32.mrf.mxu1 }
 0x2ed   : > { %v1492_v28 = vpop.f32.mrf.mxu0 }
 0x2ee   : > { %11956 = vst [vmem:[#allocation22_spill] sm:$0xff] %v9992_v27  ;;  %v9995_v33 = vpack.c.bf16 %v1848_v24, %v1847_v21  ;;  %v1923_v56 = vsel %vm1345_vm3, %v1848_v24, -inf  ;;  %v1578_v35 = vadd.f32 %v9893_v61, %v1492_v28  ;;  %v2107_v45 = vmax.bf16 %v11916_v38, %v9992_v27  ;;  %v1807_v36 = vpop.f32.mrf.mxu1 }
 0x2ef   : > { %v8463_v59 = vpop.f32.mrf.mxu0  ;;  %v1924_v49 = vmax.f32 %v1922_v23, %v1923_v56  ;;  %v1853_v48 = vadd.f32 %v9895_v1, %v1580_v57  ;;  %v1914_v1 = vsel %vm1345_vm3, %v9949_v44, -inf  ;;  %v1904_v23 = vmax.f32 %v1902_v25, %v1903_v16 }
 0x2f0   : > { %11957 = vst [vmem:[#allocation23_spill] sm:$0xff] %v9995_v33  ;;  %v1581_v39 = vadd.f32 %v8463_v59, %v9893_v61  ;;  %v2106_v41 = vmax.bf16 %v11916_v38, %v9995_v33  ;;  %v1851_v54 = vadd.f32 %v9903_v51, %v1578_v35  ;;  %v1915_v26 = vmax.f32 %v1913_v55, %v1914_v1 }
 0x2f1   : > { %v1495_v50 = vpop.f32.mrf.mxu0  ;;  %v1926_v6 = vmax.f32 %v1924_v49, %v1925_v20  ;;  %v1938_v21 = vsel %vm1345_vm3, %v1853_v48, -inf }
 0x2f2   : > { %v1854_v60 = vadd.f32 %v9910_v11, %v1581_v39  ;;  %v1579_v3 = vadd.f32 %v9893_v61, %v1495_v50  ;;  %8540 = vmatprep.mubr.msk.bf16.mxu0 %vm1345_vm3, %v2106_v41  ;;  %v10023_v11 = vmax.f32 %v1889_v58, %v1890_v42  ;;  %v1935_v12 = vsel %vm1345_vm3, %v1851_v54, -inf }
 0x2f3   : > { %v8466_v0 = vpop.f32.mrf.mxu0  ;;  %8541 = vmatmul.mubr.msk.bf16.gmra.mxu0 %vm1345_vm3, %v2107_v45  ;;  %v1916_v45 = vrot.slane %v1915_v26, 4 }
 0x2f4   : > { %v1852_v51 = vadd.f32 %v9926_v22, %v1579_v3  ;;  %v10025_v7 = vpack.c.bf16 %v1854_v60, %v1853_v48  ;;  %v1927_v22 = vsel %vm1345_vm3, %v1850_v62, -inf  ;;  %v1584_v18 = vadd.f32 %v8466_v0, %v9893_v61  ;;  %v8514_v3 = vpop.f32.mrf.mxu1 }
 0x2f5   : > { %v1508_v9 = vpop.f32.mrf.mxu0  ;;  %v1928_v28 = vmax.f32 %v1926_v6, %v1927_v22  ;;  %v1940_v35 = vsel %vm1345_vm3, %v1854_v60, -inf  ;;  %v1917_v6 = vmax.f32 %v1915_v26, %v1916_v45 }
 0x2f6   : > { %11958 = vst [vmem:[#allocation24_spill] sm:$0xff] %v10025_v7  ;;  %v10030_v13 = vpack.c.bf16 %v1852_v51, %v1851_v54  ;;  %v1936_v47 = vsel %vm1345_vm3, %v1852_v51, -inf  ;;  %v1582_v24 = vadd.f32 %v9893_v61, %v1508_v9  ;;  %v2109_v30 = vmax.bf16 %v11916_v38, %v10025_v7 }
 0x2f7   : > { %v1937_v17 = vmax.f32 %v1935_v12, %v1936_v47  ;;  %v8467_v19 = vpop.f32.mrf.mxu0  ;;  %v1857_v41 = vadd.f32 %v9938_v32, %v1584_v18  ;;  %v1929_v49 = vrot.slane %v1928_v28, 4  ;;  %v1905_v32 = vrot.slane %v1904_v23, 2 }
 0x2f8   : > { %11959 = vst [vmem:[#allocation25_spill] sm:$0xff] %v10030_v13  ;;  %v1585_v44 = vadd.f32 %v8467_v19, %v9893_v61  ;;  %v2108_v58 = vmax.bf16 %v11916_v38, %v10030_v13  ;;  %v1855_v34 = vadd.f32 %v9953_v46, %v1582_v24  ;;  %v1820_v19 = vpop.f32.mrf.mxu1  ;;  %v11968_v7 = vmov 0  }
 0x2f9   : > { %v1939_v56 = vmax.f32 %v1937_v17, %v1938_v21  ;;  %v1511_v62 = vpop.f32.mrf.mxu0  ;;  %v1951_v53 = vsel %vm1345_vm3, %v1857_v41, -inf  ;;  %v1930_v9 = vmax.f32 %v1928_v28, %v1929_v49 }
 0x2fa   : > { %v1858_v57 = vadd.f32 %v9968_v5, %v1585_v44  ;;  %v1583_v59 = vadd.f32 %v9893_v61, %v1511_v62  ;;  %8544 = vmatprep.mubr.msk.bf16.mxu0 %vm1345_vm3, %v2108_v58  ;;  %v1892_v5 = vrot.slane %v10023_v11, 2  ;;  %v1948_v63 = vsel %vm1345_vm3, %v1855_v34, -inf }
 0x2fb   : > { %v1941_v39 = vmax.f32 %v1939_v56, %v1940_v35  ;;  %v8470_v42 = vpop.f32.mrf.mxu0  ;;  %8545 = vmatmul.mubr.msk.bf16.gmra.mxu0 %vm1345_vm3, %v2109_v30  ;;  %v1906_v30 = vmax.f32 %v1904_v23, %v1905_v32  ;;  %v1918_v56 = vrot.slane %v1917_v6, 2  ;;  %v1931_v35 = vrot.slane %v1930_v9, 2 }
 0x2fc   : > { %v1856_v43 = vadd.f32 %v9983_v15, %v1583_v59  ;;  %v10050_v50 = vpack.c.bf16 %v1858_v57, %v1857_v41  ;;  %v1588_v0 = vadd.f32 %v8470_v42, %v9893_v61  ;;  %v1953_v16 = vsel %vm1345_vm3, %v1858_v57, -inf }
 0x2fd   : > { %v1524_v46 = vpop.f32.mrf.mxu0  ;;  %v1942_v25 = vrot.slane %v1941_v39, 4  ;;  %v1893_v26 = vmax.f32 %v10023_v11, %v1892_v5 }
 0x2fe   : > { %11960 = vst [vmem:[#allocation26_spill] sm:$0xff] %v10050_v50  ;;  %v10054_v54 = vpack.c.bf16 %v1856_v43, %v1855_v34  ;;  %v1949_v60 = vsel %vm1345_vm3, %v1856_v43, -inf  ;;  %v1586_v20 = vadd.f32 %v9893_v61, %v1524_v46  ;;  %v2111_v1 = vmax.bf16 %v11916_v38, %v10050_v50 }
 0x2ff   : > { %v1950_v48 = vmax.f32 %v1948_v63, %v1949_v60  ;;  %v8471_v15 = vpop.f32.mrf.mxu0  ;;  %v1943_v21 = vmax.f32 %v1941_v39, %v1942_v25  ;;  %v1861_v44 = vadd.f32 %v9999_v37, %v1588_v0  ;;  %v8515_v37 = vpop.f32.mrf.mxu1  ;;  %v1919_v46 = vmax.f32 %v1917_v6, %v1918_v56 }
 0x300   : > { %11961 = vst [vmem:[#allocation27_spill] sm:$0xff] %v10054_v54  ;;  %v1589_v51 = vadd.f32 %v8471_v15, %v9893_v61  ;;  %v2110_v55 = vmax.bf16 %v11916_v38, %v10054_v54  ;;  %v1859_v22 = vadd.f32 %v10015_v52, %v1586_v20  ;;  %v1932_v20 = vmax.f32 %v1930_v9, %v1931_v35 }
 0x301   : > { %v1952_v12 = vmax.f32 %v1950_v48, %v1951_v53  ;;  %v1527_v47 = vpop.f32.mrf.mxu0  ;;  %v1944_v39 = vrot.slane %v1943_v21, 2  ;;  %v1964_v23 = vsel %vm1345_vm3, %v1861_v44, -inf  ;;  %v1823_v53 = vpop.f32.mrf.mxu1  ;;  %v1907_v6 = vrot.slane %v1906_v30, 1 }
 0x302   : > { %v1862_v17 = vadd.f32 %v8511_v14, %v1589_v51  ;;  %v1587_v18 = vadd.f32 %v9893_v61, %v1527_v47  ;;  %8548 = vmatprep.mubr.msk.bf16.mxu0 %vm1345_vm3, %v2110_v55  ;;  %v1961_v34 = vsel %vm1345_vm3, %v1859_v22, -inf  ;;  %v1894_v47 = vrot.slane %v1893_v26, 1 }
 0x303   : > { %v1954_v24 = vmax.f32 %v1952_v12, %v1953_v16  ;;  %v8474_v58 = vpop.f32.mrf.mxu0  ;;  %8549 = vmatmul.mubr.msk.bf16.gmra.mxu0 %vm1345_vm3, %v2111_v1  ;;  %v1945_v1 = vmax.f32 %v1943_v21, %v1944_v39  ;;  %v1933_v9 = vrot.slane %v1932_v20, 1 }
 0x304   : > { %v1860_v28 = vadd.f32 %v1807_v36, %v1587_v18  ;;  %v10072_v52 = vpack.c.bf16 %v1862_v17, %v1861_v44  ;;  %v1592_v11 = vadd.f32 %v8474_v58, %v9893_v61  ;;  %v1966_v25 = vsel %vm1345_vm3, %v1862_v17, -inf }
 0x305   : > { %v1955_v62 = vrot.slane %v1954_v24, 4  ;;  %v1540_v14 = vpop.f32.mrf.mxu0  ;;  %v1920_v17 = vrot.slane %v1919_v46, 1  ;;  %v1908_v58 = vmax.f32 %v1906_v30, %v1907_v6 }
 0x306   : > { %11962 = vst [vmem:[#allocation28_spill] sm:$0xff] %v10072_v52  ;;  %v10075_v57 = vpack.c.bf16 %v1860_v28, %v1859_v22  ;;  %v1962_v59 = vsel %vm1345_vm3, %v1860_v28, -inf  ;;  %v1590_v43 = vadd.f32 %v9893_v61, %v1540_v14  ;;  %v2113_v63 = vmax.bf16 %v11916_v38, %v10072_v52 }
 0x307   : > { %v1956_v41 = vmax.f32 %v1954_v24, %v1955_v62  ;;  %v1963_v42 = vmax.f32 %v1961_v34, %v1962_v59  ;;  %v8475_v36 = vpop.f32.mrf.mxu0  ;;  %v1865_v55 = vadd.f32 %v8514_v3, %v1592_v11  ;;  %v1946_v28 = vrot.slane %v1945_v1, 1 }
 0x308   : > { %11963 = vst [vmem:[#allocation29_spill] sm:$0xff] %v10075_v57  ;;  %v1593_v45 = vadd.f32 %v8475_v36, %v9893_v61  ;;  %v2112_v49 = vmax.bf16 %v11916_v38, %v10075_v57  ;;  %v1863_v48 = vadd.f32 %v1820_v19, %v1590_v43  ;;  %v1895_v59 = vmax.f32 %v1893_v26, %v1894_v47 }
 0x309   : > { %v1957_v5 = vrot.slane %v1956_v41, 2  ;;  %v1965_v60 = vmax.f32 %v1963_v42, %v1964_v23  ;;  %v1543_v32 = vpop.f32.mrf.mxu0  ;;  %v1977_v21 = vsel %vm1345_vm3, %v1865_v55, -inf  ;;  %v1947_v11 = vmax.f32 %v1945_v1, %v1946_v28 }
 0x30a   : > { %v1866_v0 = vadd.f32 %v8515_v37, %v1593_v45  ;;  %v1591_v15 = vadd.f32 %v9893_v61, %v1543_v32  ;;  %8552 = vmatprep.mubr.msk.bf16.mxu0 %vm1345_vm3, %v2112_v49  ;;  %v1974_v19 = vsel %vm1345_vm3, %v1863_v48, -inf  ;;  %v1921_v37 = vmax.f32 %v1919_v46, %v1920_v17 }
 0x30b   : > { %v1967_v51 = vmax.f32 %v1965_v60, %v1966_v25  ;;  %8553 = vmatmul.mubr.msk.bf16.gmra.mxu0 %vm1345_vm3, %v2113_v63  ;;  %v1958_v16 = vmax.f32 %v1956_v41, %v1957_v5  ;;  %v1934_v41 = vmax.f32 %v1932_v20, %v1933_v9  ;;  %v1988_v36 = vpack.c.bf16 %v1908_v58, %v1908_v58 }
 0x30c   : > { %v1864_v12 = vadd.f32 %v1823_v53, %v1591_v15  ;;  %v10090_v18 = vpack.c.bf16 %v1866_v0, %v1865_v55  ;;  %v1979_v39 = vsel %vm1345_vm3, %v1866_v0, -inf  ;;  %v1987_v49 = vpack.c.bf16 %v1895_v59, %v1895_v59 }
 0x30d   : > { %v1968_v22 = vrot.slane %v1967_v51, 4  ;;  %v1959_v62 = vrot.slane %v1958_v16, 1  ;;  %v1989_v26 = vpack.c.bf16 %v1921_v37, %v1921_v37  ;;  %v1990_v46 = vpack.c.bf16 %v1934_v41, %v1934_v41 }
 0x30e   : > { %11964 = vst [vmem:[#allocation30_spill] sm:$0xff] %v10090_v18  ;;  %v10093_v61 = vpack.c.bf16 %v1864_v12, %v1863_v48  ;;  %v1975_v24 = vsel %vm1345_vm3, %v1864_v12, -inf  ;;  %v2115_v35 = vmax.bf16 %v11916_v38, %v10090_v18  ;;  %v1991_v60 = vpack.c.bf16 %v1947_v11, %v1947_v11 }
 0x30f   : > { %v1969_v44 = vmax.f32 %v1967_v51, %v1968_v22  ;;  %v1976_v3 = vmax.f32 %v1974_v19, %v1975_v24  ;;  %v1960_v23 = vmax.f32 %v1958_v16, %v1959_v62  ;;  %v1996_v32 = vmax.bf16 %v11916_v38, %v1988_v36 }
 0x310   : > { %11965 = vst [vmem:[#allocation31_spill] sm:$0xff] %v10093_v61  ;;  %v2114_v56 = vmax.bf16 %v11916_v38, %v10093_v61  ;;  %v1995_v0 = vmax.bf16 %v11916_v38, %v1987_v49  ;;  %v1997_v15 = vmax.bf16 %v11916_v38, %v1989_v26  ;;  %v2772_v20 = vunpack.c.l.b16 %v1988_v36 }
 0x311   : > { %v1970_v14 = vrot.slane %v1969_v44, 2  ;;  %v1978_v34 = vmax.f32 %v1976_v3, %v1977_v21  ;;  %v1992_v25 = vpack.c.bf16 %v1960_v23, %v1960_v23  ;;  %v1998_v51 = vmax.bf16 %v11916_v38, %v1990_v46 }
 0x312   : > { %8556 = vmatprep.mubr.msk.bf16.mxu0 %vm1345_vm3, %v2114_v56  ;;  %v2771_v6 = vunpack.c.l.b16 %v1987_v49  ;;  %v2773_v1 = vunpack.c.l.b16 %v1989_v26  ;;  %v1999_v12 = vmax.bf16 %v11916_v38, %v1991_v60  ;;  %v2023_v47 = vunpack.c.l.b16 %v1996_v32 }
 0x313   : > { %v1971_v30 = vmax.f32 %v1969_v44, %v1970_v14  ;;  %v1980_v42 = vmax.f32 %v1978_v34, %v1979_v39  ;;  %8557 = vmatmul.mubr.msk.bf16.gmra.mxu0 %vm1345_vm3, %v2115_v35  ;;  %v2774_v16 = vunpack.c.l.b16 %v1990_v46  ;;  %v2000_v22 = vmax.bf16 %v11916_v38, %v1992_v25 }
 0x314   : > { %8600 = vmatprep.mubr.msk.bf16.mxu0 %vm9398_vm4, %v11914_v40  ;;  %v2022_v19 = vunpack.c.l.b16 %v1995_v0  ;;  %v2024_v24 = vunpack.c.l.b16 %v1997_v15  ;;  %v2775_v9 = vunpack.c.l.b16 %v1991_v60  ;;  %v2779_v3 = vsel %vm2030_vm5, %v2772_v20, %v2771_v6  ;;  %v10141_v0 = vld [vmem:[%s11900_s13 + $0x8] sm:$0xff]  }
 0x315   : > { %v1972_v43 = vrot.slane %v1971_v30, 1  ;;  %v1981_v45 = vrot.slane %v1980_v42, 4  ;;  %v2025_v58 = vunpack.c.l.b16 %v1998_v51  ;;  %v2776_v28 = vunpack.c.l.b16 %v1992_v25  ;;  %v9149_v25 = vld [vmem:[%s11898_s11 + $0x8] sm:$0xff]  }
 0x316   : > { %v2780_v56 = vsel %vm2032_vm6, %v2773_v1, %v2779_v3  ;;  %v2026_v62 = vunpack.c.l.b16 %v1999_v12  ;;  %v2031_v35 = vsel %vm2030_vm5, %v2023_v47, %v2022_v19  ;;  %v2027_v59 = vunpack.c.l.b16 %v2000_v22  ;;  %8560 = vmatprep.subr.bf16.mxu1 %v9149_v25 }
 0x317   : > { %v1973_v5 = vmax.f32 %v1971_v30, %v1972_v43  ;;  %v1982_v63 = vmax.f32 %v1980_v42, %v1981_v45  ;;  %v2781_v34 = vsel %vm2034_vm7, %v2774_v16, %v2780_v56  ;;  %v2033_v39 = vsel %vm2032_vm6, %v2024_v24, %v2031_v35 }
 0x318   : > { %v2782_v41 = vsel %vm2036_vm8, %v2775_v9, %v2781_v34  ;;  %v2035_v42 = vsel %vm2034_vm7, %v2025_v58, %v2033_v39 }
 0x319   : > { %v1983_v48 = vrot.slane %v1982_v63, 2  ;;  %v1993_v53 = vpack.c.bf16 %v1973_v5, %v1973_v5  ;;  %v2783_v23 = vsel %vm2038_vm9, %v2776_v28, %v2782_v41  ;;  %v2037_v43 = vsel %vm2036_vm8, %v2026_v62, %v2035_v42 }
 0x31a   : > { %v2039_v46 = vsel %vm2038_vm9, %v2027_v59, %v2037_v43 }
 0x31b   : > { %v1984_v55 = vmax.f32 %v1982_v63, %v1983_v48  ;;  %v2001_v44 = vmax.bf16 %v11916_v38, %v1993_v53  ;;  %v2777_v14 = vunpack.c.l.b16 %v1993_v53  ;;  %v9150_v48 = vld [vmem:[%s11898_s11] sm:$0xff]  }
 0x31d   : > { %v1985_v17 = vrot.slane %v1984_v55, 1  ;;  %v2028_v30 = vunpack.c.l.b16 %v2001_v44  ;;  %v2784_v45 = vsel %vm2040_vm10, %v2777_v14, %v2783_v23  ;;  %v2346_v23 = vlaneseq }
 0x31f   : > { %v1986_v21 = vmax.f32 %v1984_v55, %v1985_v17  ;;  %v2041_v63 = vsel %vm2040_vm10, %v2028_v30, %v2039_v46  ;;  %v7728_v46 = vld [vmem:[#allocation10] ss:$0 sm:$0xff] }
 0x321   : > { %v1994_v37 = vpack.c.bf16 %v1986_v21, %v1986_v21 }
 0x323   : > { %v2002_v11 = vmax.bf16 %v11916_v38, %v1994_v37  ;;  %v2778_v36 = vunpack.c.l.b16 %v1994_v37 }
 0x325   : > { %v2029_v49 = vunpack.c.l.b16 %v2002_v11  ;;  %v2785_v26 = vsel %vm2042_vm11, %v2778_v36, %v2784_v45  ;;  %v9399_v11 = vmov 1966171168  }
 0x326   : > { %v2786_v5 = vpack.c.b16 %v2785_v26, %v2785_v26  ;;  %v2344_v36 = vunpack.c.l.s4 %v9399_v11 }
 0x327   : > { %v2043_v60 = vsel %vm2042_vm11, %v2029_v49, %v2041_v63  ;;  %v2347_v49 = vshrl.u32 %v2346_v23, 7 }
 0x328   : > { %8601 = vmatmul.mubr.msk.bf16.vlgmr.msra.gmra.mxu0 %vm1345_vm3, %v2786_v5  ;;  %v2044_v32 = vpack.c.b16 %v2043_v60, %v2043_v60  ;;  %v2345_v45 = vunpack.c.0.s8 %v2344_v36 }
 0x329   : > { %8644 = vmatprep.mubr.msk.bf16.mxu0 %vm9398_vm4, %v11914_v40  ;;  %v10202_v23 = vsub.s32 0, %v2347_v49 }
 0x32a   : > { %8521 = vmatmul.mubr.msk.bf16.vlgmr.msra.gmra.mxu1 %vm1345_vm3, %v2044_v32  ;;  %v10198_v32 = vsub.s32 %v2345_v45, %v2347_v49 }
 0x32b   : > { %8561 = vmatpush3.bf16.msra.mxu1 %v9149_v25  ;;  %11967 = vst [vmem:[#allocation33_spill] sm:$0xff] %v10202_v23 }
 0x32c   : > { %8562 = vmatprep.subr.bf16.mxu1 %v9150_v48 }
 0x32f   : > { %8563 = vmatpush3.bf16.msra.mxu1 %v9150_v48 }
 0x330   : > { %8604 = vmatprep.subr.bf16.mxu1 %v10141_v0 }
 0x39b   : > { %v8530_v15 = vpop.f32.mrf.mxu0 }
 0x39d   : > { %v2214_v53 = vpop.f32.mrf.mxu0 }
 0x39f   : > { %v8531_v20 = vpop.f32.mrf.mxu0 }
 0x3a1   : > { %v2217_v51 = vpop.f32.mrf.mxu0 }
 0x3a3   : > { %v10144_v55 = vpop.f32.mrf.mxu0 }
 0x3a5   : > { %v2230_v6 = vpop.f32.mrf.mxu0 }
 0x3a7   : > { %v10146_v1 = vpop.f32.mrf.mxu0 }
 0x3a9   : > { %v2233_v12 = vpop.f32.mrf.mxu0 }
 0x3ab   : > { %v10148_v47 = vpop.f32.mrf.mxu0 }
 0x3ad   : > { %v10150_v16 = vpop.f32.mrf.mxu0 }
 0x3af   : > { %v10152_v22 = vpop.f32.mrf.mxu0 }
 0x3b1   : > { %v10154_v17 = vpop.f32.mrf.mxu0 }
 0x3b3   : > { %v10156_v19 = vpop.f32.mrf.mxu0 }
 0x3b5   : > { %v10158_v24 = vpop.f32.mrf.mxu0 }
 0x3b7   : > { %v10160_v9 = vpop.f32.mrf.mxu0 }
 0x3b9   : > { %v10162_v44 = vpop.f32.mrf.mxu0 }
 0x3bb   : > { %v10164_v3 = vpop.f32.mrf.mxu0 }
 0x3bd   : > { %v10166_v58 = vpop.f32.mrf.mxu0 }
 0x3bf   : > { %v10168_v28 = vpop.f32.mrf.mxu0 }
 0x3c1   : > { %v10170_v21 = vpop.f32.mrf.mxu0 }
 0x3c3   : > { %v10172_v56 = vpop.f32.mrf.mxu0 }
 0x3c5   : > { %v10174_v62 = vpop.f32.mrf.mxu0 }
 0x3c7   : > { %v10176_v14 = vpop.f32.mrf.mxu0 }
 0x3c9   : > { %v10178_v35 = vpop.f32.mrf.mxu0 }
 0x3cb   : > { %v10180_v34 = vpop.f32.mrf.mxu0 }
 0x3cd   : > { %v10182_v59 = vpop.f32.mrf.mxu0 }
 0x3cf   : > { %v10184_v37 = vpop.f32.mrf.mxu0 }
 0x3d1   : > { %v10186_v39 = vpop.f32.mrf.mxu0 }
 0x3d3   : > { %v10188_v41 = vpop.f32.mrf.mxu0 }
 0x3d5   : > { %v10190_v30 = vpop.f32.mrf.mxu0 }
 0x3d7   : > { %v10192_v42 = vpop.f32.mrf.mxu0 }
 0x3d9   : > { %v10194_v43 = vpop.f32.mrf.mxu0 }
 0x3e8   : > { %v10196_v26 = vpop.f32.mrf.mxu0 }
 0x3e9   : > { %11966 = vst [vmem:[#allocation32_spill] sm:$0xff] %v10196_v26 }
 0x3ea   : > { %v2094_v5 = vpop.f32.mrf.mxu1  ;;  %v8602_v63 = vpop.f32.mrf.mxu0 }
 0x3eb   : > { %v2095_v60 = vadd.f32 %v7728_v46, %v2094_v5 }
 0x3ec   : > { %v8522_v25 = vpop.f32.mrf.mxu1  ;;  %v2839_v48 = vpop.f32.mrf.mxu0 }
 0x3ed   : > { %v2342_v40 = vcombine.high %v2095_v60, %v2095_v60  ;;  %v2349_v38 = vrot.slane %v2095_v60, %v10198_v32 }
 0x3ee   : > { %v2097_v18 = vpop.f32.mrf.mxu1  ;;  %v8603_v11 = vpop.f32.mrf.mxu0 }
 0x3ef   : > { %v2356_v61 = vrot.slane %v2342_v40, %v10198_v32  ;;  %v2357_v52 = vcombine.high %v2349_v38, %v2349_v38  ;;  %v2365_v26 = vrot.slane %v2349_v38, %v10198_v32 }
 0x3f0   : > { %v8523_v36 = vpop.f32.mrf.mxu1 }
 0x3f1   : > { %v2358_v57 = vcombine.high %v2356_v61, %v2356_v61  ;;  %v2379_v46 = vrot.slane %v2357_v52, %v10198_v32  ;;  %v2394_v45 = vrot.slane %v2365_v26, %v10202_v23  ;;  %v2387_v63 = vcombine.high %v2365_v26, %v2365_v26 }
 0x3f2   : > { %v2372_v18 = vrot.slane %v2356_v61, %v10198_v32 }
 0x3f3   : > { %v2398_v5 = vrot.slane %v2379_v46, %v10202_v23  ;;  %v2433_v25 = vadd.f32 %v8530_v15, %v2394_v45  ;;  %v2434_v60 = vadd.f32 %v8531_v20, %v2394_v45  ;;  %v2386_v40 = vrot.slane %v2358_v57, %v10198_v32 }
 0x3f4   : > { %v2431_v48 = vadd.f32 %v2394_v45, %v2214_v53  ;;  %v2432_v11 = vadd.f32 %v2394_v45, %v2217_v51  ;;  %v2402_v38 = vrot.slane %v2387_v63, %v10202_v23  ;;  %v2388_v52 = vcombine.high %v2372_v18, %v2372_v18  ;;  %v9152_v51 = vld [vmem:[%s11900_s13] sm:$0xff]  }
 0x3f5   : > { %v2464_v49 = vpack.c.bf16 %v2434_v60, %v2433_v25  ;;  %v2435_v36 = vadd.f32 %v2398_v5, %v2230_v6  ;;  %v2436_v50 = vadd.f32 %v2398_v5, %v2233_v12  ;;  %v2390_v33 = vcombine.high %v2386_v40, %v2386_v40 }
 0x3f6   : > { %v2463_v54 = vpack.c.bf16 %v2432_v11, %v2431_v48  ;;  %v2414_v20 = vrot.slane %v2386_v40, %v10202_v23  ;;  %v2437_v57 = vadd.f32 %v10144_v55, %v2398_v5  ;;  %v2438_v53 = vadd.f32 %v10146_v1, %v2398_v5 }
 0x3f7   : > { %v2480_v13 = vmax.bf16 %v11968_v7, %v2464_v49  ;;  %v2465_v27 = vpack.c.bf16 %v2436_v50, %v2435_v36  ;;  %v2389_v6 = vcombine.high %v2379_v46, %v2379_v46  ;;  %v2439_v50 = vadd.f32 %v2402_v38, %v10150_v16 }
 0x3f8   : > { %v2479_v15 = vmax.bf16 %v11968_v7, %v2463_v54  ;;  %v2440_v12 = vadd.f32 %v2402_v38, %v10154_v17  ;;  %v2418_v54 = vrot.slane %v2388_v52, %v10202_v23  ;;  %v2466_v55 = vpack.c.bf16 %v2438_v53, %v2437_v57 }
 0x3f9   : > { %v2481_v61 = vmax.bf16 %v11968_v7, %v2465_v27  ;;  %v2422_v27 = vrot.slane %v2390_v33, %v10202_v23  ;;  %v2453_v1 = vadd.f32 %v10172_v56, %v2414_v20  ;;  %v2406_v26 = vrot.slane %v2389_v6, %v10202_v23 }
 0x3fa   : > { %8564 = vmatprep.mubr.msk.bf16.mxu1 %vm1345_vm3, %v2479_v15  ;;  %v2467_v46 = vpack.c.bf16 %v2440_v12, %v2439_v50  ;;  %v2454_v16 = vadd.f32 %v10176_v14, %v2414_v20  ;;  %v2457_v17 = vadd.f32 %v10180_v34, %v2418_v54  ;;  %v2441_v45 = vadd.f32 %v10148_v47, %v2402_v38  ;;  %v11977_v12 = vld [vmem:[#allocation31_spill] sm:$0xff] }
 0x3fb   : > { %8565 = vmatmul.mubr.msk.bf16.vlgmr.msra.gmra.mxu1 %vm1345_vm3, %v2480_v13  ;;  %v2482_v5 = vmax.bf16 %v11968_v7, %v2466_v55  ;;  %v2442_v33 = vadd.f32 %v10152_v22, %v2402_v38  ;;  %v2461_v63 = vadd.f32 %v10188_v41, %v2422_v27  ;;  %v2462_v56 = vadd.f32 %v10192_v42, %v2422_v27 }
 0x3fc   : > { %8605 = vmatpush3.bf16.msra.mxu1 %v10141_v0  ;;  %8568 = vmatprep.mubr.msk.bf16.mxu1 %vm1345_vm3, %v2481_v61  ;;  %v2474_v13 = vpack.c.bf16 %v2454_v16, %v2453_v1  ;;  %v2458_v0 = vadd.f32 %v10184_v37, %v2418_v54  ;;  %v2483_v25 = vmax.bf16 %v11968_v7, %v2467_v46 }
 0x3fd   : > { %8606 = vmatprep.subr.bf16.mxu1 %v9152_v51  ;;  %v2443_v14 = vadd.f32 %v2406_v26, %v10158_v24  ;;  %v2444_v34 = vadd.f32 %v2406_v26, %v10162_v44  ;;  %v2478_v47 = vpack.c.bf16 %v2462_v56, %v2461_v63  ;;  %v2468_v37 = vpack.c.bf16 %v2442_v33, %v2441_v45 }
 0x3fe   : > { %v2476_v60 = vpack.c.bf16 %v2458_v0, %v2457_v17  ;;  %v2410_v40 = vrot.slane %v2372_v18, %v10202_v23  ;;  %v2445_v42 = vadd.f32 %v10156_v19, %v2406_v26  ;;  %v2446_v48 = vadd.f32 %v10160_v9, %v2406_v26 }
 0x3ff   : > { %v2469_v22 = vpack.c.bf16 %v2444_v34, %v2443_v14  ;;  %v2484_v41 = vmax.bf16 %v11968_v7, %v2468_v37  ;;  %v2451_v52 = vadd.f32 %v2414_v20, %v10174_v62  ;;  %v2459_v53 = vadd.f32 %v2422_v27, %v10190_v30  ;;  %v11969_v30 = vld [vmem:[#allocation23_spill] sm:$0xff]  ;;  %v9154_v34 = vld [vmem:[%s11896_s9 + $0x10] sm:$0xff]  }
 0x400   : > { %8607 = vmatpush3.bf16.msra.mxu1 %v9152_v51  ;;  %v2447_v44 = vadd.f32 %v2410_v40, %v10166_v58  ;;  %v2448_v11 = vadd.f32 %v2410_v40, %v10170_v21  ;;  %v2470_v49 = vpack.c.bf16 %v2446_v48, %v2445_v42  ;;  %v2449_v38 = vadd.f32 %v10164_v3, %v2410_v40 }
 0x401   : > { %v2485_v24 = vmax.bf16 %v11968_v7, %v2469_v22  ;;  %v2450_v19 = vadd.f32 %v10168_v28, %v2410_v40  ;;  %v2452_v58 = vadd.f32 %v2414_v20, %v10178_v35  ;;  %v2455_v3 = vadd.f32 %v2418_v54, %v10182_v59 }
 0x402   : > { %v2471_v36 = vpack.c.bf16 %v2448_v11, %v2447_v44  ;;  %v2486_v18 = vmax.bf16 %v11968_v7, %v2470_v49  ;;  %v2456_v28 = vadd.f32 %v2418_v54, %v10186_v39  ;;  %v2490_v35 = vmax.bf16 %v11968_v7, %v2474_v13  ;;  %v11978_v54 = vld [vmem:[#allocation30_spill] sm:$0xff] }
 0x403   : > { %8569 = vmatmul.mubr.msk.bf16.gmra.mxu1 %vm1345_vm3, %v2482_v5  ;;  %v2472_v21 = vpack.c.bf16 %v2450_v19, %v2449_v38  ;;  %v2473_v15 = vpack.c.bf16 %v2452_v58, %v2451_v52  ;;  %v2460_v51 = vadd.f32 %v2422_v27, %v10194_v43  ;;  %v2492_v39 = vmax.bf16 %v11968_v7, %v2476_v60  ;;  %v11970_v43 = vld [vmem:[#allocation22_spill] sm:$0xff]  ;;  %v11980_v19 = vld [vmem:[#allocation32_spill] sm:$0xff] }
 0x404   : > { %8572 = vmatprep.mubr.msk.bf16.mxu1 %vm1345_vm3, %v2483_v25  ;;  %v2487_v9 = vmax.bf16 %v11968_v7, %v2471_v36  ;;  %v2475_v62 = vpack.c.bf16 %v2456_v28, %v2455_v3  ;;  %v2494_v50 = vmax.bf16 %v11968_v7, %v2478_v47  ;;  %v9153_v25 = vld [vmem:[%s11896_s9 + $0x18] sm:$0xff]   ;;  %v11979_v60 = vmov 0.0  }
 0x405   : > { %v2488_v61 = vmax.bf16 %v11968_v7, %v2472_v21  ;;  %v2489_v57 = vmax.bf16 %v11968_v7, %v2473_v15  ;;  %v2477_v59 = vpack.c.bf16 %v2460_v51, %v2459_v53  ;;  %8641 = vmatpush3.bf16.msra.mxu0 %v9153_v25  ;;  %v10340_v47 = vld [vmem:[%s11895_s8 + $0x18] sm:$0xff]   ;;  %v3068_v53 = vcombine.high %v11980_v19, %v11980_v19 }
 0x406   : > { %v2491_v20 = vmax.bf16 %v11968_v7, %v2475_v62  ;;  %8642 = vmatprep.subr.bf16.mxu0 %v11979_v60 }
 0x407   : > { %v2493_v6 = vmax.bf16 %v11968_v7, %v2477_v59 }
 0x409   : > { %8643 = vmatpush3.bf16.msra.mxu0 %v9154_v34 }
 0x40a   : > { %8648 = vmatprep.subr.bf16.mxu0 %v10340_v47 }
 0x40b   : > { %8573 = vmatmul.mubr.msk.bf16.gmra.mxu1 %vm1345_vm3, %v2484_v41 }
 0x40c   : > { %8576 = vmatprep.mubr.msk.bf16.mxu1 %vm1345_vm3, %v2485_v24 }
 0x413   : > { %8577 = vmatmul.mubr.msk.bf16.gmra.mxu1 %vm1345_vm3, %v2486_v18 }
 0x414   : > { %8580 = vmatprep.mubr.msk.bf16.mxu1 %vm1345_vm3, %v2487_v9  ;;  %v3075_v9 = vrot.slane %v11980_v19, %v10198_v32 }
 0x416   : > { %v3091_v21 = vrot.slane %v3075_v9, %v10198_v32  ;;  %v3083_v3 = vcombine.high %v3075_v9, %v3075_v9 }
 0x418   : > { %v3120_v28 = vrot.slane %v3091_v21, %v10202_v23  ;;  %v10390_v59 = vrot.slane %v3083_v3, %v10198_v32  ;;  %v3113_v9 = vcombine.high %v3091_v21, %v3091_v21 }
 0x41b   : > { %8581 = vmatmul.mubr.msk.bf16.gmra.mxu1 %vm1345_vm3, %v2488_v61  ;;  %v10381_v61 = vld [vmem:[%s11899_s12] ss:$0 sm:$0xff] }
 0x41c   : > { %8584 = vmatprep.mubr.msk.bf16.mxu1 %vm1345_vm3, %v2489_v57 }
 0x423   : > { %8585 = vmatmul.mubr.msk.bf16.gmra.mxu1 %vm1345_vm3, %v2490_v35 }
 0x424   : > { %8588 = vmatprep.mubr.msk.bf16.mxu1 %vm1345_vm3, %v2491_v20 }
 0x42b   : > { %8589 = vmatmul.mubr.msk.bf16.gmra.mxu1 %vm1345_vm3, %v2492_v39 }
 0x42c   : > { %8592 = vmatprep.mubr.msk.bf16.mxu1 %vm1345_vm3, %v2493_v6 }
 0x433   : > { %8593 = vmatmul.mubr.msk.bf16.gmra.mxu1 %vm1345_vm3, %v2494_v50 }
 0x434   : > { %8608 = vmatprep.mubr.msk.bf16.mxu1 %vm1345_vm3, %v9908_v10  ;;  %v11971_v10 = vld [vmem:[#allocation25_spill] sm:$0xff] }
 0x43b   : > { %8609 = vmatmul.mubr.msk.bf16.vlgmr.msra.gmra.mxu1 %vm1345_vm3, %v9906_v8  ;;  %v11972_v8 = vld [vmem:[#allocation24_spill] sm:$0xff] }
 0x43c   : > { %8612 = vmatprep.mubr.msk.bf16.mxu1 %vm1345_vm3, %v9936_v31  ;;  %v11973_v31 = vld [vmem:[#allocation27_spill] sm:$0xff] }
 0x443   : > { %8613 = vmatmul.mubr.msk.bf16.gmra.mxu1 %vm1345_vm3, %v9933_v29  ;;  %v11974_v29 = vld [vmem:[#allocation26_spill] sm:$0xff] }
 0x444   : > { %8616 = vmatprep.mubr.msk.bf16.mxu1 %vm1345_vm3, %v9966_v4  ;;  %v11975_v4 = vld [vmem:[#allocation29_spill] sm:$0xff] }
 0x44b   : > { %8617 = vmatmul.mubr.msk.bf16.gmra.mxu1 %vm1345_vm3, %v9964_v2  ;;  %v11976_v2 = vld [vmem:[#allocation28_spill] sm:$0xff] }
 0x44c   : > { %8620 = vmatprep.mubr.msk.bf16.mxu1 %vm1345_vm3, %v11969_v30 }
 0x453   : > { %8621 = vmatmul.mubr.msk.bf16.gmra.mxu1 %vm1345_vm3, %v11970_v43 }
 0x454   : > { %8624 = vmatprep.mubr.msk.bf16.mxu1 %vm1345_vm3, %v11971_v10 }
 0x45b   : > { %8625 = vmatmul.mubr.msk.bf16.gmra.mxu1 %vm1345_vm3, %v11972_v8 }
 0x45c   : > { %8628 = vmatprep.mubr.msk.bf16.mxu1 %vm1345_vm3, %v11973_v31  ;;  %v3082_v31 = vrot.slane %v3068_v53, %v10198_v32 }
 0x463   : > { %8629 = vmatmul.mubr.msk.bf16.gmra.mxu1 %vm1345_vm3, %v11974_v29 }
 0x464   : > { %8632 = vmatprep.mubr.msk.bf16.mxu1 %vm1345_vm3, %v11975_v4  ;;  %v3124_v4 = vrot.slane %v10390_v59, %v10202_v23 }
 0x46b   : > { %8633 = vmatmul.mubr.msk.bf16.gmra.mxu1 %vm1345_vm3, %v11976_v2 }
 0x46c   : > { %8636 = vmatprep.mubr.msk.bf16.mxu1 %vm1345_vm3, %v11977_v12 }
 0x473   : > { %8637 = vmatmul.mubr.msk.bf16.gmra.mxu1 %vm1345_vm3, %v11978_v54 }
 0x4bb   : > { %v8566_v27 = vpop.f32.mrf.mxu1 }
 0x4bc   : > { %v2729_v35 = vadd.f32 %v8566_v27, %v10381_v61 }
 0x4bd   : > { %v2593_v55 = vpop.f32.mrf.mxu1 }
 0x4be   : > { %v2727_v39 = vadd.f32 %v10381_v61, %v2593_v55 }
 0x4bf   : > { %v8567_v1 = vpop.f32.mrf.mxu1 }
 0x4c0   : > { %v2730_v43 = vadd.f32 %v8567_v1, %v10381_v61  ;;  %v3084_v1 = vcombine.high %v3082_v31, %v3082_v31 }
 0x4c1   : > { %v2596_v26 = vpop.f32.mrf.mxu1 }
 0x4c2   : > { %v2728_v2 = vadd.f32 %v10381_v61, %v2596_v26 }
 0x4c3   : > { %v8570_v46 = vpop.f32.mrf.mxu1 }
 0x4c4   : > { %v2733_v55 = vadd.f32 %v8570_v46, %v10381_v61 }
 0x4c5   : > { %v10310_v16 = vpop.f32.mrf.mxu1 }
 0x4c6   : > { %v2731_v26 = vadd.f32 %v10381_v61, %v10310_v16 }
 0x4c7   : > { %v10312_v17 = vpop.f32.mrf.mxu1 }
 0x4c9   : > { %v10314_v45 = vpop.f32.mrf.mxu1 }
 0x4ca   : > { %v2732_v16 = vadd.f32 %v10381_v61, %v10314_v45 }
 0x4cb   : > { %v10316_v13 = vpop.f32.mrf.mxu1 }
 0x4cd   : > { %v10318_v0 = vpop.f32.mrf.mxu1 }
 0x4cf   : > { %v10320_v5 = vpop.f32.mrf.mxu1 }
 0x4d1   : > { %v10322_v33 = vpop.f32.mrf.mxu1 }
 0x4d3   : > { %v10324_v63 = vpop.f32.mrf.mxu1 }
 0x4d5   : > { %v10326_v56 = vpop.f32.mrf.mxu1 }
 0x4d7   : > { %v10331_v14 = vpop.f32.mrf.mxu1 }
 0x4d9   : > { %v10342_v37 = vpop.f32.mrf.mxu1 }
 0x4db   : > { %v10344_v40 = vpop.f32.mrf.mxu1 }
 0x4dd   : > { %v10347_v22 = vpop.f32.mrf.mxu1 }
 0x4df   : > { %v10349_v41 = vpop.f32.mrf.mxu1 }
 0x4e1   : > { %v10351_v42 = vpop.f32.mrf.mxu1 }
 0x4e3   : > { %v10353_v48 = vpop.f32.mrf.mxu1 }
 0x4e5   : > { %v10355_v24 = vpop.f32.mrf.mxu1 }
 0x4e7   : > { %v10357_v44 = vpop.f32.mrf.mxu1 }
 0x4e9   : > { %v10359_v11 = vpop.f32.mrf.mxu1 }
 0x4eb   : > { %v10361_v49 = vpop.f32.mrf.mxu1 }
 0x4ed   : > { %v10363_v36 = vpop.f32.mrf.mxu1 }
 0x4ef   : > { %v10365_v18 = vpop.f32.mrf.mxu1 }
 0x4f1   : > { %v10367_v38 = vpop.f32.mrf.mxu1 }
 0x4f3   : > { %v10371_v52 = vpop.f32.mrf.mxu1 }
 0x4f5   : > { %v10373_v58 = vpop.f32.mrf.mxu1 }
 0x4f7   : > { %v10376_v15 = vpop.f32.mrf.mxu1 }
 0x4f9   : > { %v10383_v57 = vpop.f32.mrf.mxu1 }
 0x4fb   : > { %v8610_v62 = vpop.f32.mrf.mxu1 }
 0x4fc   : > { %v3159_v20 = vadd.f32 %v8610_v62, %v3120_v28 }
 0x4fd   : > { %v2940_v51 = vpop.f32.mrf.mxu1 }
 0x4fe   : > { %v3191_v6 = vadd.f32 %v3159_v20, %v2729_v35  ;;  %v3157_v50 = vadd.f32 %v3120_v28, %v2940_v51 }
 0x4ff   : > { %v8611_v30 = vpop.f32.mrf.mxu1 }
 0x500   : > { %v3189_v10 = vadd.f32 %v3157_v50, %v2727_v39  ;;  %v3160_v8 = vadd.f32 %v8611_v30, %v3120_v28  ;;  %v3098_v39 = vrot.slane %v3082_v31, %v10198_v32  ;;  %v2734_v50 = vadd.f32 %v10312_v17, %v10381_v61 }
 0x501   : > { %v2943_v29 = vpop.f32.mrf.mxu1  ;;  %v3240_v21 = vsel %vm1345_vm3, %v3191_v6, -inf  ;;  %v3115_v17 = vcombine.high %v10390_v59, %v10390_v59 }
 0x502   : > { %v3192_v12 = vadd.f32 %v3160_v8, %v2730_v43  ;;  %v3158_v54 = vadd.f32 %v3120_v28, %v2943_v29  ;;  %v3237_v62 = vsel %vm1345_vm3, %v3189_v10, -inf  ;;  %v3112_v43 = vrot.slane %v3084_v1, %v10198_v32 }
 0x503   : > { %v8614_v27 = vpop.f32.mrf.mxu1  ;;  %v10423_v45 = vrot.slane %v3098_v39, %v10202_v23 }
 0x504   : > { %v10399_v25 = vpack.c.bf16 %v3192_v12, %v3191_v6  ;;  %v3190_v34 = vadd.f32 %v3158_v54, %v2728_v2  ;;  %v3163_v19 = vadd.f32 %v8614_v27, %v3124_v4  ;;  %v3242_v54 = vsel %vm1345_vm3, %v3192_v12, -inf }
 0x505   : > { %v2956_v3 = vpop.f32.mrf.mxu1 }
 0x506   : > { %v10402_v35 = vpack.c.bf16 %v3190_v34, %v3189_v10  ;;  %v3238_v20 = vsel %vm1345_vm3, %v3190_v34, -inf  ;;  %v3195_v53 = vadd.f32 %v3163_v19, %v2733_v55  ;;  %v3161_v51 = vadd.f32 %v3124_v4, %v2956_v3 }
 0x507   : > { %v3239_v28 = vmax.f32 %v3237_v62, %v3238_v20  ;;  %v8615_v46 = vpop.f32.mrf.mxu1  ;;  %v3128_v10 = vrot.slane %v3113_v9, %v10202_v23  ;;  %v2737_v34 = vadd.f32 %v10316_v13, %v10381_v61  ;;  %v3114_v3 = vcombine.high %v3098_v39, %v3098_v39 }
 0x508   : > { %v3164_v30 = vadd.f32 %v8615_v46, %v3124_v4  ;;  %v3193_v29 = vadd.f32 %v3161_v51, %v2731_v26  ;;  %v3116_v62 = vcombine.high %v3112_v43, %v3112_v43  ;;  %v2735_v13 = vadd.f32 %v10381_v61, %v10318_v0 }
 0x509   : > { %v3241_v8 = vmax.f32 %v3239_v28, %v3240_v21  ;;  %v2959_v2 = vpop.f32.mrf.mxu1  ;;  %v2738_v39 = vadd.f32 %v10320_v5, %v10381_v61  ;;  %v2736_v0 = vadd.f32 %v10381_v61, %v10322_v33 }
 0x50a   : > { %v3196_v27 = vadd.f32 %v3164_v30, %v2734_v50  ;;  %v3162_v31 = vadd.f32 %v3124_v4, %v2959_v2  ;;  %v3250_v4 = vsel %vm1345_vm3, %v3193_v29, -inf  ;;  %v3253_v30 = vsel %vm1345_vm3, %v3195_v53, -inf }
 0x50b   : > { %v3243_v55 = vmax.f32 %v3241_v8, %v3242_v54  ;;  %v8618_v6 = vpop.f32.mrf.mxu1  ;;  %v3132_v2 = vrot.slane %v3115_v17, %v10202_v23  ;;  %v10445_v17 = vrot.slane %v3116_v62, %v10202_v23 }
 0x50c   : > { %v10420_v19 = vpack.c.bf16 %v3196_v27, %v3195_v53  ;;  %v3194_v1 = vadd.f32 %v3162_v31, %v2732_v16  ;;  %v3167_v9 = vadd.f32 %v8618_v6, %v3128_v10  ;;  %v10436_v6 = vrot.slane %v3112_v43, %v10202_v23 }
 0x50d   : > { %v3244_v12 = vrot.slane %v3243_v55, 4  ;;  %v2972_v20 = vpop.f32.mrf.mxu1  ;;  %v2741_v43 = vadd.f32 %v10324_v63, %v10381_v61 }
 0x50e   : > { %v10426_v26 = vpack.c.bf16 %v3194_v1, %v3193_v29  ;;  %v3251_v59 = vsel %vm1345_vm3, %v3194_v1, -inf  ;;  %v3199_v28 = vadd.f32 %v3167_v9, %v2737_v34  ;;  %v3165_v50 = vadd.f32 %v3128_v10, %v2972_v20 }
 0x50f   : > { %v3245_v51 = vmax.f32 %v3243_v55, %v3244_v12  ;;  %v3252_v46 = vmax.f32 %v3250_v4, %v3251_v59  ;;  %v8619_v21 = vpop.f32.mrf.mxu1  ;;  %v3255_v55 = vsel %vm1345_vm3, %v3196_v27, -inf  ;;  %v10442_v12 = vrot.slane %v3114_v3, %v10202_v23 }
 0x510   : > { %v3168_v8 = vadd.f32 %v8619_v21, %v3128_v10  ;;  %v3197_v54 = vadd.f32 %v3165_v50, %v2735_v13  ;;  %v2739_v27 = vadd.f32 %v10381_v61, %v10326_v56  ;;  %v2740_v50 = vadd.f32 %v10381_v61, %v10342_v37 }
 0x511   : > { %v3246_v29 = vrot.slane %v3245_v51, 2  ;;  %v3254_v16 = vmax.f32 %v3252_v46, %v3253_v30  ;;  %v2975_v31 = vpop.f32.mrf.mxu1  ;;  %v2746_v37 = vadd.f32 %v10349_v41, %v10381_v61 }
 0x512   : > { %v3200_v34 = vadd.f32 %v3168_v8, %v2738_v39  ;;  %v3166_v1 = vadd.f32 %v3128_v10, %v2975_v31  ;;  %v2742_v10 = vadd.f32 %v10331_v14, %v10381_v61  ;;  %v2745_v14 = vadd.f32 %v10344_v40, %v10381_v61 }
 0x513   : > { %v3247_v5 = vmax.f32 %v3245_v51, %v3246_v29  ;;  %v3256_v9 = vmax.f32 %v3254_v16, %v3255_v55  ;;  %v8622_v53 = vpop.f32.mrf.mxu1  ;;  %v3263_v51 = vsel %vm1345_vm3, %v3197_v54, -inf  ;;  %v3266_v29 = vsel %vm1345_vm3, %v3199_v28, -inf }
 0x514   : > { %v10449_v20 = vpack.c.bf16 %v3200_v34, %v3199_v28  ;;  %v3198_v4 = vadd.f32 %v3166_v1, %v2736_v0  ;;  %v3171_v33 = vadd.f32 %v8622_v53, %v3132_v2  ;;  %v2744_v40 = vadd.f32 %v10381_v61, %v10351_v42 }
 0x515   : > { %v3248_v59 = vrot.slane %v3247_v5, 1  ;;  %v3257_v13 = vrot.slane %v3256_v9, 4  ;;  %v2988_v3 = vpop.f32.mrf.mxu1  ;;  %v2749_v28 = vadd.f32 %v10353_v48, %v10381_v61 }
 0x516   : > { %v10456_v62 = vpack.c.bf16 %v3198_v4, %v3197_v54  ;;  %v3264_v46 = vsel %vm1345_vm3, %v3198_v4, -inf  ;;  %v3203_v63 = vadd.f32 %v3171_v33, %v2741_v43  ;;  %v3169_v30 = vadd.f32 %v3132_v2, %v2988_v3 }
 0x517   : > { %v3258_v21 = vmax.f32 %v3256_v9, %v3257_v13  ;;  %v3265_v39 = vmax.f32 %v3263_v51, %v3264_v46  ;;  %v8623_v56 = vpop.f32.mrf.mxu1  ;;  %v3249_v8 = vmax.f32 %v3247_v5, %v3248_v59  ;;  %v2743_v54 = vadd.f32 %v10381_v61, %v10347_v22 }
 0x518   : > { %v3172_v16 = vadd.f32 %v8623_v56, %v3132_v2  ;;  %v3201_v55 = vadd.f32 %v3169_v30, %v2739_v27  ;;  %v3268_v9 = vsel %vm1345_vm3, %v3200_v34, -inf  ;;  %v10475_v33 = vadd.f32 %v10381_v61, %v10355_v24 }
 0x519   : > { %v3259_v31 = vrot.slane %v3258_v21, 2  ;;  %v3267_v0 = vmax.f32 %v3265_v39, %v3266_v29  ;;  %v2991_v1 = vpop.f32.mrf.mxu1  ;;  %v3341_v27 = vpack.c.bf16 %v3249_v8, %v3249_v8  ;;  %v3279_v56 = vsel %vm1345_vm3, %v3203_v63, -inf }
 0x51a   : > { %v3204_v53 = vadd.f32 %v3172_v16, %v2742_v10  ;;  %v3170_v43 = vadd.f32 %v3132_v2, %v2991_v1  ;;  %v2750_v2 = vadd.f32 %v10357_v44, %v10381_v61  ;;  %v3276_v48 = vsel %vm1345_vm3, %v3201_v55, -inf }
 0x51b   : > { %v3260_v5 = vmax.f32 %v3258_v21, %v3259_v31  ;;  %v3269_v4 = vmax.f32 %v3267_v0, %v3268_v9  ;;  %v8626_v22 = vpop.f32.mrf.mxu1  ;;  %v3349_v44 = vmax.bf16 %v11968_v7, %v3341_v27  ;;  %v2748_v16 = vadd.f32 %v10381_v61, %v10359_v11 }
 0x51c   : > { %v10477_v59 = vpack.c.bf16 %v3204_v53, %v3203_v63  ;;  %v3202_v41 = vadd.f32 %v3170_v43, %v2740_v50  ;;  %v3175_v42 = vadd.f32 %v8626_v22, %v10423_v45  ;;  %v4124_v9 = vunpack.c.l.b16 %v3341_v27 }
 0x51d   : > { %v3261_v34 = vrot.slane %v3260_v5, 1  ;;  %v3270_v10 = vrot.slane %v3269_v4, 4  ;;  %v3004_v13 = vpop.f32.mrf.mxu1  ;;  %v3281_v43 = vsel %vm1345_vm3, %v3204_v53, -inf }
 0x51e   : > { %v10483_v3 = vpack.c.bf16 %v3202_v41, %v3201_v55  ;;  %v3277_v51 = vsel %vm1345_vm3, %v3202_v41, -inf  ;;  %v3173_v24 = vadd.f32 %v10423_v45, %v3004_v13  ;;  %v3207_v50 = vadd.f32 %v3175_v42, %v2745_v14 }
 0x51f   : > { %v3262_v46 = vmax.f32 %v3260_v5, %v3261_v34  ;;  %v3271_v21 = vmax.f32 %v3269_v4, %v3270_v10  ;;  %v3278_v39 = vmax.f32 %v3276_v48, %v3277_v51  ;;  %v8627_v30 = vpop.f32.mrf.mxu1  ;;  %v3378_v34 = vunpack.c.l.b16 %v3349_v44 }
 0x520   : > { %v3205_v8 = vadd.f32 %v3173_v24, %v2743_v54  ;;  %v3176_v29 = vadd.f32 %v8627_v30, %v10423_v45 }
 0x521   : > { %v3342_v31 = vpack.c.bf16 %v3262_v46, %v3262_v46  ;;  %v3272_v0 = vrot.slane %v3271_v21, 2  ;;  %v3280_v55 = vmax.f32 %v3278_v39, %v3279_v56  ;;  %v3007_v1 = vpop.f32.mrf.mxu1  ;;  %v2753_v56 = vadd.f32 %v10361_v49, %v10381_v61 }
 0x522   : > { %v3208_v5 = vadd.f32 %v3176_v29, %v2746_v37  ;;  %v3174_v14 = vadd.f32 %v10423_v45, %v3007_v1  ;;  %v3289_v45 = vsel %vm1345_vm3, %v3205_v8, -inf  ;;  %v3292_v29 = vsel %vm1345_vm3, %v3207_v50, -inf }
 0x523   : > { %v3350_v4 = vmax.bf16 %v11968_v7, %v3342_v31  ;;  %v4125_v22 = vunpack.c.l.b16 %v3342_v31  ;;  %v3273_v63 = vmax.f32 %v3271_v21, %v3272_v0  ;;  %v3282_v54 = vmax.f32 %v3280_v55, %v3281_v43  ;;  %v8630_v41 = vpop.f32.mrf.mxu1 }
 0x524   : > { %v10495_v10 = vpack.c.bf16 %v3208_v5, %v3207_v50  ;;  %v3206_v11 = vadd.f32 %v3174_v14, %v2744_v40  ;;  %v3179_v42 = vadd.f32 %v8630_v41, %v10436_v6  ;;  %v3294_v43 = vsel %vm1345_vm3, %v3208_v5, -inf }
 0x525   : > { %v3379_v13 = vunpack.c.l.b16 %v3350_v4  ;;  %v4132_v27 = vsel %vm2030_vm5, %v4125_v22, %v4124_v9  ;;  %v3274_v48 = vrot.slane %v3273_v63, 1  ;;  %v3283_v53 = vrot.slane %v3282_v54, 4  ;;  %v3020_v37 = vpop.f32.mrf.mxu1 }
 0x526   : > { %v10500_v51 = vpack.c.bf16 %v3206_v11, %v3205_v8  ;;  %v3290_v24 = vsel %vm1345_vm3, %v3206_v11, -inf  ;;  %v3211_v46 = vadd.f32 %v3179_v42, %v2749_v28  ;;  %v3177_v31 = vadd.f32 %v10436_v6, %v3020_v37 }
 0x527   : > { %v3386_v21 = vsel %vm2030_vm5, %v3379_v13, %v3378_v34  ;;  %v3275_v39 = vmax.f32 %v3273_v63, %v3274_v48  ;;  %v3284_v30 = vmax.f32 %v3282_v54, %v3283_v53  ;;  %v3291_v40 = vmax.f32 %v3289_v45, %v3290_v24  ;;  %v8631_v44 = vpop.f32.mrf.mxu1 }
 0x528   : > { %v3180_v0 = vadd.f32 %v8631_v44, %v10436_v6  ;;  %v2751_v8 = vadd.f32 %v10381_v61, %v10363_v36  ;;  %v3209_v14 = vadd.f32 %v3177_v31, %v10475_v33  ;;  %v2754_v36 = vadd.f32 %v10365_v18, %v10381_v61 }
 0x529   : > { %v3343_v55 = vpack.c.bf16 %v3275_v39, %v3275_v39  ;;  %v3285_v28 = vrot.slane %v3284_v30, 2  ;;  %v3293_v1 = vmax.f32 %v3291_v40, %v3292_v29  ;;  %v3023_v9 = vpop.f32.mrf.mxu1  ;;  %v2752_v34 = vadd.f32 %v10381_v61, %v10367_v38 }
 0x52a   : > { %v3212_v4 = vadd.f32 %v3180_v0, %v2750_v2  ;;  %v3178_v49 = vadd.f32 %v10436_v6, %v3023_v9  ;;  %v3302_v48 = vsel %vm1345_vm3, %v3209_v14, -inf }
 0x52b   : > { %v3351_v50 = vmax.bf16 %v11968_v7, %v3343_v55  ;;  %v4126_v22 = vunpack.c.l.b16 %v3343_v55  ;;  %v3286_v63 = vmax.f32 %v3284_v30, %v3285_v28  ;;  %v3295_v54 = vmax.f32 %v3293_v1, %v3294_v43  ;;  %v8634_v41 = vpop.f32.mrf.mxu1 }
 0x52c   : > { %v10519_v11 = vpack.c.bf16 %v3212_v4, %v3211_v46  ;;  %v3210_v5 = vadd.f32 %v3178_v49, %v2748_v16  ;;  %v3183_v18 = vadd.f32 %v8634_v41, %v10442_v12  ;;  %v3305_v30 = vsel %vm1345_vm3, %v3211_v46, -inf }
 0x52d   : > { %v3380_v42 = vunpack.c.l.b16 %v3351_v50  ;;  %v4133_v33 = vsel %vm2032_vm6, %v4126_v22, %v4132_v27  ;;  %v3287_v2 = vrot.slane %v3286_v63, 1  ;;  %v3296_v6 = vrot.slane %v3295_v54, 4  ;;  %v3036_v13 = vpop.f32.mrf.mxu1 }
 0x52e   : > { %v10523_v53 = vpack.c.bf16 %v3210_v5, %v3209_v14  ;;  %v3303_v37 = vsel %vm1345_vm3, %v3210_v5, -inf  ;;  %v3181_v39 = vadd.f32 %v10442_v12, %v3036_v13  ;;  %v3215_v27 = vadd.f32 %v3183_v18, %v2753_v56 }
 0x52f   : > { %v3288_v45 = vmax.f32 %v3286_v63, %v3287_v2  ;;  %v3297_v24 = vmax.f32 %v3295_v54, %v3296_v6  ;;  %v3304_v38 = vmax.f32 %v3302_v48, %v3303_v37  ;;  %v8635_v16 = vpop.f32.mrf.mxu1  ;;  %v3387_v44 = vsel %vm2032_vm6, %v3380_v42, %v3386_v21 }
 0x530   : > { %v3184_v40 = vadd.f32 %v8635_v16, %v10442_v12  ;;  %v3213_v55 = vadd.f32 %v3181_v39, %v2751_v8  ;;  %v2757_v1 = vadd.f32 %v10371_v52, %v10381_v61  ;;  %v3307_v9 = vsel %vm1345_vm3, %v3212_v4, -inf }
 0x531   : > { %v3344_v29 = vpack.c.bf16 %v3288_v45, %v3288_v45  ;;  %v3298_v31 = vrot.slane %v3297_v24, 2  ;;  %v3306_v0 = vmax.f32 %v3304_v38, %v3305_v30  ;;  %v3039_v28 = vpop.f32.mrf.mxu1  ;;  %v2755_v21 = vadd.f32 %v10381_v61, %v10373_v58 }
 0x532   : > { %v3216_v43 = vadd.f32 %v3184_v40, %v2754_v36  ;;  %v3182_v14 = vadd.f32 %v10442_v12, %v3039_v28  ;;  %v2758_v8 = vadd.f32 %v10376_v15, %v10381_v61  ;;  %v3315_v5 = vsel %vm1345_vm3, %v3213_v55, -inf }
 0x533   : > { %v3352_v46 = vmax.bf16 %v11968_v7, %v3344_v29  ;;  %v4127_v56 = vunpack.c.l.b16 %v3344_v29  ;;  %v3299_v49 = vmax.f32 %v3297_v24, %v3298_v31  ;;  %v3308_v50 = vmax.f32 %v3306_v0, %v3307_v9  ;;  %v8638_v22 = vpop.f32.mrf.mxu1 }
 0x534   : > { %v10540_v63 = vpack.c.bf16 %v3216_v43, %v3215_v27  ;;  %v3214_v52 = vadd.f32 %v3182_v14, %v2752_v34  ;;  %v3187_v58 = vadd.f32 %v8638_v22, %v10445_v17  ;;  %v3318_v37 = vsel %vm1345_vm3, %v3215_v27, -inf }
 0x535   : > { %v3381_v54 = vunpack.c.l.b16 %v3352_v46  ;;  %v4134_v4 = vsel %vm2034_vm7, %v4127_v56, %v4133_v33  ;;  %v3300_v41 = vrot.slane %v3299_v49, 1  ;;  %v3309_v12 = vrot.slane %v3308_v50, 4  ;;  %v3052_v36 = vpop.f32.mrf.mxu1 }
 0x536   : > { %v10544_v42 = vpack.c.bf16 %v3214_v52, %v3213_v55  ;;  %v3316_v2 = vsel %vm1345_vm3, %v3214_v52, -inf  ;;  %v3185_v48 = vadd.f32 %v10445_v17, %v3052_v36  ;;  %v3219_v33 = vadd.f32 %v3187_v58, %v2757_v1 }
 0x537   : > { %v3301_v6 = vmax.f32 %v3299_v49, %v3300_v41  ;;  %v3310_v13 = vmax.f32 %v3308_v50, %v3309_v12  ;;  %v3317_v15 = vmax.f32 %v3315_v5, %v3316_v2  ;;  %v8639_v34 = vpop.f32.mrf.mxu1  ;;  %v3388_v45 = vsel %vm2034_vm7, %v3381_v54, %v3387_v44 }
 0x538   : > { %v3188_v18 = vadd.f32 %v8639_v34, %v10445_v17  ;;  %v3217_v16 = vadd.f32 %v3185_v48, %v2755_v21  ;;  %v2756_v40 = vadd.f32 %v10381_v61, %v10383_v57  ;;  %v3320_v29 = vsel %vm1345_vm3, %v3216_v43, -inf }
 0x539   : > { %v3345_v24 = vpack.c.bf16 %v3301_v6, %v3301_v6  ;;  %v3311_v38 = vrot.slane %v3310_v13, 2  ;;  %v3319_v39 = vmax.f32 %v3317_v15, %v3318_v37  ;;  %v3055_v30 = vpop.f32.mrf.mxu1 }
 0x53a   : > { %v3220_v31 = vadd.f32 %v3188_v18, %v2758_v8  ;;  %v3186_v0 = vadd.f32 %v10445_v17, %v3055_v30  ;;  %v3328_v61 = vsel %vm1345_vm3, %v3217_v16, -inf  ;;  %v3331_v8 = vsel %vm1345_vm3, %v3219_v33, -inf }
 0x53b   : > { %v3353_v27 = vmax.bf16 %v11968_v7, %v3345_v24  ;;  %v4128_v55 = vunpack.c.l.b16 %v3345_v24  ;;  %v3312_v28 = vmax.f32 %v3310_v13, %v3311_v38  ;;  %v3321_v1 = vmax.f32 %v3319_v39, %v3320_v29 }
 0x53c   : > { %v10557_v9 = vpack.c.bf16 %v3220_v31, %v3219_v33  ;;  %v3218_v44 = vadd.f32 %v3186_v0, %v2756_v40 }
 0x53d   : > { %v3382_v14 = vunpack.c.l.b16 %v3353_v27  ;;  %v4135_v46 = vsel %vm2036_vm8, %v4128_v55, %v4134_v4  ;;  %v3313_v56 = vrot.slane %v3312_v28, 1  ;;  %v3322_v49 = vrot.slane %v3321_v1, 4 }
 0x53e   : > { %v10561_v57 = vpack.c.bf16 %v3218_v44, %v3217_v16  ;;  %v3329_v43 = vsel %vm1345_vm3, %v3218_v44, -inf  ;;  %v3333_v4 = vsel %vm1345_vm3, %v3220_v31, -inf }
 0x53f   : > { %v3314_v17 = vmax.f32 %v3312_v28, %v3313_v56  ;;  %v3323_v50 = vmax.f32 %v3321_v1, %v3322_v49  ;;  %v3330_v22 = vmax.f32 %v3328_v61, %v3329_v43  ;;  %v3389_v21 = vsel %vm2036_vm8, %v3382_v14, %v3388_v45  ;;  %v9156_v14 = vld [vmem:[%s11895_s8 + $0x10] sm:$0xff]   ;;  %v9157_v56 = vld [vmem:[%s11901_s14 + $0x18] sm:$0xff]  }
 0x540   : > { %v3450_v49 = vmax.bf16 %v11968_v7, %v10399_v25  ;;  %v3451_v61 = vmax.bf16 %v11968_v7, %v10426_v26  ;;  %v9162_v43 = vld [vmem:[%s11898_s11 + $0x10] sm:$0xff]  }
 0x541   : > { %v3346_v52 = vpack.c.bf16 %v3314_v17, %v3314_v17  ;;  %v3324_v54 = vrot.slane %v3323_v50, 2  ;;  %v3332_v41 = vmax.f32 %v3330_v22, %v3331_v8  ;;  %v9158_v17 = vld [vmem:[%s11901_s14 + $0x10] sm:$0xff]   ;;  %v3452_v22 = vmax.bf16 %v11968_v7, %v10420_v19 }
 0x542   : > { %v3454_v8 = vmax.bf16 %v11968_v7, %v10449_v20 }
 0x543   : > { %v3354_v12 = vmax.bf16 %v11968_v7, %v3346_v52  ;;  %v4129_v36 = vunpack.c.l.b16 %v3346_v52  ;;  %v3325_v5 = vmax.f32 %v3323_v50, %v3324_v54  ;;  %v3334_v2 = vmax.f32 %v3332_v41, %v3333_v4  ;;  %v9159_v50 = vld [vmem:[%s11900_s13 + $0x18] sm:$0xff]  }
 0x544   : > { %v3455_v52 = vmax.bf16 %v11968_v7, %v10483_v3  ;;  %v3456_v54 = vmax.bf16 %v11968_v7, %v10477_v59  ;;  %v3457_v41 = vmax.bf16 %v11968_v7, %v10500_v51  ;;  %v3458_v4 = vmax.bf16 %v11968_v7, %v10495_v10 }
 0x545   : > { %v3383_v58 = vunpack.c.l.b16 %v3354_v12  ;;  %v4136_v6 = vsel %vm2038_vm9, %v4129_v36, %v4135_v46  ;;  %v3326_v13 = vrot.slane %v3325_v5, 1  ;;  %v3335_v15 = vrot.slane %v3334_v2, 4 }
 0x546   : > { %v3449_v46 = vmax.bf16 %v11968_v7, %v10402_v35  ;;  %v3459_v12 = vmax.bf16 %v11968_v7, %v10523_v53  ;;  %v3460_v36 = vmax.bf16 %v11968_v7, %v10519_v11 }
 0x547   : > { %v3327_v48 = vmax.f32 %v3325_v5, %v3326_v13  ;;  %v3336_v34 = vmax.f32 %v3334_v2, %v3335_v15  ;;  %v3390_v37 = vsel %vm2038_vm9, %v3383_v58, %v3389_v21  ;;  %v3453_v21 = vmax.bf16 %v11968_v7, %v10456_v62  ;;  %v9160_v15 = vld [vmem:[%s11900_s13 + $0x10] sm:$0xff]  }
 0x548   : > { %v3461_v5 = vmax.bf16 %v11968_v7, %v10544_v42  ;;  %v3462_v2 = vmax.bf16 %v11968_v7, %v10540_v63  ;;  %v3463_v58 = vmax.bf16 %v11968_v7, %v10561_v57 }
 0x549   : > { %v3347_v33 = vpack.c.bf16 %v3327_v48, %v3327_v48  ;;  %v3337_v18 = vrot.slane %v3336_v34, 2 }
 0x54b   : > { %v3355_v45 = vmax.bf16 %v11968_v7, %v3347_v33  ;;  %v4130_v24 = vunpack.c.l.b16 %v3347_v33  ;;  %v3338_v38 = vmax.f32 %v3336_v34, %v3337_v18 }
 0x54d   : > { %v4137_v39 = vsel %vm2040_vm10, %v4130_v24, %v4136_v6  ;;  %v3339_v16 = vrot.slane %v3338_v38, 1  ;;  %v3384_v30 = vunpack.c.l.b16 %v3355_v45  ;;  %v3464_v6 = vmax.bf16 %v11968_v7, %v10557_v9 }
 0x54f   : > { %v3340_v40 = vmax.f32 %v3338_v38, %v3339_v16  ;;  %v3391_v29 = vsel %vm2040_vm10, %v3384_v30, %v3390_v37 }
 0x551   : > { %v3348_v31 = vpack.c.bf16 %v3340_v40, %v3340_v40 }
 0x553   : > { %v4131_v0 = vunpack.c.l.b16 %v3348_v31  ;;  %v3356_v27 = vmax.bf16 %v11968_v7, %v3348_v31 }
 0x555   : > { %v4138_v55 = vsel %vm2042_vm11, %v4131_v0, %v4137_v39  ;;  %v3385_v28 = vunpack.c.l.b16 %v3356_v27 }
 0x556   : > { %v4139_v13 = vpack.c.b16 %v4138_v55, %v4138_v55 }
 0x557   : > { %v3392_v1 = vsel %vm2042_vm11, %v3385_v28, %v3391_v29 }
 0x558   : > { %v3393_v44 = vpack.c.b16 %v3392_v1, %v3392_v1 }
 0x55a   : > { %8645 = vmatmul.mubr.msk.bf16.vlgmr.msra.gmra.mxu0 %vm1345_vm3, %v3393_v44 }
 0x55b   : > { %8649 = vmatpush3.bf16.msra.mxu0 %v10340_v47  ;;  %8652 = vmatprep.mubr.msk.bf16.mxu0 %vm1345_vm3, %v3449_v46  ;;  %v9161_v47 = vld [vmem:[%s11898_s11 + $0x18] sm:$0xff]  }
 0x55c   : > { %8650 = vmatprep.subr.bf16.mxu0 %v9156_v14  ;;  %8684 = vmatprep.subr.bf16.mxu1 %v9161_v47 }
 0x55d   : > { %8685 = vmatpush3.bf16.msra.mxu1 %v9161_v47 }
 0x55e   : > { %8686 = vmatprep.subr.bf16.mxu1 %v9162_v43 }
 0x55f   : > { %8651 = vmatpush3.bf16.msra.mxu0 %v9156_v14 }
 0x560   : > { %8720 = vmatprep.subr.bf16.mxu0 %v11979_v60 }
 0x561   : > { %8687 = vmatpush3.bf16.msra.mxu1 %v9162_v43 }
 0x562   : > { %8653 = vmatmul.mubr.msk.bf16.vlgmr.msra.gmra.mxu0 %vm1345_vm3, %v3450_v49  ;;  %8764 = vmatprep.subr.bf16.mxu1 %v11979_v60 }
 0x563   : > { %8656 = vmatprep.mubr.msk.bf16.mxu0 %vm1345_vm3, %v3451_v61  ;;  %8721 = vmatpush3.bf16.msra.mxu0 %v9157_v56 }
 0x564   : > { %8722 = vmatprep.subr.bf16.mxu0 %v11979_v60 }
 0x567   : > { %8723 = vmatpush3.bf16.msra.mxu0 %v9158_v17 }
 0x568   : > { %8728 = vmatprep.subr.bf16.mxu0 %v9159_v50 }
 0x56a   : > { %8657 = vmatmul.mubr.msk.bf16.gmra.mxu0 %vm1345_vm3, %v3452_v22 }
 0x56b   : > { %8660 = vmatprep.mubr.msk.bf16.mxu0 %vm1345_vm3, %v3453_v21 }
 0x572   : > { %8661 = vmatmul.mubr.msk.bf16.gmra.mxu0 %vm1345_vm3, %v3454_v8 }
 0x573   : > { %8664 = vmatprep.mubr.msk.bf16.mxu0 %vm1345_vm3, %v3455_v52 }
 0x57a   : > { %8665 = vmatmul.mubr.msk.bf16.gmra.mxu0 %vm1345_vm3, %v3456_v54 }
 0x57b   : > { %8668 = vmatprep.mubr.msk.bf16.mxu0 %vm1345_vm3, %v3457_v41 }
 0x582   : > { %8669 = vmatmul.mubr.msk.bf16.gmra.mxu0 %vm1345_vm3, %v3458_v4 }
 0x583   : > { %8672 = vmatprep.mubr.msk.bf16.mxu0 %vm1345_vm3, %v3459_v12 }
 0x58a   : > { %8673 = vmatmul.mubr.msk.bf16.gmra.mxu0 %vm1345_vm3, %v3460_v36 }
 0x58b   : > { %8676 = vmatprep.mubr.msk.bf16.mxu0 %vm1345_vm3, %v3461_v5 }
 0x592   : > { %8677 = vmatmul.mubr.msk.bf16.gmra.mxu0 %vm1345_vm3, %v3462_v2 }
 0x593   : > { %8680 = vmatprep.mubr.msk.bf16.mxu0 %vm1345_vm3, %v3463_v58 }
 0x59a   : > { %8681 = vmatmul.mubr.msk.bf16.gmra.mxu0 %vm1345_vm3, %v3464_v6 }
 0x59b   : > { %8724 = vmatprep.mubr.msk.bf16.mxu0 %vm9398_vm4, %v11979_v60 }
 0x5a2   : > { %8725 = vmatmul.mubr.msk.bf16.vlgmr.msra.gmra.mxu0 %vm1345_vm3, %v4139_v13 }
 0x5a3   : > { %8729 = vmatpush3.bf16.msra.mxu0 %v9159_v50  ;;  %8732 = vmatprep.mubr.msk.bf16.mxu0 %vm1345_vm3, %v10402_v35 }
 0x5a4   : > { %8730 = vmatprep.subr.bf16.mxu0 %v9160_v15 }
 0x5a7   : > { %8731 = vmatpush3.bf16.msra.mxu0 %v9160_v15 }
 0x5aa   : > { %8733 = vmatmul.mubr.msk.bf16.vlgmr.msra.gmra.mxu0 %vm1345_vm3, %v10399_v25  ;;  %v7794_v25 = vld [vmem:[#allocation10 + $0x1] ss:$0 sm:$0xff] }
 0x5ab   : > { %8736 = vmatprep.mubr.msk.bf16.mxu0 %vm1345_vm3, %v10426_v26 }
 0x5b2   : > { %8737 = vmatmul.mubr.msk.bf16.gmra.mxu0 %vm1345_vm3, %v10420_v19 }
 0x5b3   : > { %8740 = vmatprep.mubr.msk.bf16.mxu0 %vm1345_vm3, %v10456_v62 }
 0x5ba   : > { %8741 = vmatmul.mubr.msk.bf16.gmra.mxu0 %vm1345_vm3, %v10449_v20 }
 0x5bb   : > { %8744 = vmatprep.mubr.msk.bf16.mxu0 %vm1345_vm3, %v10483_v3 }
 0x5c2   : > { %8745 = vmatmul.mubr.msk.bf16.gmra.mxu0 %vm1345_vm3, %v10477_v59 }
 0x5c3   : > { %8748 = vmatprep.mubr.msk.bf16.mxu0 %vm1345_vm3, %v10500_v51 }
 0x5ca   : > { %8749 = vmatmul.mubr.msk.bf16.gmra.mxu0 %vm1345_vm3, %v10495_v10 }
 0x5cb   : > { %8752 = vmatprep.mubr.msk.bf16.mxu0 %vm1345_vm3, %v10523_v53 }
 0x5d2   : > { %8753 = vmatmul.mubr.msk.bf16.gmra.mxu0 %vm1345_vm3, %v10519_v11 }
 0x5d3   : > { %8756 = vmatprep.mubr.msk.bf16.mxu0 %vm1345_vm3, %v10544_v42 }
 0x5da   : > { %8757 = vmatmul.mubr.msk.bf16.gmra.mxu0 %vm1345_vm3, %v10540_v63 }
 0x5db   : > { %8760 = vmatprep.mubr.msk.bf16.mxu0 %vm1345_vm3, %v10561_v57 }
 0x5e2   : > { %8761 = vmatmul.mubr.msk.bf16.gmra.mxu0 %vm1345_vm3, %v10557_v9 }
 0x61a   : > { %v3443_v35 = vpop.f32.mrf.mxu0 }
 0x61b   : > { %v3444_v19 = vadd.f32 %v7794_v25, %v3443_v35 }
 0x61c   : > { %v8646_v26 = vpop.f32.mrf.mxu0 }
 0x61d   : > { %v3699_v20 = vrot.slane %v3444_v19, %v10198_v32  ;;  %v3692_v50 = vcombine.high %v3444_v19, %v3444_v19 }
 0x61e   : > { %v3446_v62 = vpop.f32.mrf.mxu0 }
 0x61f   : > { %v3715_v59 = vrot.slane %v3699_v20, %v10198_v32  ;;  %v3707_v53 = vcombine.high %v3699_v20, %v3699_v20  ;;  %v3706_v12 = vrot.slane %v3692_v50, %v10198_v32 }
 0x620   : > { %v8647_v3 = vpop.f32.mrf.mxu0 }
 0x621   : > { %v3744_v51 = vrot.slane %v3715_v59, %v10202_v23  ;;  %v3729_v9 = vrot.slane %v3707_v53, %v10198_v32  ;;  %v3737_v0 = vcombine.high %v3715_v59, %v3715_v59  ;;  %v3722_v25 = vrot.slane %v3706_v12, %v10198_v32 }
 0x622   : > { %v8654_v10 = vpop.f32.mrf.mxu0  ;;  %v3708_v3 = vcombine.high %v3706_v12, %v3706_v12 }
 0x623   : > { %v3783_v57 = vadd.f32 %v8654_v10, %v3744_v51  ;;  %v3748_v39 = vrot.slane %v3729_v9, %v10202_v23  ;;  %v3752_v56 = vrot.slane %v3737_v0, %v10202_v23  ;;  %v3739_v22 = vcombine.high %v3729_v9, %v3729_v9 }
 0x624   : > { %v3564_v11 = vpop.f32.mrf.mxu0 }
 0x625   : > { %v3781_v34 = vadd.f32 %v3744_v51, %v3564_v11  ;;  %v3756_v5 = vrot.slane %v3739_v22, %v10202_v23 }
 0x626   : > { %v8655_v63 = vpop.f32.mrf.mxu0 }
 0x627   : > { %v3784_v42 = vadd.f32 %v8655_v63, %v3744_v51 }
 0x628   : > { %v3567_v48 = vpop.f32.mrf.mxu0 }
 0x629   : > { %v3782_v37 = vadd.f32 %v3744_v51, %v3567_v48  ;;  %v3814_v33 = vpack.c.bf16 %v3784_v42, %v3783_v57  ;;  %v3760_v51 = vrot.slane %v3722_v25, %v10202_v23  ;;  %v3736_v48 = vrot.slane %v3708_v3, %v10198_v32  ;;  %v9163_v3 = vld [vmem:[%s11896_s9 + $0x28] sm:$0xff]  }
 0x62a   : > { %v8658_v18 = vpop.f32.mrf.mxu0 }
 0x62b   : > { %v3813_v45 = vpack.c.bf16 %v3782_v37, %v3781_v34  ;;  %v3830_v16 = vmax.bf16 %v11968_v7, %v3814_v33  ;;  %v3787_v29 = vadd.f32 %v8658_v18, %v3748_v39  ;;  %v3740_v22 = vcombine.high %v3736_v48, %v3736_v48 }
 0x62c   : > { %v3580_v24 = vpop.f32.mrf.mxu0 }
 0x62d   : > { %v3829_v38 = vmax.bf16 %v11968_v7, %v3813_v45  ;;  %v3785_v27 = vadd.f32 %v3748_v39, %v3580_v24 }
 0x62e   : > { %v8659_v30 = vpop.f32.mrf.mxu0 }
 0x62f   : > { %v3788_v40 = vadd.f32 %v8659_v30, %v3748_v39  ;;  %8688 = vmatprep.mubr.msk.bf16.mxu1 %vm1345_vm3, %v3829_v38  ;;  %v3764_v38 = vrot.slane %v3736_v48, %v10202_v23 }
 0x630   : > { %v3583_v31 = vpop.f32.mrf.mxu0  ;;  %8689 = vmatmul.mubr.msk.bf16.vlgmr.msra.gmra.mxu1 %vm1345_vm3, %v3830_v16 }
 0x631   : > { %v3786_v55 = vadd.f32 %v3748_v39, %v3583_v31  ;;  %v3816_v28 = vpack.c.bf16 %v3788_v40, %v3787_v29  ;;  %v3738_v31 = vcombine.high %v3722_v25, %v3722_v25  ;;  %8765 = vmatpush3.bf16.msra.mxu1 %v9163_v3 }
 0x632   : > { %v8662_v1 = vpop.f32.mrf.mxu0  ;;  %8766 = vmatprep.subr.bf16.mxu1 %v11979_v60 }
 0x633   : > { %v3815_v44 = vpack.c.bf16 %v3786_v55, %v3785_v27  ;;  %v3832_v49 = vmax.bf16 %v11968_v7, %v3816_v28  ;;  %v3791_v43 = vadd.f32 %v8662_v1, %v3752_v56 }
 0x634   : > { %v3596_v14 = vpop.f32.mrf.mxu0 }
 0x635   : > { %v3831_v46 = vmax.bf16 %v11968_v7, %v3815_v44  ;;  %v3789_v21 = vadd.f32 %v3752_v56, %v3596_v14 }
 0x636   : > { %v8663_v61 = vpop.f32.mrf.mxu0 }
 0x637   : > { %v3792_v47 = vadd.f32 %v8663_v61, %v3752_v56  ;;  %8692 = vmatprep.mubr.msk.bf16.mxu1 %vm1345_vm3, %v3831_v46  ;;  %v3768_v46 = vrot.slane %v3738_v31, %v10202_v23 }
 0x638   : > { %v3599_v17 = vpop.f32.mrf.mxu0  ;;  %8693 = vmatmul.mubr.msk.bf16.gmra.mxu1 %vm1345_vm3, %v3832_v49 }
 0x639   : > { %v3790_v8 = vadd.f32 %v3752_v56, %v3599_v17  ;;  %v3818_v52 = vpack.c.bf16 %v3792_v47, %v3791_v43 }
 0x63a   : > { %v8666_v54 = vpop.f32.mrf.mxu0 }
 0x63b   : > { %v3817_v41 = vpack.c.bf16 %v3790_v8, %v3789_v21  ;;  %v3834_v2 = vmax.bf16 %v11968_v7, %v3818_v52  ;;  %v3795_v13 = vadd.f32 %v8666_v54, %v3756_v5 }
 0x63c   : > { %v3612_v4 = vpop.f32.mrf.mxu0 }
 0x63d   : > { %v3833_v36 = vmax.bf16 %v11968_v7, %v3817_v41  ;;  %v3793_v35 = vadd.f32 %v3756_v5, %v3612_v4  ;;  %v3772_v4 = vrot.slane %v3740_v22, %v10202_v23 }
 0x63e   : > { %v8667_v58 = vpop.f32.mrf.mxu0 }
 0x63f   : > { %v3796_v6 = vadd.f32 %v8667_v58, %v3756_v5  ;;  %8696 = vmatprep.mubr.msk.bf16.mxu1 %vm1345_vm3, %v3833_v36 }
 0x640   : > { %v3615_v15 = vpop.f32.mrf.mxu0  ;;  %8697 = vmatmul.mubr.msk.bf16.gmra.mxu1 %vm1345_vm3, %v3834_v2 }
 0x641   : > { %v3794_v19 = vadd.f32 %v3756_v5, %v3615_v15  ;;  %v3820_v26 = vpack.c.bf16 %v3796_v6, %v3795_v13 }
 0x642   : > { %v8670_v20 = vpop.f32.mrf.mxu0 }
 0x643   : > { %v3819_v62 = vpack.c.bf16 %v3794_v19, %v3793_v35  ;;  %v3836_v11 = vmax.bf16 %v11968_v7, %v3820_v26  ;;  %v3799_v42 = vadd.f32 %v8670_v20, %v3760_v51 }
 0x644   : > { %v3628_v59 = vpop.f32.mrf.mxu0 }
 0x645   : > { %v3835_v10 = vmax.bf16 %v11968_v7, %v3819_v62  ;;  %v3797_v9 = vadd.f32 %v3760_v51, %v3628_v59 }
 0x646   : > { %v8671_v53 = vpop.f32.mrf.mxu0 }
 0x647   : > { %v3800_v63 = vadd.f32 %v8671_v53, %v3760_v51  ;;  %8700 = vmatprep.mubr.msk.bf16.mxu1 %vm1345_vm3, %v3835_v10 }
 0x648   : > { %v3631_v57 = vpop.f32.mrf.mxu0  ;;  %8701 = vmatmul.mubr.msk.bf16.gmra.mxu1 %vm1345_vm3, %v3836_v11 }
 0x649   : > { %v3798_v34 = vadd.f32 %v3760_v51, %v3631_v57  ;;  %v3822_v37 = vpack.c.bf16 %v3800_v63, %v3799_v42 }
 0x64a   : > { %v8674_v33 = vpop.f32.mrf.mxu0 }
 0x64b   : > { %v3821_v18 = vpack.c.bf16 %v3798_v34, %v3797_v9  ;;  %v3838_v39 = vmax.bf16 %v11968_v7, %v3822_v37  ;;  %v3803_v40 = vadd.f32 %v8674_v33, %v3764_v38  ;;  %v9164_v9 = vld [vmem:[%s11896_s9 + $0x20] sm:$0xff]   ;;  %v10747_v34 = vld [vmem:[%s11895_s8 + $0x28] sm:$0xff]  }
 0x64c   : > { %v3644_v45 = vpop.f32.mrf.mxu0  ;;  %8767 = vmatpush3.bf16.msra.mxu1 %v9164_v9 }
 0x64d   : > { %v3837_v24 = vmax.bf16 %v11968_v7, %v3821_v18  ;;  %v3801_v0 = vadd.f32 %v3764_v38, %v3644_v45  ;;  %8772 = vmatprep.subr.bf16.mxu1 %v10747_v34 }
 0x64e   : > { %v8675_v16 = vpop.f32.mrf.mxu0 }
 0x64f   : > { %v3804_v30 = vadd.f32 %v8675_v16, %v3764_v38  ;;  %8704 = vmatprep.mubr.msk.bf16.mxu1 %vm1345_vm3, %v3837_v24 }
 0x650   : > { %v3647_v29 = vpop.f32.mrf.mxu0  ;;  %8705 = vmatmul.mubr.msk.bf16.gmra.mxu1 %vm1345_vm3, %v3838_v39 }
 0x651   : > { %v3802_v27 = vadd.f32 %v3764_v38, %v3647_v29  ;;  %v3824_v55 = vpack.c.bf16 %v3804_v30, %v3803_v40 }
 0x652   : > { %v8678_v28 = vpop.f32.mrf.mxu0 }
 0x653   : > { %v3823_v1 = vpack.c.bf16 %v3802_v27, %v3801_v0  ;;  %v3840_v56 = vmax.bf16 %v11968_v7, %v3824_v55  ;;  %v3807_v47 = vadd.f32 %v8678_v28, %v3768_v46  ;;  %v10776_v55 = vld [vmem:[%s11899_s12 + $0x1] ss:$0 sm:$0xff] }
 0x654   : > { %v3660_v44 = vpop.f32.mrf.mxu0 }
 0x655   : > { %v3839_v14 = vmax.bf16 %v11968_v7, %v3823_v1  ;;  %v3805_v17 = vadd.f32 %v3768_v46, %v3660_v44 }
 0x656   : > { %v8679_v49 = vpop.f32.mrf.mxu0 }
 0x657   : > { %v3808_v61 = vadd.f32 %v8679_v49, %v3768_v46  ;;  %8708 = vmatprep.mubr.msk.bf16.mxu1 %vm1345_vm3, %v3839_v14 }
 0x658   : > { %v3663_v43 = vpop.f32.mrf.mxu0  ;;  %8709 = vmatmul.mubr.msk.bf16.gmra.mxu1 %vm1345_vm3, %v3840_v56 }
 0x659   : > { %v3806_v50 = vadd.f32 %v3768_v46, %v3663_v43  ;;  %v3826_v21 = vpack.c.bf16 %v3808_v61, %v3807_v47 }
 0x65a   : > { %v8682_v8 = vpop.f32.mrf.mxu0 }
 0x65b   : > { %v3825_v52 = vpack.c.bf16 %v3806_v50, %v3805_v17  ;;  %v3842_v12 = vmax.bf16 %v11968_v7, %v3826_v21  ;;  %v3811_v2 = vadd.f32 %v8682_v8, %v3772_v4 }
 0x65c   : > { %v3676_v54 = vpop.f32.mrf.mxu0 }
 0x65d   : > { %v3841_v41 = vmax.bf16 %v11968_v7, %v3825_v52  ;;  %v3809_v6 = vadd.f32 %v3772_v4, %v3676_v54 }
 0x65e   : > { %v8683_v36 = vpop.f32.mrf.mxu0 }
 0x65f   : > { %v3812_v5 = vadd.f32 %v8683_v36, %v3772_v4  ;;  %8712 = vmatprep.mubr.msk.bf16.mxu1 %vm1345_vm3, %v3841_v41 }
 0x660   : > { %v3679_v58 = vpop.f32.mrf.mxu0  ;;  %8713 = vmatmul.mubr.msk.bf16.gmra.mxu1 %vm1345_vm3, %v3842_v12 }
 0x661   : > { %v3810_v13 = vadd.f32 %v3772_v4, %v3679_v58  ;;  %v3828_v15 = vpack.c.bf16 %v3812_v5, %v3811_v2 }
 0x662   : > { %v10727_v25 = vpop.f32.mrf.mxu0 }
 0x663   : > { %v3827_v35 = vpack.c.bf16 %v3810_v13, %v3809_v6  ;;  %v3844_v20 = vmax.bf16 %v11968_v7, %v3828_v15  ;;  %v4429_v30 = vrot.slane %v10727_v25, %v10198_v32  ;;  %v4422_v52 = vcombine.high %v10727_v25, %v10727_v25 }
 0x664   : > { %v8726_v19 = vpop.f32.mrf.mxu0 }
 0x665   : > { %v3843_v26 = vmax.bf16 %v11968_v7, %v3827_v35  ;;  %v4445_v29 = vrot.slane %v4429_v30, %v10198_v32  ;;  %v4437_v0 = vcombine.high %v4429_v30, %v4429_v30  ;;  %v4436_v35 = vrot.slane %v4422_v52, %v10198_v32 }
 0x666   : > { %v4192_v62 = vpop.f32.mrf.mxu0 }
 0x667   : > { %8716 = vmatprep.mubr.msk.bf16.mxu1 %vm1345_vm3, %v3843_v26  ;;  %v4474_v1 = vrot.slane %v4445_v29, %v10202_v23  ;;  %v10782_v49 = vrot.slane %v4437_v0, %v10198_v32  ;;  %v4467_v62 = vcombine.high %v4445_v29, %v4445_v29 }
 0x668   : > { %8717 = vmatmul.mubr.msk.bf16.gmra.mxu1 %vm1345_vm3, %v3844_v20  ;;  %v8727_v59 = vpop.f32.mrf.mxu0 }
 0x669   : > { %8768 = vmatprep.mubr.msk.bf16.mxu1 %vm9398_vm4, %v11979_v60  ;;  %v4478_v5 = vrot.slane %v10782_v49, %v10202_v23  ;;  %v4469_v52 = vcombine.high %v10782_v49, %v10782_v49 }
 0x66a   : > { %v8734_v10 = vpop.f32.mrf.mxu0 }
 0x66b   : > { %v4513_v61 = vadd.f32 %v8734_v10, %v4474_v1 }
 0x66c   : > { %v4294_v51 = vpop.f32.mrf.mxu0 }
 0x66d   : > { %v4511_v46 = vadd.f32 %v4474_v1, %v4294_v51 }
 0x66e   : > { %v8735_v11 = vpop.f32.mrf.mxu0 }
 0x66f   : > { %v4514_v54 = vadd.f32 %v8735_v11, %v4474_v1 }
 0x670   : > { %v4297_v53 = vpop.f32.mrf.mxu0 }
 0x671   : > { %v4512_v17 = vadd.f32 %v4474_v1, %v4297_v53 }
 0x672   : > { %v8738_v63 = vpop.f32.mrf.mxu0 }
 0x673   : > { %v4517_v59 = vadd.f32 %v8738_v63, %v4478_v5 }
 0x674   : > { %v4310_v42 = vpop.f32.mrf.mxu0 }
 0x675   : > { %v4515_v19 = vadd.f32 %v4478_v5, %v4310_v42 }
 0x676   : > { %v10739_v57 = vpop.f32.mrf.mxu0 }
 0x678   : > { %v4313_v48 = vpop.f32.mrf.mxu0 }
 0x679   : > { %v4516_v3 = vadd.f32 %v4478_v5, %v4313_v48  ;;  %v4438_v48 = vcombine.high %v4436_v35, %v4436_v35 }
 0x67a   : > { %v10749_v37 = vpop.f32.mrf.mxu0 }
 0x67c   : > { %v10752_v33 = vpop.f32.mrf.mxu0 }
 0x67e   : > { %v10754_v18 = vpop.f32.mrf.mxu0 }
 0x680   : > { %v10756_v45 = vpop.f32.mrf.mxu0 }
 0x682   : > { %v10758_v24 = vpop.f32.mrf.mxu0 }
 0x684   : > { %v10760_v38 = vpop.f32.mrf.mxu0 }
 0x686   : > { %v10762_v39 = vpop.f32.mrf.mxu0 }
 0x688   : > { %v10764_v16 = vpop.f32.mrf.mxu0 }
 0x68a   : > { %v10768_v40 = vpop.f32.mrf.mxu0 }
 0x68c   : > { %v10771_v27 = vpop.f32.mrf.mxu0 }
 0x68e   : > { %v10784_v47 = vpop.f32.mrf.mxu0 }
 0x690   : > { %v10796_v12 = vpop.f32.mrf.mxu0 }
 0x692   : > { %v10811_v10 = vpop.f32.mrf.mxu0 }
 0x694   : > { %v10824_v1 = vpop.f32.mrf.mxu0 }
 0x6f0   : > { %v8690_v31 = vpop.f32.mrf.mxu1 }
 0x6f1   : > { %v4081_v56 = vadd.f32 %v8690_v31, %v10776_v55 }
 0x6f2   : > { %v3944_v28 = vpop.f32.mrf.mxu1 }
 0x6f3   : > { %v4079_v44 = vadd.f32 %v10776_v55, %v3944_v28  ;;  %v10792_v41 = vadd.f32 %v4513_v61, %v4081_v56  ;;  %v4518_v28 = vadd.f32 %v10739_v57, %v4478_v5  ;;  %v10834_v57 = vrot.slane %v4436_v35, %v10198_v32 }
 0x6f4   : > { %v8691_v14 = vpop.f32.mrf.mxu1 }
 0x6f5   : > { %v10786_v50 = vadd.f32 %v4511_v46, %v4079_v44  ;;  %v4082_v22 = vadd.f32 %v8691_v14, %v10776_v55  ;;  %v4594_v26 = vsel %vm1345_vm3, %v10792_v41, -inf  ;;  %v4482_v46 = vrot.slane %v4467_v62, %v10202_v23 }
 0x6f6   : > { %v3947_v43 = vpop.f32.mrf.mxu1 }
 0x6f7   : > { %v4080_v21 = vadd.f32 %v10776_v55, %v3947_v43  ;;  %v4591_v2 = vsel %vm1345_vm3, %v10786_v50, -inf  ;;  %v10802_v58 = vadd.f32 %v4514_v54, %v4082_v22  ;;  %v4519_v54 = vadd.f32 %v4482_v46, %v10752_v33 }
 0x6f8   : > { %v8694_v8 = vpop.f32.mrf.mxu1 }
 0x6f9   : > { %v10794_v4 = vadd.f32 %v4512_v17, %v4080_v21  ;;  %v4085_v20 = vadd.f32 %v8694_v8, %v10776_v55  ;;  %v4596_v53 = vsel %vm1345_vm3, %v10802_v58, -inf }
 0x6fa   : > { %v3960_v36 = vpop.f32.mrf.mxu1 }
 0x6fb   : > { %v4592_v6 = vsel %vm1345_vm3, %v10794_v4, -inf  ;;  %v4083_v15 = vadd.f32 %v10776_v55, %v3960_v36  ;;  %v10820_v29 = vadd.f32 %v4517_v59, %v4085_v20 }
 0x6fc   : > { %v4593_v13 = vmax.f32 %v4591_v2, %v4592_v6  ;;  %v8695_v25 = vpop.f32.mrf.mxu1  ;;  %v4521_v2 = vadd.f32 %v10749_v37, %v4482_v46  ;;  %v4520_v6 = vadd.f32 %v4482_v46, %v10756_v45  ;;  %v4522_v37 = vadd.f32 %v10754_v18, %v4482_v46 }
 0x6fd   : > { %v10815_v9 = vadd.f32 %v4515_v19, %v4083_v15  ;;  %v4086_v30 = vadd.f32 %v8695_v25, %v10776_v55  ;;  %v4607_v36 = vsel %vm1345_vm3, %v10820_v29, -inf }
 0x6fe   : > { %v4595_v51 = vmax.f32 %v4593_v13, %v4594_v26  ;;  %v3963_v11 = vpop.f32.mrf.mxu1  ;;  %v10845_v13 = vpop.f32.mrf.mxu0 }
 0x6ff   : > { %v4084_v42 = vadd.f32 %v10776_v55, %v3963_v11  ;;  %v4604_v56 = vsel %vm1345_vm3, %v10815_v9, -inf  ;;  %v10829_v61 = vadd.f32 %v4518_v28, %v4086_v30  ;;  %v4468_v11 = vcombine.high %v10834_v57, %v10834_v57 }
 0x700   : > { %v4597_v31 = vmax.f32 %v4595_v51, %v4596_v53  ;;  %v8698_v0 = vpop.f32.mrf.mxu1  ;;  %v10859_v51 = vrot.slane %v4438_v48, %v10198_v32  ;;  %v10863_v53 = vpop.f32.mrf.mxu0 }
 0x701   : > { %v10822_v63 = vadd.f32 %v4516_v3, %v4084_v42  ;;  %v4089_v5 = vadd.f32 %v8698_v0, %v10776_v55  ;;  %v4609_v19 = vsel %vm1345_vm3, %v10829_v61, -inf }
 0x702   : > { %v4598_v44 = vrot.slane %v4597_v31, 4  ;;  %v3976_v14 = vpop.f32.mrf.mxu1 }
 0x703   : > { %v4605_v43 = vsel %vm1345_vm3, %v10822_v63, -inf  ;;  %v4087_v21 = vadd.f32 %v10776_v55, %v3976_v14  ;;  %v10854_v45 = vadd.f32 %v4521_v2, %v4089_v5 }
 0x704   : > { %v4599_v17 = vmax.f32 %v4597_v31, %v4598_v44  ;;  %v4606_v22 = vmax.f32 %v4604_v56, %v4605_v43  ;;  %v8699_v8 = vpop.f32.mrf.mxu1  ;;  %v4486_v31 = vrot.slane %v4469_v52, %v10202_v23  ;;  %v4490_v43 = vrot.slane %v10834_v57, %v10202_v23  ;;  %v10880_v52 = vpop.f32.mrf.mxu0 }
 0x705   : > { %v10849_v49 = vadd.f32 %v4519_v54, %v4087_v21  ;;  %v4090_v33 = vadd.f32 %v8699_v8, %v10776_v55 }
 0x706   : > { %v4600_v15 = vrot.slane %v4599_v17, 2  ;;  %v4608_v25 = vmax.f32 %v4606_v22, %v4607_v36  ;;  %v3979_v35 = vpop.f32.mrf.mxu1  ;;  %v4620_v22 = vsel %vm1345_vm3, %v10854_v45, -inf  ;;  %v4525_v8 = vadd.f32 %v10758_v24, %v4486_v31 }
 0x707   : > { %v4088_v26 = vadd.f32 %v10776_v55, %v3979_v35  ;;  %v4617_v0 = vsel %vm1345_vm3, %v10849_v49, -inf  ;;  %v10868_v18 = vadd.f32 %v4522_v37, %v4090_v33  ;;  %v4526_v35 = vadd.f32 %v10762_v39, %v4486_v31 }
 0x708   : > { %v4601_v20 = vmax.f32 %v4599_v17, %v4600_v15  ;;  %v4610_v62 = vmax.f32 %v4608_v25, %v4609_v19  ;;  %v8702_v59 = vpop.f32.mrf.mxu1  ;;  %v4523_v17 = vadd.f32 %v4486_v31, %v10760_v38 }
 0x709   : > { %v10856_v3 = vadd.f32 %v4520_v6, %v4088_v26  ;;  %v4093_v21 = vadd.f32 %v8702_v59, %v10776_v55  ;;  %v4524_v6 = vadd.f32 %v4486_v31, %v10764_v16  ;;  %v4622_v15 = vsel %vm1345_vm3, %v10868_v18, -inf }
 0x70a   : > { %v4611_v30 = vrot.slane %v4610_v62, 4  ;;  %v3992_v42 = vpop.f32.mrf.mxu1  ;;  %v4602_v44 = vrot.slane %v4601_v20, 1  ;;  %v4494_v59 = vrot.slane %v10859_v51, %v10202_v23 }
 0x70b   : > { %v4618_v28 = vsel %vm1345_vm3, %v10856_v3, -inf  ;;  %v4091_v46 = vadd.f32 %v10776_v55, %v3992_v42  ;;  %v10893_v37 = vadd.f32 %v4525_v8, %v4093_v21  ;;  %v10898_v42 = vpop.f32.mrf.mxu0  ;;  %v4528_v21 = vadd.f32 %v4490_v43, %v10796_v12 }
 0x70c   : > { %v4612_v48 = vmax.f32 %v4610_v62, %v4611_v30  ;;  %v4619_v14 = vmax.f32 %v4617_v0, %v4618_v28  ;;  %v8703_v56 = vpop.f32.mrf.mxu1  ;;  %v4603_v19 = vmax.f32 %v4601_v20, %v4602_v44  ;;  %v4529_v62 = vadd.f32 %v10768_v40, %v4490_v43 }
 0x70d   : > { %v4094_v5 = vadd.f32 %v8703_v56, %v10776_v55  ;;  %v10886_v38 = vadd.f32 %v4523_v17, %v4091_v46  ;;  %v4527_v30 = vadd.f32 %v4490_v43, %v10771_v27  ;;  %v4633_v8 = vsel %vm1345_vm3, %v10893_v37, -inf }
 0x70e   : > { %v4613_v54 = vrot.slane %v4612_v48, 2  ;;  %v4621_v36 = vmax.f32 %v4619_v14, %v4620_v22  ;;  %v3995_v2 = vpop.f32.mrf.mxu1  ;;  %v10908_v14 = vpack.c.bf16 %v4603_v19, %v4603_v19  ;;  %v4530_v22 = vadd.f32 %v10784_v47, %v4490_v43 }
 0x70f   : > { %v4092_v25 = vadd.f32 %v10776_v55, %v3995_v2  ;;  %v10900_v39 = vadd.f32 %v4526_v35, %v4094_v5  ;;  %v4630_v31 = vsel %vm1345_vm3, %v10886_v38, -inf }
 0x710   : > { %v4614_v24 = vmax.f32 %v4612_v48, %v4613_v54  ;;  %v4623_v33 = vmax.f32 %v4621_v36, %v4622_v15  ;;  %v8706_v26 = vpop.f32.mrf.mxu1  ;;  %v10915_v36 = vpop.f32.mrf.mxu0  ;;  %v5478_v43 = vunpack.c.l.b16 %v10908_v14 }
 0x711   : > { %v10895_v16 = vadd.f32 %v4524_v6, %v4092_v25  ;;  %v4097_v44 = vadd.f32 %v8706_v26, %v10776_v55  ;;  %v4635_v6 = vsel %vm1345_vm3, %v10900_v39, -inf }
 0x712   : > { %v4615_v0 = vrot.slane %v4614_v24, 1  ;;  %v4624_v28 = vrot.slane %v4623_v33, 4  ;;  %v4008_v20 = vpop.f32.mrf.mxu1 }
 0x713   : > { %v4631_v40 = vsel %vm1345_vm3, %v10895_v16, -inf  ;;  %v4095_v48 = vadd.f32 %v10776_v55, %v4008_v20  ;;  %v4561_v35 = vadd.f32 %v4529_v62, %v4097_v44  ;;  %v4498_v62 = vrot.slane %v4468_v11, %v10202_v23 }
 0x714   : > { %v4616_v27 = vmax.f32 %v4614_v24, %v4615_v0  ;;  %v4625_v46 = vmax.f32 %v4623_v33, %v4624_v28  ;;  %v4632_v56 = vmax.f32 %v4630_v31, %v4631_v40  ;;  %v8707_v17 = vpop.f32.mrf.mxu1  ;;  %v4470_v28 = vcombine.high %v10859_v51, %v10859_v51  ;;  %v4393_v40 = vpop.f32.mrf.mxu0 }
 0x715   : > { %v4098_v54 = vadd.f32 %v8707_v17, %v10776_v55  ;;  %v10921_v19 = vadd.f32 %v4527_v30, %v4095_v48  ;;  %v4533_v31 = vadd.f32 %v10811_v10, %v4494_v59  ;;  %v4534_v17 = vadd.f32 %v10845_v13, %v4494_v59 }
 0x716   : > { %v10917_v5 = vpack.c.bf16 %v4616_v27, %v4616_v27  ;;  %v4626_v2 = vrot.slane %v4625_v46, 2  ;;  %v4634_v15 = vmax.f32 %v4632_v56, %v4633_v8  ;;  %v4011_v25 = vpop.f32.mrf.mxu1  ;;  %v4531_v56 = vadd.f32 %v4494_v59, %v10824_v1 }
 0x717   : > { %v4562_v47 = vadd.f32 %v4530_v22, %v4098_v54  ;;  %v4096_v12 = vadd.f32 %v10776_v55, %v4011_v25  ;;  %v4643_v51 = vsel %vm1345_vm3, %v10921_v19, -inf  ;;  %v4532_v54 = vadd.f32 %v4494_v59, %v10863_v53 }
 0x718   : > { %v5479_v24 = vunpack.c.l.b16 %v10917_v5  ;;  %v4627_v33 = vmax.f32 %v4625_v46, %v4626_v2  ;;  %v4636_v26 = vmax.f32 %v4634_v15, %v4635_v6  ;;  %v8710_v0 = vpop.f32.mrf.mxu1  ;;  %v4646_v2 = vsel %vm1345_vm3, %v4561_v35, -inf  ;;  %v8762_v15 = vpop.f32.mrf.mxu0 }
 0x719   : > { %v10932_v30 = vpack.c.bf16 %v4562_v47, %v4561_v35  ;;  %v10934_v20 = vadd.f32 %v4528_v21, %v4096_v12  ;;  %v4101_v11 = vadd.f32 %v8710_v0, %v10776_v55 }
 0x71a   : > { %v5486_v44 = vsel %vm2030_vm5, %v5479_v24, %v5478_v43  ;;  %v4628_v48 = vrot.slane %v4627_v33, 1  ;;  %v4637_v27 = vrot.slane %v4636_v26, 4  ;;  %v4024_v46 = vpop.f32.mrf.mxu1  ;;  %v4648_v43 = vsel %vm1345_vm3, %v4562_v47, -inf }
 0x71b   : > { %v4644_v57 = vsel %vm1345_vm3, %v10934_v20, -inf  ;;  %v4099_v1 = vadd.f32 %v10776_v55, %v4024_v46  ;;  %v4537_v46 = vadd.f32 %v10880_v52, %v4498_v62  ;;  %v4535_v47 = vadd.f32 %v4498_v62, %v10898_v42 }
 0x71c   : > { %v4629_v22 = vmax.f32 %v4627_v33, %v4628_v48  ;;  %v4638_v10 = vmax.f32 %v4636_v26, %v4637_v27  ;;  %v4645_v21 = vmax.f32 %v4643_v51, %v4644_v57  ;;  %v8711_v8 = vpop.f32.mrf.mxu1  ;;  %v4565_v33 = vadd.f32 %v4533_v31, %v4101_v11 }
 0x71d   : > { %v4102_v6 = vadd.f32 %v8711_v8, %v10776_v55  ;;  %v4563_v26 = vadd.f32 %v4531_v56, %v4099_v1  ;;  %v4502_v51 = vrot.slane %v4470_v28, %v10202_v23  ;;  %v4538_v28 = vadd.f32 %v10915_v36, %v4498_v62 }
 0x71e   : > { %v10949_v25 = vpack.c.bf16 %v4629_v22, %v4629_v22  ;;  %v4639_v12 = vrot.slane %v4638_v10, 2  ;;  %v4647_v24 = vmax.f32 %v4645_v21, %v4646_v2  ;;  %v4027_v13 = vpop.f32.mrf.mxu1  ;;  %v4406_v21 = vpop.f32.mrf.mxu0 }
 0x71f   : > { %v4566_v0 = vadd.f32 %v4534_v17, %v4102_v6  ;;  %v4100_v48 = vadd.f32 %v10776_v55, %v4027_v13  ;;  %v4656_v8 = vsel %vm1345_vm3, %v4563_v26, -inf }
 0x720   : > { %v5480_v53 = vunpack.c.l.b16 %v10949_v25  ;;  %v4640_v59 = vmax.f32 %v4638_v10, %v4639_v12  ;;  %v4649_v35 = vmax.f32 %v4647_v24, %v4648_v43  ;;  %v8714_v27 = vpop.f32.mrf.mxu1  ;;  %v4536_v12 = vadd.f32 %v4498_v62, %v4393_v40  ;;  %v8763_v13 = vpop.f32.mrf.mxu0 }
 0x721   : > { %v10956_v57 = vpack.c.bf16 %v4566_v0, %v4565_v33  ;;  %v4564_v22 = vadd.f32 %v4532_v54, %v4100_v48  ;;  %v4105_v52 = vadd.f32 %v8714_v27, %v10776_v55 }
 0x722   : > { %v5487_v31 = vsel %vm2032_vm6, %v5480_v53, %v5486_v44  ;;  %v4641_v56 = vrot.slane %v4640_v59, 1  ;;  %v4650_v11 = vrot.slane %v4649_v35, 4  ;;  %v4040_v17 = vpop.f32.mrf.mxu1  ;;  %v4659_v44 = vsel %vm1345_vm3, %v4565_v33, -inf }
 0x723   : > { %v10961_v10 = vpack.c.bf16 %v4564_v22, %v4563_v26  ;;  %v4657_v2 = vsel %vm1345_vm3, %v4564_v22, -inf  ;;  %v4103_v43 = vadd.f32 %v10776_v55, %v4040_v17  ;;  %v4661_v53 = vsel %vm1345_vm3, %v4566_v0, -inf }
 0x724   : > { %v4642_v1 = vmax.f32 %v4640_v59, %v4641_v56  ;;  %v4651_v54 = vmax.f32 %v4649_v35, %v4650_v11  ;;  %v4658_v6 = vmax.f32 %v4656_v8, %v4657_v2  ;;  %v8715_v42 = vpop.f32.mrf.mxu1  ;;  %v4569_v36 = vadd.f32 %v4537_v46, %v4105_v52 }
 0x725   : > { %v4106_v24 = vadd.f32 %v8715_v42, %v10776_v55  ;;  %v4567_v59 = vadd.f32 %v4535_v47, %v4103_v43  ;;  %v4541_v17 = vadd.f32 %v8762_v15, %v4502_v51  ;;  %v4409_v42 = vpop.f32.mrf.mxu0  ;;  %v4542_v43 = vadd.f32 %v8763_v13, %v4502_v51 }
 0x726   : > { %v10969_v26 = vpack.c.bf16 %v4642_v1, %v4642_v1  ;;  %v4652_v48 = vrot.slane %v4651_v54, 2  ;;  %v4660_v27 = vmax.f32 %v4658_v6, %v4659_v44  ;;  %v4043_v22 = vpop.f32.mrf.mxu1  ;;  %v4539_v1 = vadd.f32 %v4502_v51, %v4406_v21 }
 0x727   : > { %v4570_v35 = vadd.f32 %v4538_v28, %v4106_v24  ;;  %v4104_v56 = vadd.f32 %v10776_v55, %v4043_v22  ;;  %v4669_v47 = vsel %vm1345_vm3, %v4567_v59, -inf  ;;  %v4540_v21 = vadd.f32 %v4502_v51, %v4409_v42 }
 0x728   : > { %v5481_v62 = vunpack.c.l.b16 %v10969_v26  ;;  %v4653_v40 = vmax.f32 %v4651_v54, %v4652_v48  ;;  %v4662_v33 = vmax.f32 %v4660_v27, %v4661_v53  ;;  %v8718_v11 = vpop.f32.mrf.mxu1  ;;  %v4672_v53 = vsel %vm1345_vm3, %v4569_v36, -inf }
 0x729   : > { %v10974_v8 = vpack.c.bf16 %v4570_v35, %v4569_v36  ;;  %v4568_v2 = vadd.f32 %v4536_v12, %v4104_v56  ;;  %v4109_v54 = vadd.f32 %v8718_v11, %v10776_v55 }
 0x72a   : > { %v5488_v0 = vsel %vm2034_vm7, %v5481_v62, %v5487_v31  ;;  %v4654_v6 = vrot.slane %v4653_v40, 1  ;;  %v4663_v44 = vrot.slane %v4662_v33, 4  ;;  %v4056_v46 = vpop.f32.mrf.mxu1 }
 0x72b   : > { %v10978_v52 = vpack.c.bf16 %v4568_v2, %v4567_v59  ;;  %v4670_v28 = vsel %vm1345_vm3, %v4568_v2, -inf  ;;  %v4107_v31 = vadd.f32 %v10776_v55, %v4056_v46  ;;  %v4674_v59 = vsel %vm1345_vm3, %v4570_v35, -inf }
 0x72c   : > { %v4655_v15 = vmax.f32 %v4653_v40, %v4654_v6  ;;  %v4664_v24 = vmax.f32 %v4662_v33, %v4663_v44  ;;  %v4671_v48 = vmax.f32 %v4669_v47, %v4670_v28  ;;  %v8719_v12 = vpop.f32.mrf.mxu1  ;;  %v4573_v23 = vadd.f32 %v4541_v17, %v4109_v54 }
 0x72d   : > { %v4110_v27 = vadd.f32 %v8719_v12, %v10776_v55  ;;  %v4571_v11 = vadd.f32 %v4539_v1, %v4107_v31 }
 0x72e   : > { %v4699_v22 = vpack.c.bf16 %v4655_v15, %v4655_v15  ;;  %v4665_v56 = vrot.slane %v4664_v24, 2  ;;  %v4673_v62 = vmax.f32 %v4671_v48, %v4672_v53  ;;  %v4059_v2 = vpop.f32.mrf.mxu1 }
 0x72f   : > { %v4574_v13 = vadd.f32 %v4542_v43, %v4110_v27  ;;  %v4108_v40 = vadd.f32 %v10776_v55, %v4059_v2  ;;  %v4682_v28 = vsel %vm1345_vm3, %v4571_v11, -inf  ;;  %v4685_v55 = vsel %vm1345_vm3, %v4573_v23, -inf }
 0x730   : > { %v5482_v33 = vunpack.c.l.b16 %v4699_v22  ;;  %v4666_v6 = vmax.f32 %v4664_v24, %v4665_v56  ;;  %v4675_v51 = vmax.f32 %v4673_v62, %v4674_v59  ;;  %v4704_v2 = vmax.bf16 %v11968_v7, %v10917_v5 }
 0x731   : > { %v10987_v42 = vpack.c.bf16 %v4574_v13, %v4573_v23  ;;  %v4572_v36 = vadd.f32 %v4540_v21, %v4108_v40  ;;  %v4687_v12 = vsel %vm1345_vm3, %v4574_v13, -inf  ;;  %v4705_v23 = vmax.bf16 %v11968_v7, %v10949_v25 }
 0x732   : > { %v5489_v44 = vsel %vm2036_vm8, %v5482_v33, %v5488_v0  ;;  %v4667_v46 = vrot.slane %v4666_v6, 1  ;;  %v4676_v47 = vrot.slane %v4675_v51, 4  ;;  %v4703_v13 = vmax.bf16 %v11968_v7, %v10908_v14 }
 0x733   : > { %v10991_v35 = vpack.c.bf16 %v4572_v36, %v4571_v11  ;;  %v4683_v17 = vsel %vm1345_vm3, %v4572_v36, -inf  ;;  %v4706_v33 = vmax.bf16 %v11968_v7, %v10969_v26  ;;  %v4707_v36 = vmax.bf16 %v11968_v7, %v4699_v22 }
 0x734   : > { %v4668_v1 = vmax.f32 %v4666_v6, %v4667_v46  ;;  %v4677_v54 = vmax.f32 %v4675_v51, %v4676_v47  ;;  %v4684_v43 = vmax.f32 %v4682_v28, %v4683_v17  ;;  %v4734_v28 = vunpack.c.l.b16 %v4705_v23 }
 0x735   : > { %v4732_v25 = vunpack.c.l.b16 %v4703_v13  ;;  %v4736_v14 = vunpack.c.l.b16 %v4707_v36  ;;  %v9169_v13 = vld [vmem:[%s11900_s13 + $0x28] sm:$0xff]   ;;  %v4582_v36 = vpack.c.bf16 %v10900_v39, %v10893_v37  ;;  %v4814_v37 = vmax.bf16 %v11968_v7, %v10956_v57 }
 0x736   : > { %v4700_v15 = vpack.c.bf16 %v4668_v1, %v4668_v1  ;;  %v4678_v24 = vrot.slane %v4677_v54, 2  ;;  %v4686_v48 = vmax.f32 %v4684_v43, %v4685_v55  ;;  %v4735_v1 = vunpack.c.l.b16 %v4706_v33 }
 0x737   : > { %v4579_v33 = vpack.c.bf16 %v10856_v3, %v10849_v49  ;;  %v4816_v39 = vmax.bf16 %v11968_v7, %v10974_v8 }
 0x738   : > { %v5483_v21 = vunpack.c.l.b16 %v4700_v15  ;;  %v4679_v0 = vmax.f32 %v4677_v54, %v4678_v24  ;;  %v4688_v53 = vmax.f32 %v4686_v48, %v4687_v12  ;;  %v4708_v46 = vmax.bf16 %v11968_v7, %v4700_v15 }
 0x73a   : > { %v5490_v31 = vsel %vm2038_vm9, %v5483_v21, %v5489_v44  ;;  %v4680_v27 = vrot.slane %v4679_v0, 1  ;;  %v4689_v56 = vrot.slane %v4688_v53, 4  ;;  %v4733_v44 = vunpack.c.l.b16 %v4704_v2  ;;  %v9166_v2 = vld [vmem:[%s11895_s8 + $0x20] sm:$0xff]  }
 0x73b   : > { %v4737_v26 = vunpack.c.l.b16 %v4708_v46  ;;  %v4810_v46 = vmax.bf16 %v11968_v7, %v4582_v36 }
 0x73c   : > { %v4681_v59 = vmax.f32 %v4679_v0, %v4680_v27  ;;  %v4690_v62 = vmax.f32 %v4688_v53, %v4689_v56  ;;  %v4740_v43 = vsel %vm2030_vm5, %v4733_v44, %v4732_v25  ;;  %v11016_v0 = vpack.c.bf16 %v10794_v4, %v10786_v50 }
 0x73d   : > { %v4741_v24 = vsel %vm2032_vm6, %v4734_v28, %v4740_v43  ;;  %v11034_v50 = vpack.c.bf16 %v10802_v58, %v10792_v41  ;;  %v4577_v4 = vpack.c.bf16 %v10822_v63, %v10815_v9  ;;  %v9171_v41 = vld [vmem:[%s11898_s11 + $0x28] sm:$0xff]   ;;  %v9172_v58 = vld [vmem:[%s11898_s11 + $0x20] sm:$0xff]   ;;  %v4578_v63 = vpack.c.bf16 %v10829_v61, %v10820_v29 }
 0x73e   : > { %v4701_v11 = vpack.c.bf16 %v4681_v59, %v4681_v59  ;;  %v4691_v40 = vrot.slane %v4690_v62, 2  ;;  %v4742_v48 = vsel %vm2034_vm7, %v4735_v1, %v4741_v24  ;;  %v9168_v9 = vld [vmem:[%s11901_s14 + $0x20] sm:$0xff]   ;;  %8808 = vmatprep.subr.bf16.mxu0 %v9171_v41  ;;  %v4580_v29 = vpack.c.bf16 %v10868_v18, %v10854_v45  ;;  %v7877_v28 = vld [vmem:[#allocation10 + $0x2] ss:$0 sm:$0xff] }
 0x73f   : > { %v4743_v21 = vsel %vm2036_vm8, %v4736_v14, %v4742_v48  ;;  %v4804_v23 = vmax.bf16 %v11968_v7, %v11034_v50  ;;  %8809 = vmatpush3.bf16.msra.mxu0 %v9171_v41  ;;  %v4581_v61 = vpack.c.bf16 %v10895_v16, %v10886_v38  ;;  %v4583_v44 = vpack.c.bf16 %v10934_v20, %v10921_v19  ;;  %v11981_v14 = vld [vmem:[#allocation33_spill] sm:$0xff] }
 0x740   : > { %v5484_v6 = vunpack.c.l.b16 %v4701_v11  ;;  %v4692_v51 = vmax.f32 %v4690_v62, %v4691_v40  ;;  %v4709_v17 = vmax.bf16 %v11968_v7, %v4701_v11  ;;  %v4744_v53 = vsel %vm2038_vm9, %v4737_v26, %v4743_v21  ;;  %v9167_v40 = vld [vmem:[%s11901_s14 + $0x28] sm:$0xff]   ;;  %8810 = vmatprep.subr.bf16.mxu0 %v9172_v58 }
 0x741   : > { %v4803_v11 = vmax.bf16 %v11968_v7, %v11016_v0  ;;  %v4808_v49 = vmax.bf16 %v11968_v7, %v4580_v29  ;;  %v4809_v3 = vmax.bf16 %v11968_v7, %v4581_v61  ;;  %v4811_v45 = vmax.bf16 %v11968_v7, %v4583_v44 }
 0x742   : > { %v5491_v5 = vsel %vm2040_vm10, %v5484_v6, %v5490_v31  ;;  %v4693_v47 = vrot.slane %v4692_v51, 1  ;;  %v4738_v22 = vunpack.c.l.b16 %v4709_v17  ;;  %v4806_v6 = vmax.bf16 %v11968_v7, %v4578_v63 }
 0x743   : > { %8811 = vmatpush3.bf16.msra.mxu0 %v9172_v58  ;;  %v4812_v18 = vmax.bf16 %v11968_v7, %v10932_v30  ;;  %v4813_v38 = vmax.bf16 %v11968_v7, %v10961_v10  ;;  %v4815_v16 = vmax.bf16 %v11968_v7, %v10978_v52  ;;  %v4817_v19 = vmax.bf16 %v11968_v7, %v10991_v35 }
 0x744   : > { %v4694_v54 = vmax.f32 %v4692_v51, %v4693_v47  ;;  %v4745_v56 = vsel %vm2040_vm10, %v4738_v22, %v4744_v53  ;;  %v4807_v51 = vmax.bf16 %v11968_v7, %v4579_v33  ;;  %8888 = vmatprep.subr.bf16.mxu0 %v11979_v60  ;;  %v4818_v20 = vmax.bf16 %v11968_v7, %v10987_v42  ;;  %v9170_v47 = vld [vmem:[%s11900_s13 + $0x20] sm:$0xff]  }
 0x746   : > { %v4702_v55 = vpack.c.bf16 %v4694_v54, %v4694_v54 }
 0x748   : > { %v4710_v15 = vmax.bf16 %v11968_v7, %v4702_v55  ;;  %v5485_v12 = vunpack.c.l.b16 %v4702_v55 }
 0x74a   : > { %v4739_v31 = vunpack.c.l.b16 %v4710_v15  ;;  %v11020_v27 = vsel %vm2042_vm11, %v5485_v12, %v5491_v5 }
 0x74b   : > { %v5493_v5 = vpack.c.b16 %v11020_v27, %v11020_v27 }
 0x74c   : > { %v4746_v59 = vsel %vm2042_vm11, %v4739_v31, %v4745_v56 }
 0x74d   : > { %v4747_v62 = vpack.c.b16 %v4746_v59, %v4746_v59 }
 0x74f   : > { %8769 = vmatmul.mubr.msk.bf16.vlgmr.msra.gmra.mxu1 %vm1345_vm3, %v4747_v62 }
 0x750   : > { %8773 = vmatpush3.bf16.msra.mxu1 %v10747_v34  ;;  %8776 = vmatprep.mubr.msk.bf16.mxu1 %vm1345_vm3, %v4803_v11  ;;  %v4805_v34 = vmax.bf16 %v11968_v7, %v4577_v4 }
 0x751   : > { %8774 = vmatprep.subr.bf16.mxu1 %v9166_v2 }
 0x754   : > { %8775 = vmatpush3.bf16.msra.mxu1 %v9166_v2 }
 0x755   : > { %8844 = vmatprep.subr.bf16.mxu1 %v11979_v60 }
 0x757   : > { %8777 = vmatmul.mubr.msk.bf16.vlgmr.msra.gmra.mxu1 %vm1345_vm3, %v4804_v23 }
 0x758   : > { %8780 = vmatprep.mubr.msk.bf16.mxu1 %vm1345_vm3, %v4805_v34  ;;  %8845 = vmatpush3.bf16.msra.mxu1 %v9167_v40 }
 0x759   : > { %8846 = vmatprep.subr.bf16.mxu1 %v11979_v60 }
 0x75c   : > { %8847 = vmatpush3.bf16.msra.mxu1 %v9168_v9 }
 0x75d   : > { %8852 = vmatprep.subr.bf16.mxu1 %v9169_v13 }
 0x75f   : > { %8781 = vmatmul.mubr.msk.bf16.gmra.mxu1 %vm1345_vm3, %v4806_v6 }
 0x760   : > { %8784 = vmatprep.mubr.msk.bf16.mxu1 %vm1345_vm3, %v4807_v51 }
 0x767   : > { %8785 = vmatmul.mubr.msk.bf16.gmra.mxu1 %vm1345_vm3, %v4808_v49 }
 0x768   : > { %8788 = vmatprep.mubr.msk.bf16.mxu1 %vm1345_vm3, %v4809_v3 }
 0x76f   : > { %8789 = vmatmul.mubr.msk.bf16.gmra.mxu1 %vm1345_vm3, %v4810_v46 }
 0x770   : > { %8792 = vmatprep.mubr.msk.bf16.mxu1 %vm1345_vm3, %v4811_v45 }
 0x777   : > { %8793 = vmatmul.mubr.msk.bf16.gmra.mxu1 %vm1345_vm3, %v4812_v18 }
 0x778   : > { %8796 = vmatprep.mubr.msk.bf16.mxu1 %vm1345_vm3, %v4813_v38 }
 0x77f   : > { %8797 = vmatmul.mubr.msk.bf16.gmra.mxu1 %vm1345_vm3, %v4814_v37 }
 0x780   : > { %8800 = vmatprep.mubr.msk.bf16.mxu1 %vm1345_vm3, %v4815_v16 }
 0x787   : > { %8801 = vmatmul.mubr.msk.bf16.gmra.mxu1 %vm1345_vm3, %v4816_v39 }
 0x788   : > { %8804 = vmatprep.mubr.msk.bf16.mxu1 %vm1345_vm3, %v4817_v19 }
 0x78f   : > { %8805 = vmatmul.mubr.msk.bf16.gmra.mxu1 %vm1345_vm3, %v4818_v20 }
 0x790   : > { %8848 = vmatprep.mubr.msk.bf16.mxu1 %vm9398_vm4, %v11979_v60 }
 0x797   : > { %8849 = vmatmul.mubr.msk.bf16.vlgmr.msra.gmra.mxu1 %vm1345_vm3, %v5493_v5 }
 0x798   : > { %8853 = vmatpush3.bf16.msra.mxu1 %v9169_v13  ;;  %8856 = vmatprep.mubr.msk.bf16.mxu1 %vm1345_vm3, %v11016_v0 }
 0x799   : > { %8854 = vmatprep.subr.bf16.mxu1 %v9170_v47 }
 0x79c   : > { %8855 = vmatpush3.bf16.msra.mxu1 %v9170_v47 }
 0x79f   : > { %8857 = vmatmul.mubr.msk.bf16.vlgmr.msra.gmra.mxu1 %vm1345_vm3, %v11034_v50 }
 0x7a0   : > { %8860 = vmatprep.mubr.msk.bf16.mxu1 %vm1345_vm3, %v4577_v4 }
 0x7a7   : > { %8861 = vmatmul.mubr.msk.bf16.gmra.mxu1 %vm1345_vm3, %v4578_v63 }
 0x7a8   : > { %8864 = vmatprep.mubr.msk.bf16.mxu1 %vm1345_vm3, %v4579_v33 }
 0x7af   : > { %8865 = vmatmul.mubr.msk.bf16.gmra.mxu1 %vm1345_vm3, %v4580_v29 }
 0x7b0   : > { %8868 = vmatprep.mubr.msk.bf16.mxu1 %vm1345_vm3, %v4581_v61 }
 0x7b7   : > { %8869 = vmatmul.mubr.msk.bf16.gmra.mxu1 %vm1345_vm3, %v4582_v36 }
 0x7b8   : > { %8872 = vmatprep.mubr.msk.bf16.mxu1 %vm1345_vm3, %v4583_v44 }
 0x7bf   : > { %8873 = vmatmul.mubr.msk.bf16.gmra.mxu1 %vm1345_vm3, %v10932_v30 }
 0x7c0   : > { %8876 = vmatprep.mubr.msk.bf16.mxu1 %vm1345_vm3, %v10961_v10 }
 0x7c7   : > { %8877 = vmatmul.mubr.msk.bf16.gmra.mxu1 %vm1345_vm3, %v10956_v57 }
 0x7c8   : > { %8880 = vmatprep.mubr.msk.bf16.mxu1 %vm1345_vm3, %v10978_v52 }
 0x7cf   : > { %8881 = vmatmul.mubr.msk.bf16.gmra.mxu1 %vm1345_vm3, %v10974_v8 }
 0x7d0   : > { %8884 = vmatprep.mubr.msk.bf16.mxu1 %vm1345_vm3, %v10991_v35 }
 0x7d7   : > { %8885 = vmatmul.mubr.msk.bf16.gmra.mxu1 %vm1345_vm3, %v10987_v42 }
 0x80f   : > { %v4797_v30 = vpop.f32.mrf.mxu1 }
 0x810   : > { %v4798_v17 = vadd.f32 %v7877_v28, %v4797_v30 }
 0x811   : > { %v8770_v25 = vpop.f32.mrf.mxu1 }
 0x812   : > { %v5053_v10 = vrot.slane %v4798_v17, %v10198_v32  ;;  %v5046_v61 = vcombine.high %v4798_v17, %v4798_v17 }
 0x813   : > { %v4800_v1 = vpop.f32.mrf.mxu1 }
 0x814   : > { %v5069_v57 = vrot.slane %v5053_v10, %v10198_v32  ;;  %v5061_v26 = vcombine.high %v5053_v10, %v5053_v10  ;;  %v5060_v38 = vrot.slane %v5046_v61, %v10198_v32 }
 0x815   : > { %v8771_v54 = vpop.f32.mrf.mxu1 }
 0x816   : > { %v5098_v43 = vrot.slane %v5069_v57, %v11981_v14  ;;  %v5083_v42 = vrot.slane %v5061_v26, %v10198_v32  ;;  %v5091_v50 = vcombine.high %v5069_v57, %v5069_v57  ;;  %v5076_v28 = vrot.slane %v5060_v38, %v10198_v32 }
 0x817   : > { %v8778_v52 = vpop.f32.mrf.mxu1  ;;  %v5062_v54 = vcombine.high %v5060_v38, %v5060_v38 }
 0x818   : > { %v5137_v24 = vadd.f32 %v8778_v52, %v5098_v43  ;;  %v5102_v27 = vrot.slane %v5083_v42, %v11981_v14  ;;  %v5106_v63 = vrot.slane %v5091_v50, %v11981_v14  ;;  %v5093_v49 = vcombine.high %v5083_v42, %v5083_v42 }
 0x819   : > { %v4918_v8 = vpop.f32.mrf.mxu1 }
 0x81a   : > { %v5135_v48 = vadd.f32 %v5098_v43, %v4918_v8  ;;  %v5110_v16 = vrot.slane %v5093_v49, %v11981_v14 }
 0x81b   : > { %v8779_v55 = vpop.f32.mrf.mxu1 }
 0x81c   : > { %v5138_v35 = vadd.f32 %v8779_v55, %v5098_v43 }
 0x81d   : > { %v4921_v22 = vpop.f32.mrf.mxu1 }
 0x81e   : > { %v5136_v15 = vadd.f32 %v5098_v43, %v4921_v22  ;;  %v5168_v12 = vpack.c.bf16 %v5138_v35, %v5137_v24  ;;  %v5114_v43 = vrot.slane %v5076_v28, %v11981_v14  ;;  %v5090_v22 = vrot.slane %v5062_v54, %v10198_v32  ;;  %v9173_v54 = vld [vmem:[%s11896_s9 + $0x38] sm:$0xff]  }
 0x81f   : > { %v8782_v21 = vpop.f32.mrf.mxu1 }
 0x820   : > { %v5167_v0 = vpack.c.bf16 %v5136_v15, %v5135_v48  ;;  %v5184_v56 = vmax.bf16 %v11968_v7, %v5168_v12  ;;  %v5141_v2 = vadd.f32 %v8782_v21, %v5102_v27  ;;  %v5094_v49 = vcombine.high %v5090_v22, %v5090_v22 }
 0x821   : > { %v4934_v53 = vpop.f32.mrf.mxu1 }
 0x822   : > { %v5183_v31 = vmax.bf16 %v11968_v7, %v5167_v0  ;;  %v5139_v4 = vadd.f32 %v5102_v27, %v4934_v53 }
 0x823   : > { %v8783_v59 = vpop.f32.mrf.mxu1 }
 0x824   : > { %v5142_v62 = vadd.f32 %v8783_v59, %v5102_v27  ;;  %8812 = vmatprep.mubr.msk.bf16.mxu0 %vm1345_vm3, %v5183_v31  ;;  %v5118_v31 = vrot.slane %v5090_v22, %v11981_v14 }
 0x825   : > { %v4937_v11 = vpop.f32.mrf.mxu1  ;;  %8813 = vmatmul.mubr.msk.bf16.vlgmr.msra.gmra.mxu0 %vm1345_vm3, %v5184_v56 }
 0x826   : > { %v5140_v40 = vadd.f32 %v5102_v27, %v4937_v11  ;;  %v5170_v23 = vpack.c.bf16 %v5142_v62, %v5141_v2  ;;  %v5092_v11 = vcombine.high %v5076_v28, %v5076_v28  ;;  %8889 = vmatpush3.bf16.msra.mxu0 %v9173_v54 }
 0x827   : > { %v8786_v34 = vpop.f32.mrf.mxu1  ;;  %8890 = vmatprep.subr.bf16.mxu0 %v11979_v60 }
 0x828   : > { %v5169_v41 = vpack.c.bf16 %v5140_v40, %v5139_v4  ;;  %v5186_v13 = vmax.bf16 %v11968_v7, %v5170_v23  ;;  %v5145_v51 = vadd.f32 %v8786_v34, %v5106_v63 }
 0x829   : > { %v4950_v58 = vpop.f32.mrf.mxu1 }
 0x82a   : > { %v5185_v9 = vmax.bf16 %v11968_v7, %v5169_v41  ;;  %v5143_v3 = vadd.f32 %v5106_v63, %v4950_v58 }
 0x82b   : > { %v8787_v33 = vpop.f32.mrf.mxu1 }
 0x82c   : > { %v5146_v6 = vadd.f32 %v8787_v33, %v5106_v63  ;;  %8816 = vmatprep.mubr.msk.bf16.mxu0 %vm1345_vm3, %v5185_v9  ;;  %v5122_v9 = vrot.slane %v5092_v11, %v11981_v14 }
 0x82d   : > { %v4953_v29 = vpop.f32.mrf.mxu1  ;;  %8817 = vmatmul.mubr.msk.bf16.gmra.mxu0 %vm1345_vm3, %v5186_v13 }
 0x82e   : > { %v5144_v36 = vadd.f32 %v5106_v63, %v4953_v29  ;;  %v5172_v44 = vpack.c.bf16 %v5146_v6, %v5145_v51 }
 0x82f   : > { %v8790_v46 = vpop.f32.mrf.mxu1 }
 0x830   : > { %v5171_v45 = vpack.c.bf16 %v5144_v36, %v5143_v3  ;;  %v5188_v39 = vmax.bf16 %v11968_v7, %v5172_v44  ;;  %v5149_v5 = vadd.f32 %v8790_v46, %v5110_v16 }
 0x831   : > { %v4966_v18 = vpop.f32.mrf.mxu1 }
 0x832   : > { %v5187_v37 = vmax.bf16 %v11968_v7, %v5171_v45  ;;  %v5147_v30 = vadd.f32 %v5110_v16, %v4966_v18  ;;  %v5126_v18 = vrot.slane %v5094_v49, %v11981_v14 }
 0x833   : > { %v8791_v19 = vpop.f32.mrf.mxu1 }
 0x834   : > { %v5150_v20 = vadd.f32 %v8791_v19, %v5110_v16  ;;  %8820 = vmatprep.mubr.msk.bf16.mxu0 %vm1345_vm3, %v5187_v37 }
 0x835   : > { %v4969_v47 = vpop.f32.mrf.mxu1  ;;  %8821 = vmatmul.mubr.msk.bf16.gmra.mxu0 %vm1345_vm3, %v5188_v39 }
 0x836   : > { %v5148_v17 = vadd.f32 %v5110_v16, %v4969_v47  ;;  %v5174_v25 = vpack.c.bf16 %v5150_v20, %v5149_v5 }
 0x837   : > { %v8794_v10 = vpop.f32.mrf.mxu1 }
 0x838   : > { %v5173_v1 = vpack.c.bf16 %v5148_v17, %v5147_v30  ;;  %v5190_v8 = vmax.bf16 %v11968_v7, %v5174_v25  ;;  %v5153_v35 = vadd.f32 %v8794_v10, %v5114_v43 }
 0x839   : > { %v4982_v57 = vpop.f32.mrf.mxu1 }
 0x83a   : > { %v5189_v52 = vmax.bf16 %v11968_v7, %v5173_v1  ;;  %v5151_v42 = vadd.f32 %v5114_v43, %v4982_v57 }
 0x83b   : > { %v8795_v26 = vpop.f32.mrf.mxu1 }
 0x83c   : > { %v5154_v55 = vadd.f32 %v8795_v26, %v5114_v43  ;;  %8824 = vmatprep.mubr.msk.bf16.mxu0 %vm1345_vm3, %v5189_v52 }
 0x83d   : > { %v4985_v24 = vpop.f32.mrf.mxu1  ;;  %8825 = vmatmul.mubr.msk.bf16.gmra.mxu0 %vm1345_vm3, %v5190_v8 }
 0x83e   : > { %v5152_v48 = vadd.f32 %v5114_v43, %v4985_v24  ;;  %v5176_v15 = vpack.c.bf16 %v5154_v55, %v5153_v35 }
 0x83f   : > { %v8798_v12 = vpop.f32.mrf.mxu1 }
 0x840   : > { %v5175_v21 = vpack.c.bf16 %v5152_v48, %v5151_v42  ;;  %v5192_v27 = vmax.bf16 %v11968_v7, %v5176_v15  ;;  %v5157_v62 = vadd.f32 %v8798_v12, %v5118_v31  ;;  %v9174_v42 = vld [vmem:[%s11896_s9 + $0x30] sm:$0xff]   ;;  %v11201_v48 = vld [vmem:[%s11895_s8 + $0x38] sm:$0xff]  }
 0x841   : > { %v4998_v0 = vpop.f32.mrf.mxu1  ;;  %8891 = vmatpush3.bf16.msra.mxu0 %v9174_v42 }
 0x842   : > { %v5191_v53 = vmax.bf16 %v11968_v7, %v5175_v21  ;;  %v5155_v50 = vadd.f32 %v5118_v31, %v4998_v0  ;;  %8896 = vmatprep.subr.bf16.mxu0 %v11201_v48 }
 0x843   : > { %v8799_v56 = vpop.f32.mrf.mxu1 }
 0x844   : > { %v5158_v59 = vadd.f32 %v8799_v56, %v5118_v31  ;;  %8828 = vmatprep.mubr.msk.bf16.mxu0 %vm1345_vm3, %v5191_v53 }
 0x845   : > { %v5001_v2 = vpop.f32.mrf.mxu1  ;;  %8829 = vmatmul.mubr.msk.bf16.gmra.mxu0 %vm1345_vm3, %v5192_v27 }
 0x846   : > { %v5156_v4 = vadd.f32 %v5118_v31, %v5001_v2  ;;  %v5178_v40 = vpack.c.bf16 %v5158_v59, %v5157_v62 }
 0x847   : > { %v8802_v23 = vpop.f32.mrf.mxu1 }
 0x848   : > { %v5177_v34 = vpack.c.bf16 %v5156_v4, %v5155_v50  ;;  %v5194_v63 = vmax.bf16 %v11968_v7, %v5178_v40  ;;  %v5161_v6 = vadd.f32 %v8802_v23, %v5122_v9  ;;  %v11230_v40 = vld [vmem:[%s11899_s12 + $0x2] ss:$0 sm:$0xff] }
 0x849   : > { %v5014_v41 = vpop.f32.mrf.mxu1 }
 0x84a   : > { %v5193_v58 = vmax.bf16 %v11968_v7, %v5177_v34  ;;  %v5159_v29 = vadd.f32 %v5122_v9, %v5014_v41 }
 0x84b   : > { %v8803_v13 = vpop.f32.mrf.mxu1 }
 0x84c   : > { %v5162_v33 = vadd.f32 %v8803_v13, %v5122_v9  ;;  %8832 = vmatprep.mubr.msk.bf16.mxu0 %vm1345_vm3, %v5193_v58 }
 0x84d   : > { %v5017_v51 = vpop.f32.mrf.mxu1  ;;  %8833 = vmatmul.mubr.msk.bf16.gmra.mxu0 %vm1345_vm3, %v5194_v63 }
 0x84e   : > { %v5160_v61 = vadd.f32 %v5122_v9, %v5017_v51  ;;  %v5180_v3 = vpack.c.bf16 %v5162_v33, %v5161_v6 }
 0x84f   : > { %v8806_v36 = vpop.f32.mrf.mxu1 }
 0x850   : > { %v5179_v44 = vpack.c.bf16 %v5160_v61, %v5159_v29  ;;  %v5196_v38 = vmax.bf16 %v11968_v7, %v5180_v3  ;;  %v5165_v39 = vadd.f32 %v8806_v36, %v5126_v18 }
 0x851   : > { %v5030_v46 = vpop.f32.mrf.mxu1 }
 0x852   : > { %v5195_v45 = vmax.bf16 %v11968_v7, %v5179_v44  ;;  %v5163_v20 = vadd.f32 %v5126_v18, %v5030_v46 }
 0x853   : > { %v8807_v37 = vpop.f32.mrf.mxu1 }
 0x854   : > { %v5166_v16 = vadd.f32 %v8807_v37, %v5126_v18  ;;  %8836 = vmatprep.mubr.msk.bf16.mxu0 %vm1345_vm3, %v5195_v45 }
 0x855   : > { %v5033_v19 = vpop.f32.mrf.mxu1  ;;  %8837 = vmatmul.mubr.msk.bf16.gmra.mxu0 %vm1345_vm3, %v5196_v38 }
 0x856   : > { %v5164_v5 = vadd.f32 %v5126_v18, %v5033_v19  ;;  %v5182_v47 = vpack.c.bf16 %v5166_v16, %v5165_v39 }
 0x857   : > { %v11181_v28 = vpop.f32.mrf.mxu1 }
 0x858   : > { %v5181_v30 = vpack.c.bf16 %v5164_v5, %v5163_v20  ;;  %v5198_v10 = vmax.bf16 %v11968_v7, %v5182_v47  ;;  %v5783_v59 = vrot.slane %v11181_v28, %v10198_v32  ;;  %v5776_v44 = vcombine.high %v11181_v28, %v11181_v28 }
 0x859   : > { %v8850_v17 = vpop.f32.mrf.mxu1 }
 0x85a   : > { %v5197_v25 = vmax.bf16 %v11968_v7, %v5181_v30  ;;  %v5799_v2 = vrot.slane %v5783_v59, %v10198_v32  ;;  %v5791_v50 = vcombine.high %v5783_v59, %v5783_v59  ;;  %v5790_v30 = vrot.slane %v5776_v44, %v10198_v32 }
 0x85b   : > { %v5546_v1 = vpop.f32.mrf.mxu1 }
 0x85c   : > { %8840 = vmatprep.mubr.msk.bf16.mxu0 %vm1345_vm3, %v5197_v25  ;;  %v5828_v34 = vrot.slane %v5799_v2, %v11981_v14  ;;  %v11236_v13 = vrot.slane %v5791_v50, %v10198_v32  ;;  %v5821_v1 = vcombine.high %v5799_v2, %v5799_v2 }
 0x85d   : > { %8841 = vmatmul.mubr.msk.bf16.gmra.mxu0 %vm1345_vm3, %v5198_v10  ;;  %v8851_v57 = vpop.f32.mrf.mxu1 }
 0x85e   : > { %8892 = vmatprep.mubr.msk.bf16.mxu0 %vm9398_vm4, %v11979_v60  ;;  %v5832_v16 = vrot.slane %v11236_v13, %v11981_v14  ;;  %v5823_v44 = vcombine.high %v11236_v13, %v11236_v13 }
 0x85f   : > { %v8858_v52 = vpop.f32.mrf.mxu1 }
 0x860   : > { %v5867_v33 = vadd.f32 %v8858_v52, %v5828_v34 }
 0x861   : > { %v5648_v43 = vpop.f32.mrf.mxu1 }
 0x862   : > { %v5865_v9 = vadd.f32 %v5828_v34, %v5648_v43 }
 0x863   : > { %v8859_v8 = vpop.f32.mrf.mxu1 }
 0x864   : > { %v5868_v46 = vadd.f32 %v8859_v8, %v5828_v34 }
 0x865   : > { %v5651_v26 = vpop.f32.mrf.mxu1 }
 0x866   : > { %v5866_v29 = vadd.f32 %v5828_v34, %v5651_v26 }
 0x867   : > { %v8862_v55 = vpop.f32.mrf.mxu1 }
 0x868   : > { %v5871_v57 = vadd.f32 %v8862_v55, %v5832_v16 }
 0x869   : > { %v5664_v35 = vpop.f32.mrf.mxu1 }
 0x86a   : > { %v5869_v17 = vadd.f32 %v5832_v16, %v5664_v35 }
 0x86b   : > { %v11193_v24 = vpop.f32.mrf.mxu1 }
 0x86d   : > { %v5667_v22 = vpop.f32.mrf.mxu1 }
 0x86e   : > { %v5870_v54 = vadd.f32 %v5832_v16, %v5667_v22  ;;  %v5792_v22 = vcombine.high %v5790_v30, %v5790_v30 }
 0x86f   : > { %v11203_v15 = vpop.f32.mrf.mxu1 }
 0x871   : > { %v11206_v12 = vpop.f32.mrf.mxu1 }
 0x873   : > { %v11208_v21 = vpop.f32.mrf.mxu1 }
 0x875   : > { %v11210_v0 = vpop.f32.mrf.mxu1 }
 0x877   : > { %v11212_v53 = vpop.f32.mrf.mxu1 }
 0x879   : > { %v11214_v31 = vpop.f32.mrf.mxu1 }
 0x87b   : > { %v11216_v27 = vpop.f32.mrf.mxu1 }
 0x87d   : > { %v11218_v56 = vpop.f32.mrf.mxu1 }
 0x87f   : > { %v11222_v62 = vpop.f32.mrf.mxu1 }
 0x881   : > { %v11225_v4 = vpop.f32.mrf.mxu1 }
 0x883   : > { %v11238_v6 = vpop.f32.mrf.mxu1 }
 0x885   : > { %v11250_v38 = vpop.f32.mrf.mxu1 }
 0x887   : > { %v11265_v52 = vpop.f32.mrf.mxu1 }
 0x889   : > { %v11278_v34 = vpop.f32.mrf.mxu1 }
 0x8e5   : > { %v8814_v11 = vpop.f32.mrf.mxu0 }
 0x8e6   : > { %v5435_v63 = vadd.f32 %v8814_v11, %v11230_v40 }
 0x8e7   : > { %v5298_v23 = vpop.f32.mrf.mxu0 }
 0x8e8   : > { %v5433_v41 = vadd.f32 %v11230_v40, %v5298_v23  ;;  %v11246_v45 = vadd.f32 %v5867_v33, %v5435_v63  ;;  %v5872_v23 = vadd.f32 %v11193_v24, %v5832_v16  ;;  %v11288_v24 = vrot.slane %v5790_v30, %v10198_v32 }
 0x8e9   : > { %v8815_v58 = vpop.f32.mrf.mxu0 }
 0x8ea   : > { %v11240_v61 = vadd.f32 %v5865_v9, %v5433_v41  ;;  %v5436_v49 = vadd.f32 %v8815_v58, %v11230_v40  ;;  %v5948_v25 = vsel %vm1345_vm3, %v11246_v45, -inf  ;;  %v5836_v9 = vrot.slane %v5821_v1, %v11981_v14 }
 0x8eb   : > { %v5301_v51 = vpop.f32.mrf.mxu0 }
 0x8ec   : > { %v5434_v3 = vadd.f32 %v11230_v40, %v5301_v51  ;;  %v5945_v39 = vsel %vm1345_vm3, %v11240_v61, -inf  ;;  %v11256_v19 = vadd.f32 %v5868_v46, %v5436_v49  ;;  %v5873_v46 = vadd.f32 %v5836_v9, %v11206_v12 }
 0x8ed   : > { %v8818_v36 = vpop.f32.mrf.mxu0 }
 0x8ee   : > { %v11248_v18 = vadd.f32 %v5866_v29, %v5434_v3  ;;  %v5439_v10 = vadd.f32 %v8818_v36, %v11230_v40  ;;  %v5950_v26 = vsel %vm1345_vm3, %v11256_v19, -inf }
 0x8ef   : > { %v5314_v37 = vpop.f32.mrf.mxu0 }
 0x8f0   : > { %v5946_v20 = vsel %vm1345_vm3, %v11248_v18, -inf  ;;  %v5437_v47 = vadd.f32 %v11230_v40, %v5314_v37  ;;  %v11274_v2 = vadd.f32 %v5871_v57, %v5439_v10 }
 0x8f1   : > { %v5947_v5 = vmax.f32 %v5945_v39, %v5946_v20  ;;  %v8819_v28 = vpop.f32.mrf.mxu0  ;;  %v5875_v39 = vadd.f32 %v11203_v15, %v5836_v9  ;;  %v5874_v20 = vadd.f32 %v5836_v9, %v11210_v0  ;;  %v5876_v15 = vadd.f32 %v11208_v21, %v5836_v9 }
 0x8f2   : > { %v11269_v42 = vadd.f32 %v5869_v17, %v5437_v47  ;;  %v5440_v59 = vadd.f32 %v8819_v28, %v11230_v40  ;;  %v5961_v37 = vsel %vm1345_vm3, %v11274_v2, -inf }
 0x8f3   : > { %v5949_v43 = vmax.f32 %v5947_v5, %v5948_v25  ;;  %v5317_v8 = vpop.f32.mrf.mxu0  ;;  %v11299_v5 = vpop.f32.mrf.mxu1 }
 0x8f4   : > { %v5438_v35 = vadd.f32 %v11230_v40, %v5317_v8  ;;  %v5958_v63 = vsel %vm1345_vm3, %v11269_v42, -inf  ;;  %v11283_v33 = vadd.f32 %v5872_v23, %v5440_v59  ;;  %v5822_v8 = vcombine.high %v11288_v24, %v11288_v24 }
 0x8f5   : > { %v5951_v11 = vmax.f32 %v5949_v43, %v5950_v26  ;;  %v8822_v50 = vpop.f32.mrf.mxu0  ;;  %v11313_v43 = vrot.slane %v5792_v22, %v10198_v32  ;;  %v11317_v26 = vpop.f32.mrf.mxu1 }
 0x8f6   : > { %v11276_v55 = vadd.f32 %v5870_v54, %v5438_v35  ;;  %v5443_v16 = vadd.f32 %v8822_v50, %v11230_v40  ;;  %v5963_v17 = vsel %vm1345_vm3, %v11283_v33, -inf }
 0x8f7   : > { %v5952_v41 = vrot.slane %v5951_v11, 4  ;;  %v5330_v58 = vpop.f32.mrf.mxu0 }
 0x8f8   : > { %v5959_v51 = vsel %vm1345_vm3, %v11276_v55, -inf  ;;  %v5441_v3 = vadd.f32 %v11230_v40, %v5330_v58  ;;  %v11308_v0 = vadd.f32 %v5875_v39, %v5443_v16 }
 0x8f9   : > { %v5953_v29 = vmax.f32 %v5951_v11, %v5952_v41  ;;  %v5960_v49 = vmax.f32 %v5958_v63, %v5959_v51  ;;  %v8823_v36 = vpop.f32.mrf.mxu0  ;;  %v5840_v11 = vrot.slane %v5823_v44, %v11981_v14  ;;  %v5844_v51 = vrot.slane %v11288_v24, %v11981_v14  ;;  %v11334_v44 = vpop.f32.mrf.mxu1 }
 0x8fa   : > { %v11303_v13 = vadd.f32 %v5873_v46, %v5441_v3  ;;  %v5444_v12 = vadd.f32 %v8823_v36, %v11230_v40 }
 0x8fb   : > { %v5954_v47 = vrot.slane %v5953_v29, 2  ;;  %v5962_v28 = vmax.f32 %v5960_v49, %v5961_v37  ;;  %v5333_v30 = vpop.f32.mrf.mxu0  ;;  %v5974_v49 = vsel %vm1345_vm3, %v11308_v0, -inf  ;;  %v5879_v36 = vadd.f32 %v11212_v53, %v5840_v11 }
 0x8fc   : > { %v5442_v25 = vadd.f32 %v11230_v40, %v5333_v30  ;;  %v5971_v50 = vsel %vm1345_vm3, %v11303_v13, -inf  ;;  %v11322_v21 = vadd.f32 %v5876_v15, %v5444_v12  ;;  %v5880_v30 = vadd.f32 %v11216_v27, %v5840_v11 }
 0x8fd   : > { %v5955_v10 = vmax.f32 %v5953_v29, %v5954_v47  ;;  %v5964_v1 = vmax.f32 %v5962_v28, %v5963_v17  ;;  %v8826_v57 = vpop.f32.mrf.mxu0  ;;  %v5877_v29 = vadd.f32 %v5840_v11, %v11214_v31 }
 0x8fe   : > { %v11310_v54 = vadd.f32 %v5874_v20, %v5442_v25  ;;  %v5447_v3 = vadd.f32 %v8826_v57, %v11230_v40  ;;  %v5878_v20 = vadd.f32 %v5840_v11, %v11218_v56  ;;  %v5976_v47 = vsel %vm1345_vm3, %v11322_v21, -inf }
 0x8ff   : > { %v5965_v59 = vrot.slane %v5964_v1, 4  ;;  %v5346_v35 = vpop.f32.mrf.mxu0  ;;  %v5956_v41 = vrot.slane %v5955_v10, 1  ;;  %v5848_v57 = vrot.slane %v11313_v43, %v11981_v14 }
 0x900   : > { %v5972_v23 = vsel %vm1345_vm3, %v11310_v54, -inf  ;;  %v5445_v9 = vadd.f32 %v11230_v40, %v5346_v35  ;;  %v11347_v15 = vadd.f32 %v5879_v36, %v5447_v3  ;;  %v11352_v35 = vpop.f32.mrf.mxu1  ;;  %v5882_v3 = vadd.f32 %v5844_v51, %v11250_v38 }
 0x901   : > { %v5966_v22 = vmax.f32 %v5964_v1, %v5965_v59  ;;  %v5973_v58 = vmax.f32 %v5971_v50, %v5972_v23  ;;  %v8827_v63 = vpop.f32.mrf.mxu0  ;;  %v5957_v17 = vmax.f32 %v5955_v10, %v5956_v41  ;;  %v5883_v1 = vadd.f32 %v11222_v62, %v5844_v51 }
 0x902   : > { %v5448_v16 = vadd.f32 %v8827_v63, %v11230_v40  ;;  %v11340_v31 = vadd.f32 %v5877_v29, %v5445_v9  ;;  %v5881_v59 = vadd.f32 %v5844_v51, %v11225_v4  ;;  %v5987_v36 = vsel %vm1345_vm3, %v11347_v15, -inf }
 0x903   : > { %v5967_v46 = vrot.slane %v5966_v22, 2  ;;  %v5975_v37 = vmax.f32 %v5973_v58, %v5974_v49  ;;  %v5349_v39 = vpop.f32.mrf.mxu0  ;;  %v11362_v58 = vpack.c.bf16 %v5957_v17, %v5957_v17  ;;  %v5884_v49 = vadd.f32 %v11238_v6, %v5844_v51 }
 0x904   : > { %v5446_v28 = vadd.f32 %v11230_v40, %v5349_v39  ;;  %v11354_v27 = vadd.f32 %v5880_v30, %v5448_v16  ;;  %v5984_v11 = vsel %vm1345_vm3, %v11340_v31, -inf }
 0x905   : > { %v5968_v53 = vmax.f32 %v5966_v22, %v5967_v46  ;;  %v5977_v12 = vmax.f32 %v5975_v37, %v5976_v47  ;;  %v8830_v25 = vpop.f32.mrf.mxu0  ;;  %v11369_v37 = vpop.f32.mrf.mxu1  ;;  %v6832_v51 = vunpack.c.l.b16 %v11362_v58 }
 0x906   : > { %v11349_v56 = vadd.f32 %v5878_v20, %v5446_v28  ;;  %v5451_v41 = vadd.f32 %v8830_v25, %v11230_v40  ;;  %v5989_v20 = vsel %vm1345_vm3, %v11354_v27, -inf }
 0x907   : > { %v5969_v50 = vrot.slane %v5968_v53, 1  ;;  %v5978_v23 = vrot.slane %v5977_v12, 4  ;;  %v5362_v10 = vpop.f32.mrf.mxu0 }
 0x908   : > { %v5985_v62 = vsel %vm1345_vm3, %v11349_v56, -inf  ;;  %v5449_v22 = vadd.f32 %v11230_v40, %v5362_v10  ;;  %v5915_v30 = vadd.f32 %v5883_v1, %v5451_v41  ;;  %v5852_v1 = vrot.slane %v5822_v8, %v11981_v14 }
 0x909   : > { %v5970_v4 = vmax.f32 %v5968_v53, %v5969_v50  ;;  %v5979_v9 = vmax.f32 %v5977_v12, %v5978_v23  ;;  %v5986_v63 = vmax.f32 %v5984_v11, %v5985_v62  ;;  %v8831_v29 = vpop.f32.mrf.mxu0  ;;  %v5824_v23 = vcombine.high %v11313_v43, %v11313_v43  ;;  %v5747_v62 = vpop.f32.mrf.mxu1 }
 0x90a   : > { %v5452_v46 = vadd.f32 %v8831_v29, %v11230_v40  ;;  %v11375_v17 = vadd.f32 %v5881_v59, %v5449_v22  ;;  %v5887_v11 = vadd.f32 %v11265_v52, %v5848_v57  ;;  %v5888_v29 = vadd.f32 %v11299_v5, %v5848_v57 }
 0x90b   : > { %v11371_v16 = vpack.c.bf16 %v5970_v4, %v5970_v4  ;;  %v5980_v39 = vrot.slane %v5979_v9, 2  ;;  %v5988_v47 = vmax.f32 %v5986_v63, %v5987_v36  ;;  %v5365_v28 = vpop.f32.mrf.mxu0  ;;  %v5885_v63 = vadd.f32 %v5848_v57, %v11278_v34 }
 0x90c   : > { %v5916_v6 = vadd.f32 %v5884_v49, %v5452_v46  ;;  %v5450_v38 = vadd.f32 %v11230_v40, %v5365_v28  ;;  %v5997_v43 = vsel %vm1345_vm3, %v11375_v17, -inf  ;;  %v5886_v46 = vadd.f32 %v5848_v57, %v11317_v26 }
 0x90d   : > { %v6833_v53 = vunpack.c.l.b16 %v11371_v16  ;;  %v5981_v12 = vmax.f32 %v5979_v9, %v5980_v39  ;;  %v5990_v25 = vmax.f32 %v5988_v47, %v5989_v20  ;;  %v8834_v50 = vpop.f32.mrf.mxu0  ;;  %v6000_v39 = vsel %vm1345_vm3, %v5915_v30, -inf  ;;  %v8886_v47 = vpop.f32.mrf.mxu1 }
 0x90e   : > { %v11386_v59 = vpack.c.bf16 %v5916_v6, %v5915_v30  ;;  %v11388_v10 = vadd.f32 %v5882_v3, %v5450_v38  ;;  %v5455_v8 = vadd.f32 %v8834_v50, %v11230_v40 }
 0x90f   : > { %v6840_v41 = vsel %vm2030_vm5, %v6833_v53, %v6832_v51  ;;  %v5982_v22 = vrot.slane %v5981_v12, 1  ;;  %v5991_v4 = vrot.slane %v5990_v25, 4  ;;  %v5378_v9 = vpop.f32.mrf.mxu0  ;;  %v6002_v51 = vsel %vm1345_vm3, %v5916_v6, -inf }
 0x910   : > { %v5998_v24 = vsel %vm1345_vm3, %v11388_v10, -inf  ;;  %v5453_v34 = vadd.f32 %v11230_v40, %v5378_v9  ;;  %v5891_v9 = vadd.f32 %v11334_v44, %v5852_v1  ;;  %v5889_v6 = vadd.f32 %v5852_v1, %v11352_v35 }
 0x911   : > { %v5983_v49 = vmax.f32 %v5981_v12, %v5982_v22  ;;  %v5992_v52 = vmax.f32 %v5990_v25, %v5991_v4  ;;  %v5999_v3 = vmax.f32 %v5997_v43, %v5998_v24  ;;  %v8835_v36 = vpop.f32.mrf.mxu0  ;;  %v5919_v12 = vadd.f32 %v5887_v11, %v5455_v8 }
 0x912   : > { %v5456_v20 = vadd.f32 %v8835_v36, %v11230_v40  ;;  %v5917_v25 = vadd.f32 %v5885_v63, %v5453_v34  ;;  %v5856_v43 = vrot.slane %v5824_v23, %v11981_v14  ;;  %v5892_v23 = vadd.f32 %v11369_v37, %v5852_v1 }
 0x913   : > { %v11403_v28 = vpack.c.bf16 %v5983_v49, %v5983_v49  ;;  %v5993_v38 = vrot.slane %v5992_v52, 2  ;;  %v6001_v53 = vmax.f32 %v5999_v3, %v6000_v39  ;;  %v5381_v5 = vpop.f32.mrf.mxu0  ;;  %v5760_v3 = vpop.f32.mrf.mxu1 }
 0x914   : > { %v5920_v50 = vadd.f32 %v5888_v29, %v5456_v20  ;;  %v5454_v22 = vadd.f32 %v11230_v40, %v5381_v5  ;;  %v6010_v36 = vsel %vm1345_vm3, %v5917_v25, -inf }
 0x915   : > { %v6834_v26 = vunpack.c.l.b16 %v11403_v28  ;;  %v5994_v57 = vmax.f32 %v5992_v52, %v5993_v38  ;;  %v6003_v30 = vmax.f32 %v6001_v53, %v6002_v51  ;;  %v8838_v4 = vpop.f32.mrf.mxu0  ;;  %v5890_v38 = vadd.f32 %v5852_v1, %v5747_v62  ;;  %v8887_v5 = vpop.f32.mrf.mxu1 }
 0x916   : > { %v11410_v24 = vpack.c.bf16 %v5920_v50, %v5919_v12  ;;  %v5918_v49 = vadd.f32 %v5886_v46, %v5454_v22  ;;  %v5459_v44 = vadd.f32 %v8838_v4, %v11230_v40 }
 0x917   : > { %v6841_v11 = vsel %vm2032_vm6, %v6834_v26, %v6840_v41  ;;  %v5995_v63 = vrot.slane %v5994_v57, 1  ;;  %v6004_v8 = vrot.slane %v6003_v30, 4  ;;  %v5394_v29 = vpop.f32.mrf.mxu0  ;;  %v6013_v41 = vsel %vm1345_vm3, %v5919_v12, -inf }
 0x918   : > { %v11415_v52 = vpack.c.bf16 %v5918_v49, %v5917_v25  ;;  %v6011_v39 = vsel %vm1345_vm3, %v5918_v49, -inf  ;;  %v5457_v51 = vadd.f32 %v11230_v40, %v5394_v29  ;;  %v6015_v26 = vsel %vm1345_vm3, %v5920_v50, -inf }
 0x919   : > { %v5996_v34 = vmax.f32 %v5994_v57, %v5995_v63  ;;  %v6005_v46 = vmax.f32 %v6003_v30, %v6004_v8  ;;  %v6012_v20 = vmax.f32 %v6010_v36, %v6011_v39  ;;  %v8839_v35 = vpop.f32.mrf.mxu0  ;;  %v5923_v37 = vadd.f32 %v5891_v9, %v5459_v44 }
 0x91a   : > { %v5460_v53 = vadd.f32 %v8839_v35, %v11230_v40  ;;  %v5921_v57 = vadd.f32 %v5889_v6, %v5457_v51  ;;  %v5895_v29 = vadd.f32 %v8886_v47, %v5856_v43  ;;  %v5763_v35 = vpop.f32.mrf.mxu1  ;;  %v5896_v51 = vadd.f32 %v8887_v5, %v5856_v43 }
 0x91b   : > { %v11423_v25 = vpack.c.bf16 %v5996_v34, %v5996_v34  ;;  %v6006_v22 = vrot.slane %v6005_v46, 2  ;;  %v6014_v4 = vmax.f32 %v6012_v20, %v6013_v41  ;;  %v5397_v49 = vpop.f32.mrf.mxu0  ;;  %v5893_v34 = vadd.f32 %v5856_v43, %v5760_v3 }
 0x91c   : > { %v5924_v30 = vadd.f32 %v5892_v23, %v5460_v53  ;;  %v5458_v63 = vadd.f32 %v11230_v40, %v5397_v49  ;;  %v6023_v6 = vsel %vm1345_vm3, %v5921_v57, -inf  ;;  %v5894_v3 = vadd.f32 %v5856_v43, %v5763_v35 }
 0x91d   : > { %v6835_v1 = vunpack.c.l.b16 %v11423_v25  ;;  %v6007_v62 = vmax.f32 %v6005_v46, %v6006_v22  ;;  %v6016_v12 = vmax.f32 %v6014_v4, %v6015_v26  ;;  %v8842_v8 = vpop.f32.mrf.mxu0  ;;  %v6026_v26 = vsel %vm1345_vm3, %v5923_v37, -inf }
 0x91e   : > { %v11428_v36 = vpack.c.bf16 %v5924_v30, %v5923_v37  ;;  %v5922_v39 = vadd.f32 %v5890_v38, %v5458_v63  ;;  %v5463_v46 = vadd.f32 %v8842_v8, %v11230_v40 }
 0x91f   : > { %v6842_v50 = vsel %vm2034_vm7, %v6835_v1, %v6841_v11  ;;  %v6008_v20 = vrot.slane %v6007_v62, 1  ;;  %v6017_v41 = vrot.slane %v6016_v12, 4  ;;  %v5410_v9 = vpop.f32.mrf.mxu0 }
 0x920   : > { %v11432_v44 = vpack.c.bf16 %v5922_v39, %v5921_v57  ;;  %v6024_v23 = vsel %vm1345_vm3, %v5922_v39, -inf  ;;  %v5461_v11 = vadd.f32 %v11230_v40, %v5410_v9  ;;  %v6028_v57 = vsel %vm1345_vm3, %v5924_v30, -inf }
 0x921   : > { %v6009_v47 = vmax.f32 %v6007_v62, %v6008_v20  ;;  %v6018_v53 = vmax.f32 %v6016_v12, %v6017_v41  ;;  %v6025_v22 = vmax.f32 %v6023_v6, %v6024_v23  ;;  %v8843_v38 = vpop.f32.mrf.mxu0  ;;  %v5927_v14 = vadd.f32 %v5895_v29, %v5463_v46 }
 0x922   : > { %v5464_v4 = vadd.f32 %v8843_v38, %v11230_v40  ;;  %v5925_v8 = vadd.f32 %v5893_v34, %v5461_v11 }
 0x923   : > { %v6053_v49 = vpack.c.bf16 %v6009_v47, %v6009_v47  ;;  %v6019_v63 = vrot.slane %v6018_v53, 2  ;;  %v6027_v1 = vmax.f32 %v6025_v22, %v6026_v26  ;;  %v5413_v39 = vpop.f32.mrf.mxu0 }
 0x924   : > { %v5928_v5 = vadd.f32 %v5896_v51, %v5464_v4  ;;  %v5462_v62 = vadd.f32 %v11230_v40, %v5413_v39  ;;  %v6036_v23 = vsel %vm1345_vm3, %v5925_v8, -inf  ;;  %v6039_v40 = vsel %vm1345_vm3, %v5927_v14, -inf }
 0x925   : > { %v6836_v12 = vunpack.c.l.b16 %v6053_v49  ;;  %v6020_v20 = vmax.f32 %v6018_v53, %v6019_v63  ;;  %v6029_v43 = vmax.f32 %v6027_v1, %v6028_v57  ;;  %v6058_v39 = vmax.bf16 %v11968_v7, %v11371_v16 }
 0x926   : > { %v11441_v35 = vpack.c.bf16 %v5928_v5, %v5927_v14  ;;  %v5926_v37 = vadd.f32 %v5894_v3, %v5462_v62  ;;  %v6041_v38 = vsel %vm1345_vm3, %v5928_v5, -inf  ;;  %v6059_v14 = vmax.bf16 %v11968_v7, %v11403_v28 }
 0x927   : > { %v6843_v41 = vsel %vm2036_vm8, %v6836_v12, %v6842_v50  ;;  %v6021_v9 = vrot.slane %v6020_v20, 1  ;;  %v6030_v6 = vrot.slane %v6029_v43, 4  ;;  %v6057_v5 = vmax.bf16 %v11968_v7, %v11362_v58 }
 0x928   : > { %v11445_v30 = vpack.c.bf16 %v5926_v37, %v5925_v8  ;;  %v6037_v29 = vsel %vm1345_vm3, %v5926_v37, -inf  ;;  %v6060_v12 = vmax.bf16 %v11968_v7, %v11423_v25  ;;  %v6061_v37 = vmax.bf16 %v11968_v7, %v6053_v49 }
 0x929   : > { %v6022_v34 = vmax.f32 %v6020_v20, %v6021_v9  ;;  %v6031_v46 = vmax.f32 %v6029_v43, %v6030_v6  ;;  %v6038_v51 = vmax.f32 %v6036_v23, %v6037_v29  ;;  %v6088_v23 = vunpack.c.l.b16 %v6059_v14 }
 0x92a   : > { %v6086_v28 = vunpack.c.l.b16 %v6057_v5  ;;  %v6090_v58 = vunpack.c.l.b16 %v6061_v37  ;;  %v9179_v5 = vld [vmem:[%s11900_s13 + $0x38] sm:$0xff]   ;;  %v5936_v37 = vpack.c.bf16 %v11354_v27, %v11347_v15  ;;  %v6168_v15 = vmax.bf16 %v11968_v7, %v11410_v24 }
 0x92b   : > { %v6054_v47 = vpack.c.bf16 %v6022_v34, %v6022_v34  ;;  %v6032_v53 = vrot.slane %v6031_v46, 2  ;;  %v6040_v22 = vmax.f32 %v6038_v51, %v6039_v40  ;;  %v6089_v34 = vunpack.c.l.b16 %v6060_v12 }
 0x92c   : > { %v5933_v12 = vpack.c.bf16 %v11310_v54, %v11303_v13  ;;  %v6170_v27 = vmax.bf16 %v11968_v7, %v11428_v36 }
 0x92d   : > { %v6837_v3 = vunpack.c.l.b16 %v6054_v47  ;;  %v6033_v50 = vmax.f32 %v6031_v46, %v6032_v53  ;;  %v6042_v26 = vmax.f32 %v6040_v22, %v6041_v38  ;;  %v6062_v9 = vmax.bf16 %v11968_v7, %v6054_v47 }
 0x92f   : > { %v6844_v11 = vsel %vm2038_vm9, %v6837_v3, %v6843_v41  ;;  %v6034_v4 = vrot.slane %v6033_v50, 1  ;;  %v6043_v63 = vrot.slane %v6042_v26, 4  ;;  %v6087_v41 = vunpack.c.l.b16 %v6058_v39  ;;  %v9176_v39 = vld [vmem:[%s11895_s8 + $0x30] sm:$0xff]  }
 0x930   : > { %v6091_v25 = vunpack.c.l.b16 %v6062_v9  ;;  %v6164_v9 = vmax.bf16 %v11968_v7, %v5936_v37 }
 0x931   : > { %v6035_v57 = vmax.f32 %v6033_v50, %v6034_v4  ;;  %v6044_v1 = vmax.f32 %v6042_v26, %v6043_v63  ;;  %v6094_v51 = vsel %vm2030_vm5, %v6087_v41, %v6086_v28  ;;  %v11470_v50 = vpack.c.bf16 %v11248_v18, %v11240_v61 }
 0x932   : > { %v6095_v53 = vsel %vm2032_vm6, %v6088_v23, %v6094_v51  ;;  %v11488_v61 = vpack.c.bf16 %v11256_v19, %v11246_v45  ;;  %v5931_v18 = vpack.c.bf16 %v11276_v55, %v11269_v42  ;;  %v9181_v45 = vld [vmem:[%s11898_s11 + $0x38] sm:$0xff]   ;;  %v9182_v19 = vld [vmem:[%s11898_s11 + $0x30] sm:$0xff]   ;;  %v5932_v55 = vpack.c.bf16 %v11283_v33, %v11274_v2  ;;  %v7960_v23 = vld [vmem:[#allocation10 + $0x3] ss:$0 sm:$0xff] }
 0x933   : > { %v6055_v8 = vpack.c.bf16 %v6035_v57, %v6035_v57  ;;  %v6045_v62 = vrot.slane %v6044_v1, 2  ;;  %v6096_v22 = vsel %vm2034_vm7, %v6089_v34, %v6095_v53  ;;  %v9178_v42 = vld [vmem:[%s11901_s14 + $0x30] sm:$0xff]   ;;  %8932 = vmatprep.subr.bf16.mxu1 %v9181_v45  ;;  %v5934_v2 = vpack.c.bf16 %v11322_v21, %v11308_v0 }
 0x934   : > { %v6097_v3 = vsel %vm2036_vm8, %v6090_v58, %v6096_v22  ;;  %v6158_v14 = vmax.bf16 %v11968_v7, %v11488_v61  ;;  %8933 = vmatpush3.bf16.msra.mxu1 %v9181_v45  ;;  %v5935_v33 = vpack.c.bf16 %v11349_v56, %v11340_v31  ;;  %v5937_v41 = vpack.c.bf16 %v11388_v10, %v11375_v17  ;;  %v11982_v58 = vld [vmem:[#allocation33_spill] sm:$0xff] }
 0x935   : > { %v6838_v20 = vunpack.c.l.b16 %v6055_v8  ;;  %v6046_v43 = vmax.f32 %v6044_v1, %v6045_v62  ;;  %v6063_v29 = vmax.bf16 %v11968_v7, %v6055_v8  ;;  %v6098_v26 = vsel %vm2038_vm9, %v6091_v25, %v6097_v3  ;;  %v9177_v62 = vld [vmem:[%s11901_s14 + $0x38] sm:$0xff]   ;;  %8934 = vmatprep.subr.bf16.mxu1 %v9182_v19 }
 0x936   : > { %v6157_v8 = vmax.bf16 %v11968_v7, %v11470_v50  ;;  %v6162_v13 = vmax.bf16 %v11968_v7, %v5934_v2  ;;  %v6163_v54 = vmax.bf16 %v11968_v7, %v5935_v33  ;;  %v6165_v0 = vmax.bf16 %v11968_v7, %v5937_v41 }
 0x937   : > { %v6845_v16 = vsel %vm2040_vm10, %v6838_v20, %v6844_v11  ;;  %v6047_v6 = vrot.slane %v6046_v43, 1  ;;  %v6092_v49 = vunpack.c.l.b16 %v6063_v29  ;;  %v6160_v20 = vmax.bf16 %v11968_v7, %v5932_v55 }
 0x938   : > { %8935 = vmatpush3.bf16.msra.mxu1 %v9182_v19  ;;  %v6166_v21 = vmax.bf16 %v11968_v7, %v11386_v59  ;;  %v6167_v31 = vmax.bf16 %v11968_v7, %v11415_v52  ;;  %v6169_v56 = vmax.bf16 %v11968_v7, %v11432_v44  ;;  %v6171_v17 = vmax.bf16 %v11968_v7, %v11445_v30 }
 0x939   : > { %v6048_v46 = vmax.f32 %v6046_v43, %v6047_v6  ;;  %v6099_v63 = vsel %vm2040_vm10, %v6092_v49, %v6098_v26  ;;  %v6161_v43 = vmax.bf16 %v11968_v7, %v5933_v12  ;;  %9012 = vmatprep.subr.bf16.mxu1 %v11979_v60  ;;  %v6172_v10 = vmax.bf16 %v11968_v7, %v11441_v35  ;;  %v9180_v6 = vld [vmem:[%s11900_s13 + $0x30] sm:$0xff]  }
 0x93b   : > { %v6056_v40 = vpack.c.bf16 %v6048_v46, %v6048_v46 }
 0x93d   : > { %v6064_v47 = vmax.bf16 %v11968_v7, %v6056_v40  ;;  %v6839_v38 = vunpack.c.l.b16 %v6056_v40 }
 0x93f   : > { %v6093_v11 = vunpack.c.l.b16 %v6064_v47  ;;  %v11474_v4 = vsel %vm2042_vm11, %v6839_v38, %v6845_v16 }
 0x940   : > { %v6847_v16 = vpack.c.b16 %v11474_v4, %v11474_v4 }
 0x941   : > { %v6100_v57 = vsel %vm2042_vm11, %v6093_v11, %v6099_v63 }
 0x942   : > { %v6101_v1 = vpack.c.b16 %v6100_v57, %v6100_v57 }
 0x944   : > { %8893 = vmatmul.mubr.msk.bf16.vlgmr.msra.gmra.mxu0 %vm1345_vm3, %v6101_v1 }
 0x945   : > { %8897 = vmatpush3.bf16.msra.mxu0 %v11201_v48  ;;  %8900 = vmatprep.mubr.msk.bf16.mxu0 %vm1345_vm3, %v6157_v8  ;;  %v6159_v48 = vmax.bf16 %v11968_v7, %v5931_v18 }
 0x946   : > { %8898 = vmatprep.subr.bf16.mxu0 %v9176_v39 }
 0x949   : > { %8899 = vmatpush3.bf16.msra.mxu0 %v9176_v39 }
 0x94a   : > { %8968 = vmatprep.subr.bf16.mxu0 %v11979_v60 }
 0x94c   : > { %8901 = vmatmul.mubr.msk.bf16.vlgmr.msra.gmra.mxu0 %vm1345_vm3, %v6158_v14 }
 0x94d   : > { %8904 = vmatprep.mubr.msk.bf16.mxu0 %vm1345_vm3, %v6159_v48  ;;  %8969 = vmatpush3.bf16.msra.mxu0 %v9177_v62 }
 0x94e   : > { %8970 = vmatprep.subr.bf16.mxu0 %v11979_v60 }
 0x951   : > { %8971 = vmatpush3.bf16.msra.mxu0 %v9178_v42 }
 0x952   : > { %8976 = vmatprep.subr.bf16.mxu0 %v9179_v5 }
 0x954   : > { %8905 = vmatmul.mubr.msk.bf16.gmra.mxu0 %vm1345_vm3, %v6160_v20 }
 0x955   : > { %8908 = vmatprep.mubr.msk.bf16.mxu0 %vm1345_vm3, %v6161_v43 }
 0x95c   : > { %8909 = vmatmul.mubr.msk.bf16.gmra.mxu0 %vm1345_vm3, %v6162_v13 }
 0x95d   : > { %8912 = vmatprep.mubr.msk.bf16.mxu0 %vm1345_vm3, %v6163_v54 }
 0x964   : > { %8913 = vmatmul.mubr.msk.bf16.gmra.mxu0 %vm1345_vm3, %v6164_v9 }
 0x965   : > { %8916 = vmatprep.mubr.msk.bf16.mxu0 %vm1345_vm3, %v6165_v0 }
 0x96c   : > { %8917 = vmatmul.mubr.msk.bf16.gmra.mxu0 %vm1345_vm3, %v6166_v21 }
 0x96d   : > { %8920 = vmatprep.mubr.msk.bf16.mxu0 %vm1345_vm3, %v6167_v31 }
 0x974   : > { %8921 = vmatmul.mubr.msk.bf16.gmra.mxu0 %vm1345_vm3, %v6168_v15 }
 0x975   : > { %8924 = vmatprep.mubr.msk.bf16.mxu0 %vm1345_vm3, %v6169_v56 }
 0x97c   : > { %8925 = vmatmul.mubr.msk.bf16.gmra.mxu0 %vm1345_vm3, %v6170_v27 }
 0x97d   : > { %8928 = vmatprep.mubr.msk.bf16.mxu0 %vm1345_vm3, %v6171_v17 }
 0x984   : > { %8929 = vmatmul.mubr.msk.bf16.gmra.mxu0 %vm1345_vm3, %v6172_v10 }
 0x985   : > { %8972 = vmatprep.mubr.msk.bf16.mxu0 %vm9398_vm4, %v11979_v60 }
 0x98c   : > { %8973 = vmatmul.mubr.msk.bf16.vlgmr.msra.gmra.mxu0 %vm1345_vm3, %v6847_v16 }
 0x98d   : > { %8977 = vmatpush3.bf16.msra.mxu0 %v9179_v5  ;;  %8980 = vmatprep.mubr.msk.bf16.mxu0 %vm1345_vm3, %v11470_v50 }
 0x98e   : > { %8978 = vmatprep.subr.bf16.mxu0 %v9180_v6 }
 0x991   : > { %8979 = vmatpush3.bf16.msra.mxu0 %v9180_v6 }
 0x994   : > { %8981 = vmatmul.mubr.msk.bf16.vlgmr.msra.gmra.mxu0 %vm1345_vm3, %v11488_v61 }
 0x995   : > { %8984 = vmatprep.mubr.msk.bf16.mxu0 %vm1345_vm3, %v5931_v18 }
 0x99c   : > { %8985 = vmatmul.mubr.msk.bf16.gmra.mxu0 %vm1345_vm3, %v5932_v55 }
 0x99d   : > { %8988 = vmatprep.mubr.msk.bf16.mxu0 %vm1345_vm3, %v5933_v12 }
 0x9a4   : > { %8989 = vmatmul.mubr.msk.bf16.gmra.mxu0 %vm1345_vm3, %v5934_v2 }
 0x9a5   : > { %8992 = vmatprep.mubr.msk.bf16.mxu0 %vm1345_vm3, %v5935_v33 }
 0x9ac   : > { %8993 = vmatmul.mubr.msk.bf16.gmra.mxu0 %vm1345_vm3, %v5936_v37 }
 0x9ad   : > { %8996 = vmatprep.mubr.msk.bf16.mxu0 %vm1345_vm3, %v5937_v41 }
 0x9b4   : > { %8997 = vmatmul.mubr.msk.bf16.gmra.mxu0 %vm1345_vm3, %v11386_v59 }
 0x9b5   : > { %9000 = vmatprep.mubr.msk.bf16.mxu0 %vm1345_vm3, %v11415_v52 }
 0x9bc   : > { %9001 = vmatmul.mubr.msk.bf16.gmra.mxu0 %vm1345_vm3, %v11410_v24 }
 0x9bd   : > { %9004 = vmatprep.mubr.msk.bf16.mxu0 %vm1345_vm3, %v11432_v44 }
 0x9c4   : > { %9005 = vmatmul.mubr.msk.bf16.gmra.mxu0 %vm1345_vm3, %v11428_v36 }
 0x9c5   : > { %9008 = vmatprep.mubr.msk.bf16.mxu0 %vm1345_vm3, %v11445_v30 }
 0x9cc   : > { %9009 = vmatmul.mubr.msk.bf16.gmra.mxu0 %vm1345_vm3, %v11441_v35 }
 0xa04   : > { %v6151_v59 = vpop.f32.mrf.mxu0 }
 0xa05   : > { %v6152_v29 = vadd.f32 %v7960_v23, %v6151_v59 }
 0xa06   : > { %v8894_v28 = vpop.f32.mrf.mxu0 }
 0xa07   : > { %v6407_v52 = vrot.slane %v6152_v29, %v10198_v32  ;;  %v6400_v33 = vcombine.high %v6152_v29, %v6152_v29 }
 0xa08   : > { %v6154_v34 = vpop.f32.mrf.mxu0 }
 0xa09   : > { %v6423_v24 = vrot.slane %v6407_v52, %v10198_v32  ;;  %v6415_v25 = vcombine.high %v6407_v52, %v6407_v52  ;;  %v6414_v31 = vrot.slane %v6400_v33, %v10198_v32 }
 0xa0a   : > { %v8895_v46 = vpop.f32.mrf.mxu0 }
 0xa0b   : > { %v6452_v51 = vrot.slane %v6423_v24, %v11982_v58  ;;  %v6437_v35 = vrot.slane %v6415_v25, %v10198_v32  ;;  %v6445_v61 = vcombine.high %v6423_v24, %v6423_v24  ;;  %v6430_v23 = vrot.slane %v6414_v31, %v10198_v32 }
 0xa0c   : > { %v8902_v44 = vpop.f32.mrf.mxu0  ;;  %v6416_v46 = vcombine.high %v6414_v31, %v6414_v31 }
 0xa0d   : > { %v6491_v53 = vadd.f32 %v8902_v44, %v6452_v51  ;;  %v6456_v4 = vrot.slane %v6437_v35, %v11982_v58  ;;  %v6460_v55 = vrot.slane %v6445_v61, %v11982_v58  ;;  %v6447_v13 = vcombine.high %v6437_v35, %v6437_v35 }
 0xa0e   : > { %v6272_v36 = vpop.f32.mrf.mxu0 }
 0xa0f   : > { %v6489_v22 = vadd.f32 %v6452_v51, %v6272_v36  ;;  %v6464_v56 = vrot.slane %v6447_v13, %v11982_v58 }
 0xa10   : > { %v8903_v40 = vpop.f32.mrf.mxu0 }
 0xa11   : > { %v6492_v30 = vadd.f32 %v8903_v40, %v6452_v51 }
 0xa12   : > { %v6275_v49 = vpop.f32.mrf.mxu0 }
 0xa13   : > { %v6490_v47 = vadd.f32 %v6452_v51, %v6275_v49  ;;  %v6522_v38 = vpack.c.bf16 %v6492_v30, %v6491_v53  ;;  %v6468_v51 = vrot.slane %v6430_v23, %v11982_v58  ;;  %v6444_v49 = vrot.slane %v6416_v46, %v10198_v32  ;;  %v9183_v46 = vld [vmem:[%s11902_s15 + $0x8] sm:$0xff]  }
 0xa14   : > { %v8906_v3 = vpop.f32.mrf.mxu0 }
 0xa15   : > { %v6521_v50 = vpack.c.bf16 %v6490_v47, %v6489_v22  ;;  %v6538_v63 = vmax.bf16 %v11968_v7, %v6522_v38  ;;  %v6495_v39 = vadd.f32 %v8906_v3, %v6456_v4  ;;  %v6448_v13 = vcombine.high %v6444_v49, %v6444_v49 }
 0xa16   : > { %v6288_v26 = vpop.f32.mrf.mxu0 }
 0xa17   : > { %v6537_v11 = vmax.bf16 %v11968_v7, %v6521_v50  ;;  %v6493_v18 = vadd.f32 %v6456_v4, %v6288_v26 }
 0xa18   : > { %v8907_v57 = vpop.f32.mrf.mxu0 }
 0xa19   : > { %v6496_v1 = vadd.f32 %v8907_v57, %v6456_v4  ;;  %8936 = vmatprep.mubr.msk.bf16.mxu1 %vm1345_vm3, %v6537_v11  ;;  %v6472_v11 = vrot.slane %v6444_v49, %v11982_v58 }
 0xa1a   : > { %v6291_v8 = vpop.f32.mrf.mxu0  ;;  %8937 = vmatmul.mubr.msk.bf16.vlgmr.msra.gmra.mxu1 %vm1345_vm3, %v6538_v63 }
 0xa1b   : > { %v6494_v62 = vadd.f32 %v6456_v4, %v6291_v8  ;;  %v6524_v14 = vpack.c.bf16 %v6496_v1, %v6495_v39  ;;  %v6446_v8 = vcombine.high %v6430_v23, %v6430_v23  ;;  %9013 = vmatpush3.bf16.msra.mxu1 %v9183_v46 }
 0xa1c   : > { %v8910_v48 = vpop.f32.mrf.mxu0  ;;  %9014 = vmatprep.subr.bf16.mxu1 %v11979_v60 }
 0xa1d   : > { %v6523_v45 = vpack.c.bf16 %v6494_v62, %v6493_v18  ;;  %v6540_v5 = vmax.bf16 %v11968_v7, %v6524_v14  ;;  %v6499_v43 = vadd.f32 %v8910_v48, %v6460_v55 }
 0xa1e   : > { %v6304_v19 = vpop.f32.mrf.mxu0 }
 0xa1f   : > { %v6539_v42 = vmax.bf16 %v11968_v7, %v6523_v45  ;;  %v6497_v54 = vadd.f32 %v6460_v55, %v6304_v19 }
 0xa20   : > { %v8911_v12 = vpop.f32.mrf.mxu0 }
 0xa21   : > { %v6500_v20 = vadd.f32 %v8911_v12, %v6460_v55  ;;  %8940 = vmatprep.mubr.msk.bf16.mxu1 %vm1345_vm3, %v6539_v42  ;;  %v6476_v42 = vrot.slane %v6446_v8, %v11982_v58 }
 0xa22   : > { %v6307_v2 = vpop.f32.mrf.mxu0  ;;  %8941 = vmatmul.mubr.msk.bf16.gmra.mxu1 %vm1345_vm3, %v6540_v5 }
 0xa23   : > { %v6498_v37 = vadd.f32 %v6460_v55, %v6307_v2  ;;  %v6526_v41 = vpack.c.bf16 %v6500_v20, %v6499_v43 }
 0xa24   : > { %v8914_v9 = vpop.f32.mrf.mxu0 }
 0xa25   : > { %v6525_v0 = vpack.c.bf16 %v6498_v37, %v6497_v54  ;;  %v6542_v27 = vmax.bf16 %v11968_v7, %v6526_v41  ;;  %v6503_v16 = vadd.f32 %v8914_v9, %v6464_v56 }
 0xa26   : > { %v6320_v21 = vpop.f32.mrf.mxu0 }
 0xa27   : > { %v6541_v15 = vmax.bf16 %v11968_v7, %v6525_v0  ;;  %v6501_v59 = vadd.f32 %v6464_v56, %v6320_v21  ;;  %v6480_v21 = vrot.slane %v6448_v13, %v11982_v58 }
 0xa28   : > { %v8915_v17 = vpop.f32.mrf.mxu0 }
 0xa29   : > { %v6504_v10 = vadd.f32 %v8915_v17, %v6464_v56  ;;  %8944 = vmatprep.mubr.msk.bf16.mxu1 %vm1345_vm3, %v6541_v15 }
 0xa2a   : > { %v6323_v6 = vpop.f32.mrf.mxu0  ;;  %8945 = vmatmul.mubr.msk.bf16.gmra.mxu1 %vm1345_vm3, %v6542_v27 }
 0xa2b   : > { %v6502_v29 = vadd.f32 %v6464_v56, %v6323_v6  ;;  %v6528_v28 = vpack.c.bf16 %v6504_v10, %v6503_v16 }
 0xa2c   : > { %v8918_v52 = vpop.f32.mrf.mxu0 }
 0xa2d   : > { %v6527_v34 = vpack.c.bf16 %v6502_v29, %v6501_v59  ;;  %v6544_v36 = vmax.bf16 %v11968_v7, %v6528_v28  ;;  %v6507_v30 = vadd.f32 %v8918_v52, %v6468_v51 }
 0xa2e   : > { %v6336_v24 = vpop.f32.mrf.mxu0 }
 0xa2f   : > { %v6543_v44 = vmax.bf16 %v11968_v7, %v6527_v34  ;;  %v6505_v35 = vadd.f32 %v6468_v51, %v6336_v24 }
 0xa30   : > { %v8919_v25 = vpop.f32.mrf.mxu0 }
 0xa31   : > { %v6508_v40 = vadd.f32 %v8919_v25, %v6468_v51  ;;  %8948 = vmatprep.mubr.msk.bf16.mxu1 %vm1345_vm3, %v6543_v44 }
 0xa32   : > { %v6339_v53 = vpop.f32.mrf.mxu0  ;;  %8949 = vmatmul.mubr.msk.bf16.gmra.mxu1 %vm1345_vm3, %v6544_v36 }
 0xa33   : > { %v6506_v22 = vadd.f32 %v6468_v51, %v6339_v53  ;;  %v6530_v47 = vpack.c.bf16 %v6508_v40, %v6507_v30 }
 0xa34   : > { %v8922_v38 = vpop.f32.mrf.mxu0 }
 0xa35   : > { %v6529_v3 = vpack.c.bf16 %v6506_v22, %v6505_v35  ;;  %v6546_v4 = vmax.bf16 %v11968_v7, %v6530_v47  ;;  %v6511_v1 = vadd.f32 %v8922_v38, %v6472_v11  ;;  %v9184_v35 = vld [vmem:[%s11902_s15] sm:$0xff]  }
 0xa36   : > { %v6352_v50 = vpop.f32.mrf.mxu0  ;;  %9015 = vmatpush3.bf16.msra.mxu1 %v9184_v35 }
 0xa37   : > { %v6545_v26 = vmax.bf16 %v11968_v7, %v6529_v3  ;;  %v6509_v61 = vadd.f32 %v6472_v11, %v6352_v50 }
 0xa38   : > { %v8923_v63 = vpop.f32.mrf.mxu0 }
 0xa39   : > { %v6512_v57 = vadd.f32 %v8923_v63, %v6472_v11  ;;  %8952 = vmatprep.mubr.msk.bf16.mxu1 %vm1345_vm3, %v6545_v26 }
 0xa3a   : > { %v6355_v39 = vpop.f32.mrf.mxu0  ;;  %8953 = vmatmul.mubr.msk.bf16.gmra.mxu1 %vm1345_vm3, %v6546_v4 }
 0xa3b   : > { %v6510_v18 = vadd.f32 %v6472_v11, %v6355_v39  ;;  %v6532_v62 = vpack.c.bf16 %v6512_v57, %v6511_v1 }
 0xa3c   : > { %v8926_v14 = vpop.f32.mrf.mxu0 }
 0xa3d   : > { %v6531_v48 = vpack.c.bf16 %v6510_v18, %v6509_v61  ;;  %v6548_v55 = vmax.bf16 %v11968_v7, %v6532_v62  ;;  %v6515_v20 = vadd.f32 %v8926_v14, %v6476_v42 }
 0xa3e   : > { %v6368_v45 = vpop.f32.mrf.mxu0 }
 0xa3f   : > { %v6547_v19 = vmax.bf16 %v11968_v7, %v6531_v48  ;;  %v6513_v2 = vadd.f32 %v6476_v42, %v6368_v45 }
 0xa40   : > { %v8927_v5 = vpop.f32.mrf.mxu0 }
 0xa41   : > { %v6516_v12 = vadd.f32 %v8927_v5, %v6476_v42  ;;  %8956 = vmatprep.mubr.msk.bf16.mxu1 %vm1345_vm3, %v6547_v19 }
 0xa42   : > { %v6371_v43 = vpop.f32.mrf.mxu0  ;;  %8957 = vmatmul.mubr.msk.bf16.gmra.mxu1 %vm1345_vm3, %v6548_v55 }
 0xa43   : > { %v6514_v33 = vadd.f32 %v6476_v42, %v6371_v43  ;;  %v6534_v54 = vpack.c.bf16 %v6516_v12, %v6515_v20 }
 0xa44   : > { %v8930_v37 = vpop.f32.mrf.mxu0 }
 0xa45   : > { %v6533_v41 = vpack.c.bf16 %v6514_v33, %v6513_v2  ;;  %v6550_v31 = vmax.bf16 %v11968_v7, %v6534_v54  ;;  %v6519_v27 = vadd.f32 %v8930_v37, %v6480_v21 }
 0xa46   : > { %v6384_v9 = vpop.f32.mrf.mxu0 }
 0xa47   : > { %v6549_v0 = vmax.bf16 %v11968_v7, %v6533_v41  ;;  %v6517_v10 = vadd.f32 %v6480_v21, %v6384_v9 }
 0xa48   : > { %v8931_v15 = vpop.f32.mrf.mxu0 }
 0xa49   : > { %v6520_v56 = vadd.f32 %v8931_v15, %v6480_v21  ;;  %8960 = vmatprep.mubr.msk.bf16.mxu1 %vm1345_vm3, %v6549_v0 }
 0xa4a   : > { %v6387_v17 = vpop.f32.mrf.mxu0  ;;  %8961 = vmatmul.mubr.msk.bf16.gmra.mxu1 %vm1345_vm3, %v6550_v31 }
 0xa4b   : > { %v6518_v16 = vadd.f32 %v6480_v21, %v6387_v17  ;;  %v6536_v6 = vpack.c.bf16 %v6520_v56, %v6519_v27 }
 0xa4c   : > { %v6897_v23 = vpop.f32.mrf.mxu0 }
 0xa4d   : > { %v6535_v59 = vpack.c.bf16 %v6518_v16, %v6517_v10  ;;  %v6552_v52 = vmax.bf16 %v11968_v7, %v6536_v6  ;;  %v7130_v8 = vcombine.high %v6897_v23, %v6897_v23  ;;  %v7137_v62 = vrot.slane %v6897_v23, %v10198_v32  ;;  %v11690_v6 = vld [vmem:[%s11899_s12 + $0x3] ss:$0 sm:$0xff] }
 0xa4e   : > { %v8974_v29 = vpop.f32.mrf.mxu0 }
 0xa4f   : > { %v6551_v28 = vmax.bf16 %v11968_v7, %v6535_v59  ;;  %v7144_v48 = vrot.slane %v7130_v8, %v10198_v32  ;;  %v7145_v42 = vcombine.high %v7137_v62, %v7137_v62  ;;  %v7153_v12 = vrot.slane %v7137_v62, %v10198_v32 }
 0xa50   : > { %v6900_v34 = vpop.f32.mrf.mxu0 }
 0xa51   : > { %8964 = vmatprep.mubr.msk.bf16.mxu1 %vm1345_vm3, %v6551_v28  ;;  %v7146_v5 = vcombine.high %v7144_v48, %v7144_v48  ;;  %v7167_v2 = vrot.slane %v7145_v42, %v10198_v32  ;;  %v11669_v13 = vrot.slane %v7144_v48, %v10198_v32  ;;  %v7175_v37 = vcombine.high %v7153_v12, %v7153_v12 }
 0xa52   : > { %8965 = vmatmul.mubr.msk.bf16.gmra.mxu1 %vm1345_vm3, %v6552_v52  ;;  %v8975_v24 = vpop.f32.mrf.mxu0  ;;  %v7182_v21 = vrot.slane %v7153_v12, %v11982_v58 }
 0xa53   : > { %9016 = vmatprep.mubr.msk.bf16.mxu1 %vm9398_vm4, %v11979_v60  ;;  %v11672_v54 = vrot.slane %v7146_v5, %v10198_v32  ;;  %v7177_v0 = vcombine.high %v7167_v2, %v7167_v2  ;;  %v7176_v15 = vcombine.high %v11669_v13, %v11669_v13  ;;  %v7186_v56 = vrot.slane %v7167_v2, %v11982_v58 }
 0xa54   : > { %v8982_v44 = vpop.f32.mrf.mxu0  ;;  %v7190_v17 = vrot.slane %v7175_v37, %v11982_v58  ;;  %v7198_v32 = vrot.slane %v11669_v13, %v11982_v58 }
 0xa55   : > { %v7178_v27 = vcombine.high %v11672_v54, %v11672_v54  ;;  %v7221_v10 = vadd.f32 %v8982_v44, %v7182_v21  ;;  %v7194_v28 = vrot.slane %v7177_v0, %v11982_v58  ;;  %v11697_v52 = vrot.slane %v11672_v54, %v11982_v58 }
 0xa56   : > { %v7002_v51 = vpop.f32.mrf.mxu0 }
 0xa57   : > { %v7219_v59 = vadd.f32 %v7182_v21, %v7002_v51 }
 0xa58   : > { %v8983_v36 = vpop.f32.mrf.mxu0 }
 0xa59   : > { %v11692_v29 = vadd.f32 %v8983_v36, %v7182_v21 }
 0xa5a   : > { %v7005_v25 = vpop.f32.mrf.mxu0 }
 0xa5b   : > { %v7220_v34 = vadd.f32 %v7182_v21, %v7005_v25 }
 0xa5c   : > { %v8986_v40 = vpop.f32.mrf.mxu0 }
 0xa5d   : > { %v7225_v24 = vadd.f32 %v8986_v40, %v7186_v56 }
 0xa5e   : > { %v7018_v30 = vpop.f32.mrf.mxu0 }
 0xa5f   : > { %v7223_v46 = vadd.f32 %v7186_v56, %v7018_v30 }
 0xa60   : > { %v8987_v53 = vpop.f32.mrf.mxu0 }
 0xa61   : > { %v11699_v44 = vadd.f32 %v8987_v53, %v7186_v56 }
 0xa62   : > { %v7021_v49 = vpop.f32.mrf.mxu0 }
 0xa63   : > { %v7224_v8 = vadd.f32 %v7186_v56, %v7021_v49 }
 0xa64   : > { %v8990_v22 = vpop.f32.mrf.mxu0 }
 0xa65   : > { %v7229_v62 = vadd.f32 %v8990_v22, %v7190_v17 }
 0xa66   : > { %v7034_v47 = vpop.f32.mrf.mxu0 }
 0xa67   : > { %v7227_v48 = vadd.f32 %v7190_v17, %v7034_v47 }
 0xa68   : > { %v8991_v38 = vpop.f32.mrf.mxu0 }
 0xa69   : > { %v11702_v51 = vadd.f32 %v8991_v38, %v7190_v17 }
 0xa6a   : > { %v7037_v3 = vpop.f32.mrf.mxu0 }
 0xa6b   : > { %v7228_v36 = vadd.f32 %v7190_v17, %v7037_v3 }
 0xa6c   : > { %v8994_v50 = vpop.f32.mrf.mxu0 }
 0xa6d   : > { %v7233_v25 = vadd.f32 %v8994_v50, %v7194_v28 }
 0xa6e   : > { %v7050_v26 = vpop.f32.mrf.mxu0 }
 0xa6f   : > { %v7231_v40 = vadd.f32 %v7194_v28, %v7050_v26 }
 0xa70   : > { %v11648_v11 = vpop.f32.mrf.mxu0 }
 0xa71   : > { %v11709_v49 = vadd.f32 %v11648_v11, %v7194_v28 }
 0xa72   : > { %v11650_v60 = vpop.f32.mrf.mxu0 }
 0xa73   : > { %v7232_v22 = vadd.f32 %v7194_v28, %v11650_v60 }
 0xa74   : > { %v11652_v4 = vpop.f32.mrf.mxu0 }
 0xa75   : > { %v7237_v47 = vadd.f32 %v11652_v4, %v7198_v32 }
 0xa76   : > { %v11654_v57 = vpop.f32.mrf.mxu0 }
 0xa78   : > { %v8999_v61 = vpop.f32.mrf.mxu0 }
 0xa7a   : > { %v7069_v45 = vpop.f32.mrf.mxu0 }
 0xa7c   : > { %v9002_v20 = vpop.f32.mrf.mxu0 }
 0xa7e   : > { %v7082_v41 = vpop.f32.mrf.mxu0 }
 0xa80   : > { %v11685_v16 = vpop.f32.mrf.mxu0 }
 0xa82   : > { %v7085_v5 = vpop.f32.mrf.mxu0 }
 0xa84   : > { %v11721_v11 = vpop.f32.mrf.mxu0 }
 0xa86   : > { %v11736_v28 = vpop.f32.mrf.mxu0 }
 0xada   : > { %v8938_v63 = vpop.f32.mrf.mxu1 }
 0xadb   : > { %v6789_v42 = vadd.f32 %v8938_v63, %v11690_v6  ;;  %v7235_v63 = vadd.f32 %v7198_v32, %v11654_v57 }
 0xadc   : > { %v6652_v1 = vpop.f32.mrf.mxu1 }
 0xadd   : > { %v6787_v12 = vadd.f32 %v11690_v6, %v6652_v1  ;;  %v11715_v1 = vadd.f32 %v8999_v61, %v7198_v32  ;;  %v7253_v50 = vadd.f32 %v7221_v10, %v6789_v42  ;;  %v11726_v61 = vadd.f32 %v11697_v52, %v7082_v41 }
 0xade   : > { %v11656_v39 = vpop.f32.mrf.mxu1 }
 0xadf   : > { %v7251_v0 = vadd.f32 %v7219_v59, %v6787_v12  ;;  %v7286_v10 = vsel %vm1345_vm3, %v7253_v50, -inf }
 0xae0   : > { %v6655_v18 = vpop.f32.mrf.mxu1 }
 0xae1   : > { %v6788_v2 = vadd.f32 %v11690_v6, %v6655_v18  ;;  %v7236_v18 = vadd.f32 %v7198_v32, %v7069_v45  ;;  %v11733_v32 = vadd.f32 %v11697_v52, %v7085_v5  ;;  %v7283_v41 = vsel %vm1345_vm3, %v7251_v0, -inf }
 0xae2   : > { %v11659_v14 = vpop.f32.mrf.mxu1 }
 0xae3   : > { %v7252_v60 = vadd.f32 %v7220_v34, %v6788_v2  ;;  %v6793_v45 = vadd.f32 %v11659_v14, %v11690_v6  ;;  %v6790_v34 = vadd.f32 %v11656_v39, %v11690_v6 }
 0xae4   : > { %v6668_v19 = vpop.f32.mrf.mxu1 }
 0xae5   : > { %v6791_v38 = vadd.f32 %v11690_v6, %v6668_v19  ;;  %v7284_v14 = vsel %vm1345_vm3, %v7252_v60, -inf  ;;  %v7257_v5 = vadd.f32 %v7225_v24, %v6793_v45 }
 0xae6   : > { %v11662_v55 = vpop.f32.mrf.mxu1 }
 0xae7   : > { %v6794_v2 = vadd.f32 %v11662_v55, %v11690_v6 }
 0xae8   : > { %v6671_v43 = vpop.f32.mrf.mxu1 }
 0xae9   : > { %v6792_v30 = vadd.f32 %v11690_v6, %v6671_v43  ;;  %v11719_v43 = vadd.f32 %v9002_v20, %v11697_v52 }
 0xaea   : > { %v11666_v33 = vpop.f32.mrf.mxu1 }
 0xaeb   : > { %v7256_v4 = vadd.f32 %v7224_v8, %v6792_v30  ;;  %v6797_v20 = vadd.f32 %v11666_v33, %v11690_v6 }
 0xaec   : > { %v6684_v9 = vpop.f32.mrf.mxu1 }
 0xaed   : > { %v6795_v26 = vadd.f32 %v11690_v6, %v6684_v9  ;;  %v7255_v9 = vadd.f32 %v7223_v46, %v6791_v38  ;;  %v7297_v8 = vsel %vm1345_vm3, %v7256_v4, -inf  ;;  %v7285_v38 = vmax.f32 %v7283_v41, %v7284_v14 }
 0xaee   : > { %v11675_v31 = vpop.f32.mrf.mxu1  ;;  %v7258_v4 = vadd.f32 %v11699_v44, %v6794_v2 }
 0xaef   : > { %v7296_v12 = vsel %vm1345_vm3, %v7255_v9, -inf }
 0xaf0   : > { %v6687_v23 = vpop.f32.mrf.mxu1  ;;  %v7298_v24 = vmax.f32 %v7296_v12, %v7297_v8  ;;  %v7287_v8 = vmax.f32 %v7285_v38, %v7286_v10 }
 0xaf1   : > { %v6796_v53 = vadd.f32 %v11690_v6, %v6687_v23  ;;  %v7259_v23 = vadd.f32 %v7227_v48, %v6795_v26 }
 0xaf2   : > { %v8950_v35 = vpop.f32.mrf.mxu1 }
 0xaf3   : > { %v7260_v56 = vadd.f32 %v7228_v36, %v6796_v53  ;;  %v6801_v46 = vadd.f32 %v8950_v35, %v11690_v6  ;;  %v7309_v30 = vsel %vm1345_vm3, %v7259_v23, -inf  ;;  %v6798_v35 = vadd.f32 %v11675_v31, %v11690_v6 }
 0xaf4   : > { %v6700_v37 = vpop.f32.mrf.mxu1  ;;  %v7299_v31 = vsel %vm1345_vm3, %v7257_v5, -inf }
 0xaf5   : > { %v6799_v19 = vadd.f32 %v11690_v6, %v6700_v37  ;;  %v7310_v42 = vsel %vm1345_vm3, %v7260_v56, -inf  ;;  %v7261_v37 = vadd.f32 %v7229_v62, %v6797_v20  ;;  %v7265_v26 = vadd.f32 %v7233_v25, %v6801_v46 }
 0xaf6   : > { %v8951_v3 = vpop.f32.mrf.mxu1  ;;  %v7311_v50 = vmax.f32 %v7309_v30, %v7310_v42  ;;  %v7262_v25 = vadd.f32 %v11702_v51, %v6798_v35 }
 0xaf7   : > { %v7263_v36 = vadd.f32 %v7231_v40, %v6799_v19  ;;  %v11754_v40 = vpop.f32.mrf.mxu0  ;;  %v6802_v62 = vadd.f32 %v8951_v3, %v11690_v6  ;;  %v7312_v45 = vsel %vm1345_vm3, %v7261_v37, -inf  ;;  %v7254_v3 = vadd.f32 %v11692_v29, %v6790_v34 }
 0xaf8   : > { %v6703_v21 = vpop.f32.mrf.mxu1  ;;  %v7313_v23 = vmax.f32 %v7311_v50, %v7312_v45  ;;  %v7301_v29 = vsel %vm1345_vm3, %v7258_v4, -inf  ;;  %v7314_v34 = vsel %vm1345_vm3, %v7262_v25, -inf  ;;  %v7242_v50 = vadd.f32 %v11685_v16, %v11697_v52 }
 0xaf9   : > { %v6800_v57 = vadd.f32 %v11690_v6, %v6703_v21  ;;  %v7322_v55 = vsel %vm1345_vm3, %v7263_v36, -inf  ;;  %v7266_v44 = vadd.f32 %v11709_v49, %v6802_v62  ;;  %v7288_v5 = vsel %vm1345_vm3, %v7254_v3, -inf }
 0xafa   : > { %v8954_v17 = vpop.f32.mrf.mxu1  ;;  %v7315_v2 = vmax.f32 %v7313_v23, %v7314_v34  ;;  %v11793_v62 = vrot.slane %v7178_v27, %v11982_v58 }
 0xafb   : > { %v7264_v59 = vadd.f32 %v7232_v22, %v6800_v57  ;;  %v6805_v22 = vadd.f32 %v8954_v17, %v11690_v6  ;;  %v7101_v17 = vpop.f32.mrf.mxu0 }
 0xafc   : > { %v6716_v33 = vpop.f32.mrf.mxu1 }
 0xafd   : > { %v6803_v48 = vadd.f32 %v11690_v6, %v6716_v33  ;;  %v7323_v53 = vsel %vm1345_vm3, %v7264_v59, -inf  ;;  %v7269_v9 = vadd.f32 %v7237_v47, %v6805_v22  ;;  %v7325_v59 = vsel %vm1345_vm3, %v7265_v26, -inf }
 0xafe   : > { %v8955_v39 = vpop.f32.mrf.mxu1  ;;  %v7324_v56 = vmax.f32 %v7322_v55, %v7323_v53  ;;  %v7289_v53 = vmax.f32 %v7287_v8, %v7288_v5 }
 0xaff   : > { %v7267_v60 = vadd.f32 %v7235_v63, %v6803_v48  ;;  %v6806_v19 = vadd.f32 %v8955_v39, %v11690_v6  ;;  %v7300_v63 = vmax.f32 %v7298_v24, %v7299_v31  ;;  %v7338_v36 = vsel %vm1345_vm3, %v7269_v9, -inf  ;;  %v9010_v48 = vpop.f32.mrf.mxu0 }
 0xb00   : > { %v6719_v0 = vpop.f32.mrf.mxu1  ;;  %v7326_v51 = vmax.f32 %v7324_v56, %v7325_v59  ;;  %v7327_v39 = vsel %vm1345_vm3, %v7266_v44, -inf  ;;  %v7316_v31 = vrot.slane %v7315_v2, 4 }
 0xb01   : > { %v6804_v21 = vadd.f32 %v11690_v6, %v6719_v0  ;;  %v7335_v14 = vsel %vm1345_vm3, %v7267_v60, -inf  ;;  %v7270_v47 = vadd.f32 %v11715_v1, %v6806_v19  ;;  %v7302_v12 = vmax.f32 %v7300_v63, %v7301_v29  ;;  %v7114_v60 = vpop.f32.mrf.mxu0 }
 0xb02   : > { %v8958_v57 = vpop.f32.mrf.mxu1  ;;  %v7328_v22 = vmax.f32 %v7326_v51, %v7327_v39  ;;  %v7317_v3 = vmax.f32 %v7315_v2, %v7316_v31 }
 0xb03   : > { %v7268_v20 = vadd.f32 %v7236_v18, %v6804_v21  ;;  %v6809_v49 = vadd.f32 %v8958_v57, %v11690_v6  ;;  %v7340_v38 = vsel %vm1345_vm3, %v7270_v47, -inf  ;;  %v7303_v21 = vrot.slane %v7302_v12, 4  ;;  %v9011_v9 = vpop.f32.mrf.mxu0 }
 0xb04   : > { %v6732_v41 = vpop.f32.mrf.mxu1  ;;  %v7329_v56 = vrot.slane %v7328_v22, 4 }
 0xb05   : > { %v7336_v46 = vsel %vm1345_vm3, %v7268_v20, -inf  ;;  %v6807_v33 = vadd.f32 %v11690_v6, %v6732_v41  ;;  %v7273_v0 = vadd.f32 %v11719_v43, %v6809_v49  ;;  %v7304_v20 = vmax.f32 %v7302_v12, %v7303_v21  ;;  %v7117_v29 = vpop.f32.mrf.mxu0 }
 0xb06   : > { %v7337_v18 = vmax.f32 %v7335_v14, %v7336_v46  ;;  %v8959_v42 = vpop.f32.mrf.mxu1  ;;  %v7330_v46 = vmax.f32 %v7328_v22, %v7329_v56 }
 0xb07   : > { %v7271_v1 = vadd.f32 %v11726_v61, %v6807_v33  ;;  %v6810_v30 = vadd.f32 %v8959_v42, %v11690_v6  ;;  %v7206_v61 = vrot.slane %v7176_v15, %v11982_v58  ;;  %v7290_v15 = vrot.slane %v7289_v53, 4 }
 0xb08   : > { %v7339_v37 = vmax.f32 %v7337_v18, %v7338_v36  ;;  %v6735_v10 = vpop.f32.mrf.mxu1  ;;  %v7351_v27 = vsel %vm1345_vm3, %v7273_v0, -inf  ;;  %v7247_v42 = vadd.f32 %v11793_v62, %v7114_v60  ;;  %v7305_v34 = vrot.slane %v7304_v20, 2 }
 0xb09   : > { %v6808_v35 = vadd.f32 %v11690_v6, %v6735_v10  ;;  %v7348_v52 = vsel %vm1345_vm3, %v7271_v1, -inf  ;;  %v7274_v43 = vadd.f32 %v7242_v50, %v6810_v30  ;;  %v7245_v13 = vadd.f32 %v11721_v11, %v7206_v61 }
 0xb0a   : > { %v8962_v24 = vpop.f32.mrf.mxu1  ;;  %v7341_v26 = vmax.f32 %v7339_v37, %v7340_v38  ;;  %v7243_v58 = vadd.f32 %v7206_v61, %v11736_v28  ;;  %v7244_v25 = vadd.f32 %v7206_v61, %v7101_v17  ;;  %v7246_v28 = vadd.f32 %v11754_v40, %v7206_v61 }
 0xb0b   : > { %v7272_v55 = vadd.f32 %v11733_v32, %v6808_v35  ;;  %v6813_v45 = vadd.f32 %v8962_v24, %v11690_v6  ;;  %v7353_v59 = vsel %vm1345_vm3, %v7274_v43, -inf  ;;  %v7291_v14 = vmax.f32 %v7289_v53, %v7290_v15 }
 0xb0c   : > { %v6748_v16 = vpop.f32.mrf.mxu1  ;;  %v7342_v54 = vrot.slane %v7341_v26, 4  ;;  %v7249_v17 = vadd.f32 %v9010_v48, %v11793_v62  ;;  %v7318_v36 = vrot.slane %v7317_v3, 2  ;;  %v7331_v39 = vrot.slane %v7330_v46, 2 }
 0xb0d   : > { %v7349_v32 = vsel %vm1345_vm3, %v7272_v55, -inf  ;;  %v6811_v4 = vadd.f32 %v11690_v6, %v6748_v16  ;;  %v7277_v47 = vadd.f32 %v7245_v13, %v6813_v45  ;;  %v7292_v10 = vrot.slane %v7291_v14, 2 }
 0xb0e   : > { %v7350_v19 = vmax.f32 %v7348_v52, %v7349_v32  ;;  %v8963_v57 = vpop.f32.mrf.mxu1  ;;  %v7343_v51 = vmax.f32 %v7341_v26, %v7342_v54  ;;  %v7248_v35 = vadd.f32 %v11793_v62, %v7117_v29  ;;  %v7306_v24 = vmax.f32 %v7304_v20, %v7305_v34 }
 0xb0f   : > { %v7275_v11 = vadd.f32 %v7243_v58, %v6811_v4  ;;  %v6814_v41 = vadd.f32 %v8963_v57, %v11690_v6  ;;  %v7364_v22 = vsel %vm1345_vm3, %v7277_v47, -inf  ;;  %v7319_v50 = vmax.f32 %v7317_v3, %v7318_v36 }
 0xb10   : > { %v7352_v63 = vmax.f32 %v7350_v19, %v7351_v27  ;;  %v6751_v23 = vpop.f32.mrf.mxu1  ;;  %v7344_v53 = vrot.slane %v7343_v51, 2  ;;  %v7293_v16 = vmax.f32 %v7291_v14, %v7292_v10  ;;  %v7332_v52 = vmax.f32 %v7330_v46, %v7331_v39 }
 0xb11   : > { %v6812_v44 = vadd.f32 %v11690_v6, %v6751_v23  ;;  %v7361_v12 = vsel %vm1345_vm3, %v7275_v11, -inf  ;;  %v7278_v2 = vadd.f32 %v7246_v28, %v6814_v41  ;;  %v7250_v32 = vadd.f32 %v9011_v9, %v11793_v62 }
 0xb12   : > { %v7354_v33 = vmax.f32 %v7352_v63, %v7353_v59  ;;  %v8966_v8 = vpop.f32.mrf.mxu1  ;;  %v7345_v4 = vmax.f32 %v7343_v51, %v7344_v53  ;;  %v7307_v56 = vrot.slane %v7306_v24, 1  ;;  %v7320_v58 = vrot.slane %v7319_v50, 1 }
 0xb13   : > { %v7276_v18 = vadd.f32 %v7244_v25, %v6812_v44  ;;  %v6817_v38 = vadd.f32 %v8966_v8, %v11690_v6  ;;  %v7366_v61 = vsel %vm1345_vm3, %v7278_v2, -inf  ;;  %v7294_v25 = vrot.slane %v7293_v16, 1 }
 0xb14   : > { %v7355_v49 = vrot.slane %v7354_v33, 4  ;;  %v6764_v5 = vpop.f32.mrf.mxu1  ;;  %v7333_v20 = vrot.slane %v7332_v52, 1  ;;  %v7346_v63 = vrot.slane %v7345_v4, 1  ;;  %v7308_v62 = vmax.f32 %v7306_v24, %v7307_v56 }
 0xb15   : > { %v7362_v40 = vsel %vm1345_vm3, %v7276_v18, -inf  ;;  %v6815_v37 = vadd.f32 %v11690_v6, %v6764_v5  ;;  %v7281_v13 = vadd.f32 %v7249_v17, %v6817_v38  ;;  %v7321_v41 = vmax.f32 %v7319_v50, %v7320_v58 }
 0xb16   : > { %v7356_v48 = vmax.f32 %v7354_v33, %v7355_v49  ;;  %v7363_v1 = vmax.f32 %v7361_v12, %v7362_v40  ;;  %v8967_v30 = vpop.f32.mrf.mxu1  ;;  %v7295_v28 = vmax.f32 %v7293_v16, %v7294_v25  ;;  %v7334_v14 = vmax.f32 %v7332_v52, %v7333_v20 }
 0xb17   : > { %v7279_v60 = vadd.f32 %v7247_v42, %v6815_v37  ;;  %v6818_v21 = vadd.f32 %v8967_v30, %v11690_v6  ;;  %v7377_v23 = vsel %vm1345_vm3, %v7281_v13, -inf  ;;  %v7347_v8 = vmax.f32 %v7345_v4, %v7346_v63 }
 0xb18   : > { %v7357_v26 = vrot.slane %v7356_v48, 2  ;;  %v7365_v0 = vmax.f32 %v7363_v1, %v7364_v22  ;;  %v6767_v55 = vpop.f32.mrf.mxu1  ;;  %v7388_v17 = vpack.c.bf16 %v7308_v62, %v7308_v62  ;;  %v7389_v42 = vpack.c.bf16 %v7321_v41, %v7321_v41 }
 0xb19   : > { %v6816_v31 = vadd.f32 %v11690_v6, %v6767_v55  ;;  %v7374_v54 = vsel %vm1345_vm3, %v7279_v60, -inf  ;;  %v7282_v27 = vadd.f32 %v7250_v32, %v6818_v21  ;;  %v7387_v29 = vpack.c.bf16 %v7295_v28, %v7295_v28 }
 0xb1a   : > { %v7367_v43 = vmax.f32 %v7365_v0, %v7366_v61  ;;  %v7358_v19 = vmax.f32 %v7356_v48, %v7357_v26  ;;  %v7390_v34 = vpack.c.bf16 %v7334_v14, %v7334_v14  ;;  %v7391_v5 = vpack.c.bf16 %v7347_v8, %v7347_v8 }
 0xb1b   : > { %v7280_v15 = vadd.f32 %v7248_v35, %v6816_v31  ;;  %v7379_v44 = vsel %vm1345_vm3, %v7282_v27, -inf  ;;  %v7396_v12 = vmax.bf16 %v11968_v7, %v7388_v17  ;;  %v7397_v37 = vmax.bf16 %v11968_v7, %v7389_v42 }
 0xb1c   : > { %v7368_v57 = vrot.slane %v7367_v43, 4  ;;  %v7359_v9 = vrot.slane %v7358_v19, 1  ;;  %v7395_v39 = vmax.bf16 %v11968_v7, %v7387_v29  ;;  %v7398_v48 = vmax.bf16 %v11968_v7, %v7390_v34 }
 0xb1d   : > { %v7375_v45 = vsel %vm1345_vm3, %v7280_v15, -inf  ;;  %v7399_v30 = vmax.bf16 %v11968_v7, %v7391_v5  ;;  %v7423_v35 = vunpack.c.l.b16 %v7396_v12  ;;  %v7424_v38 = vunpack.c.l.b16 %v7397_v37 }
 0xb1e   : > { %v7369_v6 = vmax.f32 %v7367_v43, %v7368_v57  ;;  %v7376_v3 = vmax.f32 %v7374_v54, %v7375_v45  ;;  %v7360_v51 = vmax.f32 %v7358_v19, %v7359_v9  ;;  %v7422_v50 = vunpack.c.l.b16 %v7395_v39  ;;  %v8039_v57 = vld [vmem:[%s11903_s16] ss:$0 sm:$0xff] }
 0xb1f   : > { %v7425_v26 = vunpack.c.l.b16 %v7398_v48  ;;  %v7426_v55 = vunpack.c.l.b16 %v7399_v30 }
 0xb20   : > { %v7370_v59 = vrot.slane %v7369_v6, 2  ;;  %v7378_v11 = vmax.f32 %v7376_v3, %v7377_v23  ;;  %v7392_v2 = vpack.c.bf16 %v7360_v51, %v7360_v51  ;;  %v7430_v61 = vsel %vm2030_vm5, %v7423_v35, %v7422_v50 }
 0xb21   : > { %v7431_v31 = vsel %vm2032_vm6, %v7424_v38, %v7430_v61 }
 0xb22   : > { %v7371_v46 = vmax.f32 %v7369_v6, %v7370_v59  ;;  %v7380_v33 = vmax.f32 %v7378_v11, %v7379_v44  ;;  %v7400_v53 = vmax.bf16 %v11968_v7, %v7392_v2  ;;  %v7432_v52 = vsel %vm2034_vm7, %v7425_v26, %v7431_v31 }
 0xb23   : > { %v7433_v32 = vsel %vm2036_vm8, %v7426_v55, %v7432_v52 }
 0xb24   : > { %v7372_v47 = vrot.slane %v7371_v46, 1  ;;  %v7381_v18 = vrot.slane %v7380_v33, 4  ;;  %v7427_v60 = vunpack.c.l.b16 %v7400_v53 }
 0xb26   : > { %v7373_v36 = vmax.f32 %v7371_v46, %v7372_v47  ;;  %v7382_v49 = vmax.f32 %v7380_v33, %v7381_v18  ;;  %v7434_v4 = vsel %vm2038_vm9, %v7427_v60, %v7433_v32 }
 0xb28   : > { %v7383_v40 = vrot.slane %v7382_v49, 2  ;;  %v7393_v10 = vpack.c.bf16 %v7373_v36, %v7373_v36 }
 0xb2a   : > { %v7384_v1 = vmax.f32 %v7382_v49, %v7383_v40  ;;  %v7401_v24 = vmax.bf16 %v11968_v7, %v7393_v10 }
 0xb2c   : > { %v7385_v22 = vrot.slane %v7384_v1, 1  ;;  %v7428_v16 = vunpack.c.l.b16 %v7401_v24 }
 0xb2e   : > { %v7386_v0 = vmax.f32 %v7384_v1, %v7385_v22  ;;  %v7435_v15 = vsel %vm2040_vm10, %v7428_v16, %v7434_v4 }
 0xb30   : > { %v7394_v21 = vpack.c.bf16 %v7386_v0, %v7386_v0 }
 0xb32   : > { %v7402_v43 = vmax.bf16 %v11968_v7, %v7394_v21 }
 0xb34   : > { %v7429_v13 = vunpack.c.l.b16 %v7402_v43 }
 0xb36   : > { %v7436_v56 = vsel %vm2042_vm11, %v7429_v13, %v7435_v15 }
 0xb37   : > { %v7437_v19 = vpack.c.b16 %v7436_v56, %v7436_v56 }
 0xb39   : > { %9017 = vmatmul.mubr.msk.bf16.vlgmr.msra.gmra.mxu1 %vm1345_vm3, %v7437_v19 }
 0xbf9   : > { %v7487_v7 = vpop.f32.mrf.mxu1 }
 0xbfa   : > { %v7488_v58 = vadd.f32 %v8039_v57, %v7487_v7 }
 0xbfb   : > { %v9018_v54 = vpop.f32.mrf.mxu1 }
 0xbfc   : > { %7493 = vst [vmem:[%s609_s24] sm:$0xff] %v7488_v58 }
 0xbfd   : > { %v7490_v27 = vpop.f32.mrf.mxu1 }
 0xbfe   : > { %9328 = shalt.err (!%p9325_p0)
}
 0xbff   : > { %s9329_s19 = scalar_lea.hbm %s11846_s23, 128  ;;  %s9333_s20 = scalar_lea.hbm %s11904_s17, 256 }
 0xc00   : > { %p9330_p13 = scmp.ne.s32.totalorder %s11846_s23, %s9329_s19  ;;  %p9334_p9 = scmp.lt.s32.totalorder %s11846_s23, %s11904_s17 }
 0xc01   : > { %p9335_p12 = scmp.lt.s32.totalorder %s9333_s20, %s9329_s19 }
 0xc02   : > { %p9331_p1 = pnand %p9330_p13, %p11983_p7 }
 0xc03   : > { %p9336_p3 = por %p9335_p12, %p9334_p9 }
 0xc04   : > { %p9332_p2 = pneg %p9331_p1 }
 0xc06   : > { %p9337_p4 = pnand %p9336_p3, %p9332_p2 }
 0xc08   : > { %9340 = shalt.err (!%p9337_p4)
}
 0xc09   : > { %9041 = dma.vmem_to_hbm [thread:$0]  (%p11983_p7), %s11848_s26, 128, %s11846_s23, %s7495_s30   ;;  %v9019_v45 = vpop.f32.mrf.mxu1 }
 0xc0a PF: > { %s11984_s2 = sld [smem:[#allocation18_spill]] }
 0xc0b   : > { %s11985_s22 = sld [smem:[#allocation16_spill]] }
 0xc0c   : > { %s11986_s28 = sld [smem:[#allocation21_spill]] }
 0xc10   : > { %p9073_p5 = scmp.ge.s32.totalorder %s11984_s2, 2 }
 0xc11   : > { %s7520_s0 = sand.u32 1, %s11985_s22  }
 0xc12   : > { %p11987_p6 = scmp.ne.s32.totalorder %s11986_s28, 0  ;;  %s7521_s18 = scalar_lea.sflag [#allocation4], %s7520_s0 }
 0xc14   : > { %p9060_p10 = pnand %p9073_p5, %p11987_p6 }
 0xc16   : > { %p9061_p8 = pneg %p9060_p10 }
 0xc18   : > { %9370 = dma.done.wait (%p9061_p8), %s7521_s18, 128  }
 0xc19   : > { %9372 = vsyncadd (%p9061_p8), %s7521_s18, 4294967168  ;;  %s11988_s27 = sld [smem:[#allocation19_spill]]  ;;  %s11991_s24 = smov %s9379_s25 }
 0xc1a   : > { %s11989_s19 = sld [smem:[#allocation17_spill]] }
 0xc1b   : > { %s11990_s26 = sld [smem:[#allocation20_spill]] }
 0xc1f   : > { %p30_p11 = scmp.ge.s32.totalorder %s11988_s27, 4  }
 0xc20   : > { %s11992_s25 = smov %s11989_s19 }
 0xc21   :  { %32 = sbr.rel (!%p30_p11) target bundleno = 10 (0xa), region = 165 }
 0xc26   :  { %7526 = vsyncpa [#allocation3], 1 }
 0xc27   :  { %7528 = vsyncpa [#allocation3 + $0x1], 1 }
 0xc28   :  { %7529 = vsyncpa [#allocation6], 1 }
 0xc29   :  { %7530 = vsyncpa [#allocation9], 1 }
 0xc2a   :  { %7531 = vsyncpa [#allocation4], 1 }
 0xc2b   :  { %7533 = vsyncpa [#allocation4 + $0x1], 1 }

</bundles_post_ra>
